<compile_context>
chip_gen: v7x
topology: tpu7x:2x2x1
jax: 0.10.0
libtpu: 0.0.40
codegen_flags: <defaults>
</compile_context>

<pallas_src>
from functools import partial
import warnings

import numpy as np
import jax
import jax.numpy as jnp
from jax.experimental import pallas as pl
from jax.experimental.pallas import tpu as pltpu


def residual_attention_block_kernel(
    x_ref,
    wqkv_ref, bqkv_ref,
    wo_ref, bo_ref,
    g1_ref, be1_ref, g2_ref, be2_ref,
    wfc_ref, bfc_ref, wpr_ref, bpr_ref,
    o_ref,
    *, n_head,
):
    # B batch elements per grid step.
    xb = x_ref[...]                             # (B, L, D) float32
    B, L, D = xb.shape
    H = n_head
    hd = D // H
    eps = 1e-5
    cdt = wqkv_ref.dtype                        # matmul-input dtype (bf16)

    x = xb.reshape(B * L, D)                    # leading-dim collapse, layout no-op

    def layer_norm(v, g, b):                    # f32 throughout (v5e VPU has no bf16)
        mu = jnp.mean(v, axis=-1, keepdims=True)
        var = jnp.mean(jnp.square(v - mu), axis=-1, keepdims=True)
        return (v - mu) * jax.lax.rsqrt(var + eps) * g + b

    # ---------------- attention branch ----------------
    xn = layer_norm(x, g1_ref[...], be1_ref[...]).astype(cdt)
    # Fused QKV projection: one (B*L, D) x (D, 3D) MXU pass, f32 accumulation.
    # 1/sqrt(hd) is pre-folded into the Q columns of wqkv/bqkv (fold_qk_scale).
    qkv = jnp.dot(xn, wqkv_ref[...], preferred_element_type=jnp.float32) + bqkv_ref[...]

    def to_heads(t):                            # (B*L, D) -> (B*H, L, hd), one transpose
        return jnp.transpose(
            t.astype(cdt).reshape(B, L, H, hd), (0, 2, 1, 3)
        ).reshape(B * H, L, hd)

    qh = to_heads(qkv[:, 0 * D:1 * D])
    kh = to_heads(qkv[:, 1 * D:2 * D])
    vh = to_heads(qkv[:, 2 * D:3 * D])

    # Head-batched MXU contractions with a fused (B*H) batch axis.
    s = jnp.einsum('gqd,gkd->gqk', qh, kh,
                   preferred_element_type=jnp.float32)          # (B*H, L, L) f32
    s = s - jnp.max(s, axis=-1, keepdims=True)                  # stable softmax
    p = jnp.exp(s)
    p = p * pl.reciprocal(jnp.sum(p, axis=-1, keepdims=True), approx=True)
    oh = jnp.einsum('gqk,gkd->gqd', p.astype(cdt), vh,
                    preferred_element_type=jnp.float32)          # (B*H, L, hd) f32

    # Head merge: one transpose back + output projection.
    attn = jnp.transpose(oh.reshape(B, H, L, hd), (0, 2, 1, 3)).reshape(B * L, D)
    attn = jnp.dot(attn.astype(cdt), wo_ref[...],
                   preferred_element_type=jnp.float32) + bo_ref[...]
    x = x + attn

    # ---------------- MLP branch ----------------
    xn2 = layer_norm(x, g2_ref[...], be2_ref[...]).astype(cdt)
    h1 = jnp.dot(xn2, wfc_ref[...], preferred_element_type=jnp.float32) + bfc_ref[...]
    h1 = h1 * jax.nn.sigmoid(1.702 * h1)        # QuickGELU, f32
    h2 = jnp.dot(h1.astype(cdt), wpr_ref[...],
                 preferred_element_type=jnp.float32) + bpr_ref[...]
    o_ref[...] = (x + h2).reshape(B, L, D)


def _supports_pipeline_mode():
    """Feature-detect BlockSpec(pipeline_mode=pl.Buffered(1)) at construction time.

    Catches only the construction-level TypeError/ValueError (unknown kwarg /
    unsupported buffer count) so genuine lowering errors are never hidden here.
    """
    if not hasattr(pl, "Buffered"):
        return False
    try:
        pl.BlockSpec((8, 128), lambda i: (0, 0), pipeline_mode=pl.Buffered(1))
    except (TypeError, ValueError):
        return False
    return True


def _choose_step_batch_and_vmem(N, L, D, H, weight_bytes, step_batch=None):
    """Pick per-step batch B and a scoped-VMEM budget from the chip's VMEM capacity.

    v5e/v6e (128 MiB): budget ~100 MiB, B up to 8.
    v7x    (64 MiB) : budget ~51 MiB, B capped at 2 (leaves compiler-scratch headroom).
    """
    try:
        vmem_cap = int(pltpu.get_tpu_info().vmem_capacity_bytes)
    except Exception:
        vmem_cap = 64 * 1024 * 1024             # conservative: v7x per-TensorCore VMEM
    budget = min(int(vmem_cap * 0.80), 104 * 1024 * 1024)
    b_cap = 8 if vmem_cap >= 100 * 1024 * 1024 else 2

    if step_batch is not None:
        return max(1, min(int(step_batch), N)), budget

    def fits(b):
        scores = b * H * L * L * 4              # (B*H, L, L) f32 scores
        probs = b * H * L * L * 4               # exp/p temp
        mlp = b * L * (4 * D) * 4 * 2           # f32 intermediate + bf16 copy headroom
        xio = 2 * (2 * b * L * D * 4)           # double-buffered (B,L,D) f32 in + out blocks
        act = b * L * (3 * D) * 4 * 2           # qkv f32 + head-major bf16 copies (rough)
        return weight_bytes + scores + probs + mlp + xio + act <= int(budget * 0.75)

    B = 1
    for cand in range(1, min(N, b_cap) + 1):
        if fits(cand):
            B = cand
    return B, budget


def residual_attention_block(x_lnd, params, n_head, *, step_batch=None):
    """x_lnd: (L, N, D) like PyTorch MultiheadAttention (batch_first=False).

    `params` must already have the 1/sqrt(head_dim) scale folded into the Q part of
    the fused QKV weight/bias (see fold_qk_scale).
    """
    L, N, D = x_lnd.shape
    assert D % n_head == 0, "d_model must be divisible by n_head"
    param_list = list(params)

    # NOTE: the (L, N, D) <-> (N, L, D) layout change stays in the wrapper.  Indexing
    # the (L, N, D) array directly would need a narrow block on the second-minor
    # (batch) axis, which does not satisfy the (8, 128) block-divisibility rule for
    # arbitrary N, so we keep the transpose outside the kernel for portability.
    x = jnp.transpose(x_lnd, (1, 0, 2))         # -> (N, L, D)

    weight_bytes = sum(int(np.prod(p.shape)) * int(p.dtype.itemsize) for p in param_list)
    B, vmem_limit = _choose_step_batch_and_vmem(N, L, D, n_head, weight_bytes, step_batch)

    n_blocks = pl.cdiv(N, B)
    n_pad = n_blocks * B
    if n_pad != N:
        # Pad the batch axis so each grid step sees a full (B, L, D) block; padded
        # rows are dropped after the call (LayerNorm of zeros is finite).
        x = jnp.concatenate([x, jnp.zeros((n_pad - N, L, D), x.dtype)], axis=0)

    use_single_buffer = _supports_pipeline_mode()

    def build(single_buffer_weights):
        def weight_spec(a):
            # Grid-invariant blocks (constant index_map): DMA'd once for the whole
            # grid.  Single buffering halves resident weight VMEM (matters for real
            # CLIP sizes on v7x's 64 MiB VMEM).
            kwargs = {}
            if single_buffer_weights:
                kwargs["pipeline_mode"] = pl.Buffered(1)
            return pl.BlockSpec(a.shape, lambda i, _nd=a.ndim: (0,) * _nd, **kwargs)

        in_specs = [pl.BlockSpec((B, L, D), lambda i: (i, 0, 0))]
        in_specs += [weight_spec(p) for p in param_list]

        return pl.pallas_call(
            partial(residual_attention_block_kernel, n_head=n_head),
            out_shape=jax.ShapeDtypeStruct((n_pad, L, D), jnp.float32),
            grid=(n_blocks,),
            in_specs=in_specs,
            out_specs=pl.BlockSpec((B, L, D), lambda i: (i, 0, 0)),
            compiler_params=pltpu.CompilerParams(
                # Batch-block axis is independent; "parallel" lets megacore / v7x's
                # two TensorCores shard it.
                dimension_semantics=("parallel",),
                vmem_limit_bytes=int(vmem_limit),
            ),
        )

    if use_single_buffer:
        try:
            out = build(True)(x, *param_list)
        except Exception as e:  # noqa: BLE001 - only around the Buffered(1) variant; loud.
            warnings.warn(
                "Single-buffered weight specs (pl.Buffered(1)) failed to lower/run "
                f"({type(e).__name__}: {e}); retrying with default double-buffered "
                "weights. NOTE: this doubles resident weight VMEM and may not fit "
                "on v7x at real CLIP sizes.",
                RuntimeWarning,
            )
            out = build(False)(x, *param_list)
    else:
        out = build(False)(x, *param_list)

    out = out[:N]
    return jnp.transpose(out, (1, 0, 2))        # back to (L, N, D)


def fold_qk_scale(params, n_head):
    """Fold the 1/sqrt(head_dim) softmax scale into the Q columns of Wqkv / bqkv.

    One-time weight fold (not a per-call activation pre-scale); mathematically
    identical to PyTorch's q-scaling inside MultiheadAttention.
    """
    (wqkv, bqkv, *rest) = params
    D = wqkv.shape[0]
    hd = D // n_head
    scale = float(hd) ** -0.5
    w = wqkv.astype(jnp.float32)
    w = w.at[:, :D].multiply(scale)
    b = bqkv.astype(jnp.float32)
    b = b.at[:, :D].multiply(scale)
    return (w.astype(wqkv.dtype), b.astype(bqkv.dtype), *rest)


def reference_block(x_lnd, params, n_head):
    """Pure-JAX f32 reference (mirrors nn.MultiheadAttention + CLIP MLP).

    Takes the UNFOLDED params (scale applied explicitly, like PyTorch).
    """
    (Wqkv, bqkv, Wo, bo, g1, b1, g2, b2, Wfc, bfc, Wpr, bpr) = [
        jnp.asarray(p, jnp.float32) for p in params]

    def ln(v, g, b):
        mu = v.mean(-1, keepdims=True)
        var = ((v - mu) ** 2).mean(-1, keepdims=True)
        return (v - mu) / jnp.sqrt(var + 1e-5) * g + b

    x = jnp.transpose(x_lnd, (1, 0, 2))        # (N, L, D)
    N, L, D = x.shape
    H, hd = n_head, D // n_head

    xn = ln(x, g1, b1)
    qkv = xn @ Wqkv + bqkv
    q, k, v = qkv[..., :D], qkv[..., D:2 * D], qkv[..., 2 * D:]
    qh = q.reshape(N, L, H, hd).transpose(0, 2, 1, 3)
    kh = k.reshape(N, L, H, hd).transpose(0, 2, 1, 3)
    vh = v.reshape(N, L, H, hd).transpose(0, 2, 1, 3)
    s = jnp.einsum('nhqd,nhkd->nhqk', qh, kh) / jnp.sqrt(jnp.float32(hd))
    p = jax.nn.softmax(s, axis=-1)
    a = jnp.einsum('nhqk,nhkd->nhqd', p, vh).transpose(0, 2, 1, 3).reshape(N, L, D)
    x = x + (a @ Wo + bo)

    xn2 = ln(x, g2, b2)
    h1 = xn2 @ Wfc + bfc
    h1 = h1 * jax.nn.sigmoid(1.702 * h1)
    x = x + (h1 @ Wpr + bpr)
    return jnp.transpose(x, (1, 0, 2))


def make_params(key, d_model, weight_dtype=jnp.bfloat16):
    """Deterministic synthetic parameters (shapes follow the nn.Module __init__).

    Matmul weights are pre-transposed (x @ W) and stored in bf16; biases and
    LayerNorm affine params stay f32 (added / applied on the f32 path).
    Returns UNFOLDED params; apply fold_qk_scale before calling the kernel.
    """
    d4 = 4 * d_model
    ks = jax.random.split(key, 8)
    std = 0.02
    # nn.MultiheadAttention: in_proj_weight (3D, D), in_proj_bias (3D) -> fused (D, 3D).
    in_proj_w = jax.random.normal(ks[0], (3 * d_model, d_model), jnp.float32) * std
    in_proj_b = jax.random.normal(ks[1], (3 * d_model,), jnp.float32) * std
    Wqkv = in_proj_w.T.astype(weight_dtype)                     # (D, 3D)
    bqkv = in_proj_b.reshape(1, 3 * d_model)                    # f32
    Wo = (jax.random.normal(ks[2], (d_model, d_model), jnp.float32) * std).T.astype(weight_dtype)
    bo = (jax.random.normal(ks[3], (d_model,), jnp.float32) * std).reshape(1, d_model)
    # LayerNorms (gamma=1, beta=0 at init, like PyTorch).
    g1 = jnp.ones((1, d_model), jnp.float32)
    b1 = jnp.zeros((1, d_model), jnp.float32)
    g2 = jnp.ones((1, d_model), jnp.float32)
    b2 = jnp.zeros((1, d_model), jnp.float32)
    # MLP: c_fc (4D, D), c_proj (D, 4D) -> pre-transposed for x @ W.
    Wfc = (jax.random.normal(ks[4], (d4, d_model), jnp.float32) * std).T.astype(weight_dtype)
    bfc = (jax.random.normal(ks[5], (d4,), jnp.float32) * std).reshape(1, d4)
    Wpr = (jax.random.normal(ks[6], (d_model, d4), jnp.float32) * std).T.astype(weight_dtype)
    bpr = (jax.random.normal(ks[7], (d_model,), jnp.float32) * std).reshape(1, d_model)
    return (Wqkv, bqkv, Wo, bo, g1, b1, g2, b2, Wfc, bfc, Wpr, bpr)


if __name__ == "__main__":
    # Small shapes consistent with the module's forward: (seq, batch, d_model).
    L, N, D, H = 8, 2, 32, 4
    key = jax.random.PRNGKey(0)
    kx, kp = jax.random.split(key)
    x = jax.random.normal(kx, (L, N, D), jnp.float32)
    params = make_params(kp, D)
    kernel_params = fold_qk_scale(params, H)    # one-time weight fold for the kernel

    out = residual_attention_block(x, kernel_params, n_head=H)
    out = jax.block_until_ready(out)

    ref = reference_block(x, params, n_head=H)
    # bf16 matmul inputs + approx reciprocal vs. full-f32 reference -> loose tolerance.
    np.testing.assert_allclose(np.asarray(out), np.asarray(ref), rtol=1e-2, atol=1e-2)

    print("KERNEL_OK")
</pallas_src>

<mosaic_0001>
module attributes {stable_mosaic.version = 11 : i64} {
  func.func @residual_attention_block_kernel(%arg0: i32, %arg1: memref<2x8x32xf32, #tpu.memory_space<vmem>>, %arg2: memref<32x96xbf16, #tpu.memory_space<vmem>>, %arg3: memref<1x96xf32, #tpu.memory_space<vmem>>, %arg4: memref<32x32xbf16, #tpu.memory_space<vmem>>, %arg5: memref<1x32xf32, #tpu.memory_space<vmem>>, %arg6: memref<1x32xf32, #tpu.memory_space<vmem>>, %arg7: memref<1x32xf32, #tpu.memory_space<vmem>>, %arg8: memref<1x32xf32, #tpu.memory_space<vmem>>, %arg9: memref<1x32xf32, #tpu.memory_space<vmem>>, %arg10: memref<32x128xbf16, #tpu.memory_space<vmem>>, %arg11: memref<1x128xf32, #tpu.memory_space<vmem>>, %arg12: memref<128x32xbf16, #tpu.memory_space<vmem>>, %arg13: memref<1x32xf32, #tpu.memory_space<vmem>>, %arg14: memref<2x8x32xf32, #tpu.memory_space<vmem>>) attributes {dimension_semantics = [#tpu.dimension_semantics<parallel>], iteration_bounds = array<i64: 1>, scalar_prefetch = 0 : i64, scratch_operands = 0 : i64, tpu.core_type = #tpu.core_type<tc>, window_params = [{transform_indices = @transform_0, window_bounds = array<i64: 2, 8, 32>}, {pipeline_mode = #tpu.pipeline_mode<synchronous>, transform_indices = @transform_1, window_bounds = array<i64: 32, 96>}, {pipeline_mode = #tpu.pipeline_mode<synchronous>, transform_indices = @transform_2, window_bounds = array<i64: 1, 96>}, {pipeline_mode = #tpu.pipeline_mode<synchronous>, transform_indices = @transform_3, window_bounds = array<i64: 32, 32>}, {pipeline_mode = #tpu.pipeline_mode<synchronous>, transform_indices = @transform_4, window_bounds = array<i64: 1, 32>}, {pipeline_mode = #tpu.pipeline_mode<synchronous>, transform_indices = @transform_5, window_bounds = array<i64: 1, 32>}, {pipeline_mode = #tpu.pipeline_mode<synchronous>, transform_indices = @transform_6, window_bounds = array<i64: 1, 32>}, {pipeline_mode = #tpu.pipeline_mode<synchronous>, transform_indices = @transform_7, window_bounds = array<i64: 1, 32>}, {pipeline_mode = #tpu.pipeline_mode<synchronous>, transform_indices = @transform_8, window_bounds = array<i64: 1, 32>}, {pipeline_mode = #tpu.pipeline_mode<synchronous>, transform_indices = @transform_9, window_bounds = array<i64: 32, 128>}, {pipeline_mode = #tpu.pipeline_mode<synchronous>, transform_indices = @transform_10, window_bounds = array<i64: 1, 128>}, {pipeline_mode = #tpu.pipeline_mode<synchronous>, transform_indices = @transform_11, window_bounds = array<i64: 128, 32>}, {pipeline_mode = #tpu.pipeline_mode<synchronous>, transform_indices = @transform_12, window_bounds = array<i64: 1, 32>}, {transform_indices = @transform_13, window_bounds = array<i64: 2, 8, 32>}]} {
    %c0 = arith.constant 0 : index
    %c0_0 = arith.constant 0 : index
    %c0_1 = arith.constant 0 : index
    %0 = vector.load %arg1[%c0, %c0_0, %c0_1] : memref<2x8x32xf32, #tpu.memory_space<vmem>>, vector<2x8x32xf32>
    %1 = vector.shape_cast %0 : vector<2x8x32xf32> to vector<16x32xf32>
    %c0_2 = arith.constant 0 : index
    %c0_3 = arith.constant 0 : index
    %2 = vector.load %arg6[%c0_2, %c0_3] : memref<1x32xf32, #tpu.memory_space<vmem>>, vector<1x32xf32>
    %c0_4 = arith.constant 0 : index
    %c0_5 = arith.constant 0 : index
    %3 = vector.load %arg7[%c0_4, %c0_5] : memref<1x32xf32, #tpu.memory_space<vmem>>, vector<1x32xf32>
    %cst = arith.constant dense<0.000000e+00> : vector<16xf32>
    %4 = vector.multi_reduction <add>, %1, %cst [1] : vector<16x32xf32> to vector<16xf32>
    %5 = vector.shape_cast %4 : vector<16xf32> to vector<16x1xf32>
    %cst_6 = arith.constant 3.200000e+01 : f32
    %6 = vector.broadcast %cst_6 : f32 to vector<16x1xf32>
    %7 = arith.divf %5, %6 : vector<16x1xf32>
    %8 = vector.broadcast %7 : vector<16x1xf32> to vector<16x32xf32>
    %9 = arith.subf %1, %8 : vector<16x32xf32>
    %10 = arith.mulf %9, %9 : vector<16x32xf32>
    %cst_7 = arith.constant dense<0.000000e+00> : vector<16xf32>
    %11 = vector.multi_reduction <add>, %10, %cst_7 [1] : vector<16x32xf32> to vector<16xf32>
    %12 = vector.shape_cast %11 : vector<16xf32> to vector<16x1xf32>
    %cst_8 = arith.constant 3.200000e+01 : f32
    %13 = vector.broadcast %cst_8 : f32 to vector<16x1xf32>
    %14 = arith.divf %12, %13 : vector<16x1xf32>
    %15 = vector.broadcast %7 : vector<16x1xf32> to vector<16x32xf32>
    %16 = arith.subf %1, %15 : vector<16x32xf32>
    %cst_9 = arith.constant 9.99999974E-6 : f32
    %17 = vector.broadcast %cst_9 : f32 to vector<16x1xf32>
    %18 = arith.addf %14, %17 : vector<16x1xf32>
    %19 = math.rsqrt %18 : vector<16x1xf32>
    %20 = vector.broadcast %19 : vector<16x1xf32> to vector<16x32xf32>
    %21 = arith.mulf %16, %20 : vector<16x32xf32>
    %22 = vector.broadcast %2 : vector<1x32xf32> to vector<16x32xf32>
    %23 = arith.mulf %21, %22 : vector<16x32xf32>
    %24 = vector.broadcast %3 : vector<1x32xf32> to vector<16x32xf32>
    %25 = arith.addf %23, %24 : vector<16x32xf32>
    %26 = arith.truncf %25 : vector<16x32xf32> to vector<16x32xbf16>
    %c0_10 = arith.constant 0 : index
    %c0_11 = arith.constant 0 : index
    %27 = vector.load %arg2[%c0_10, %c0_11] : memref<32x96xbf16, #tpu.memory_space<vmem>>, vector<32x96xbf16>
    %cst_12 = arith.constant dense<0.000000e+00> : vector<16x96xf32>
    %28 = tpu.matmul %26, %27, %cst_12 {dimension_numbers = #tpu.dot_dimension_numbers<[1], [0], [0], [1], [0, 0, 1, 1], [], []>} : vector<16x32xbf16>, vector<32x96xbf16>, vector<16x96xf32> -> vector<16x96xf32>
    %c0_13 = arith.constant 0 : index
    %c0_14 = arith.constant 0 : index
    %29 = vector.load %arg3[%c0_13, %c0_14] : memref<1x96xf32, #tpu.memory_space<vmem>>, vector<1x96xf32>
    %30 = vector.broadcast %29 : vector<1x96xf32> to vector<16x96xf32>
    %31 = arith.addf %28, %30 : vector<16x96xf32>
    %32 = vector.extract_strided_slice %31 {offsets = [0, 0], sizes = [16, 32], strides = [1, 1]} : vector<16x96xf32> to vector<16x32xf32>
    %33 = arith.truncf %32 : vector<16x32xf32> to vector<16x32xbf16>
    %34 = vector.shape_cast %33 : vector<16x32xbf16> to vector<2x8x4x8xbf16>
    %35 = tpu.transpose %34, [0, 2, 1, 3] : vector<2x8x4x8xbf16> -> vector<2x4x8x8xbf16>
    %36 = vector.shape_cast %35 : vector<2x4x8x8xbf16> to vector<8x8x8xbf16>
    %37 = vector.extract_strided_slice %31 {offsets = [0, 32], sizes = [16, 32], strides = [1, 1]} : vector<16x96xf32> to vector<16x32xf32>
    %38 = arith.truncf %37 : vector<16x32xf32> to vector<16x32xbf16>
    %39 = vector.shape_cast %38 : vector<16x32xbf16> to vector<2x8x4x8xbf16>
    %40 = tpu.transpose %39, [0, 2, 1, 3] : vector<2x8x4x8xbf16> -> vector<2x4x8x8xbf16>
    %41 = vector.shape_cast %40 : vector<2x4x8x8xbf16> to vector<8x8x8xbf16>
    %42 = vector.extract_strided_slice %31 {offsets = [0, 64], sizes = [16, 32], strides = [1, 1]} : vector<16x96xf32> to vector<16x32xf32>
    %43 = arith.truncf %42 : vector<16x32xf32> to vector<16x32xbf16>
    %44 = vector.shape_cast %43 : vector<16x32xbf16> to vector<2x8x4x8xbf16>
    %45 = tpu.transpose %44, [0, 2, 1, 3] : vector<2x8x4x8xbf16> -> vector<2x4x8x8xbf16>
    %46 = vector.shape_cast %45 : vector<2x4x8x8xbf16> to vector<8x8x8xbf16>
    "tpu.trace_start"() <{level = 10 : i32, message = "gqd,gkd->gqk"}> : () -> ()
    %cst_15 = arith.constant dense<0.000000e+00> : vector<8x8x8xf32>
    %47 = tpu.matmul %36, %41, %cst_15 {dimension_numbers = #tpu.dot_dimension_numbers<[2], [2], [1], [1], [0, 0, 0, 1, 1, 1], [0], [0]>} : vector<8x8x8xbf16>, vector<8x8x8xbf16>, vector<8x8x8xf32> -> vector<8x8x8xf32>
    "tpu.trace_stop"() : () -> ()
    %cst_16 = arith.constant dense<0xFF800000> : vector<8x8xf32>
    %48 = vector.multi_reduction <maximumf>, %47, %cst_16 [2] : vector<8x8x8xf32> to vector<8x8xf32>
    %49 = vector.shape_cast %48 : vector<8x8xf32> to vector<8x8x1xf32>
    %50 = vector.broadcast %49 : vector<8x8x1xf32> to vector<8x8x8xf32>
    %51 = arith.subf %47, %50 : vector<8x8x8xf32>
    %52 = math.exp %51 : vector<8x8x8xf32>
    %cst_17 = arith.constant dense<0.000000e+00> : vector<8x8xf32>
    %53 = vector.multi_reduction <add>, %52, %cst_17 [2] : vector<8x8x8xf32> to vector<8x8xf32>
    %54 = vector.shape_cast %53 : vector<8x8xf32> to vector<8x8x1xf32>
    %55 = tpu.reciprocal %54 {approx = true} : vector<8x8x1xf32> -> vector<8x8x1xf32>
    %56 = vector.broadcast %55 : vector<8x8x1xf32> to vector<8x8x8xf32>
    %57 = arith.mulf %52, %56 : vector<8x8x8xf32>
    %58 = arith.truncf %57 : vector<8x8x8xf32> to vector<8x8x8xbf16>
    "tpu.trace_start"() <{level = 10 : i32, message = "gqk,gkd->gqd"}> : () -> ()
    %cst_18 = arith.constant dense<0.000000e+00> : vector<8x8x8xf32>
    %59 = tpu.matmul %58, %46, %cst_18 {dimension_numbers = #tpu.dot_dimension_numbers<[2], [1], [1], [2], [0, 0, 0, 1, 1, 2], [0], [0]>} : vector<8x8x8xbf16>, vector<8x8x8xbf16>, vector<8x8x8xf32> -> vector<8x8x8xf32>
    "tpu.trace_stop"() : () -> ()
    %60 = vector.shape_cast %59 : vector<8x8x8xf32> to vector<2x4x8x8xf32>
    %61 = tpu.transpose %60, [0, 2, 1, 3] : vector<2x4x8x8xf32> -> vector<2x8x4x8xf32>
    %62 = vector.shape_cast %61 : vector<2x8x4x8xf32> to vector<16x32xf32>
    %63 = arith.truncf %62 : vector<16x32xf32> to vector<16x32xbf16>
    %c0_19 = arith.constant 0 : index
    %c0_20 = arith.constant 0 : index
    %64 = vector.load %arg4[%c0_19, %c0_20] : memref<32x32xbf16, #tpu.memory_space<vmem>>, vector<32x32xbf16>
    %cst_21 = arith.constant dense<0.000000e+00> : vector<16x32xf32>
    %65 = tpu.matmul %63, %64, %cst_21 {dimension_numbers = #tpu.dot_dimension_numbers<[1], [0], [0], [1], [0, 0, 1, 1], [], []>} : vector<16x32xbf16>, vector<32x32xbf16>, vector<16x32xf32> -> vector<16x32xf32>
    %c0_22 = arith.constant 0 : index
    %c0_23 = arith.constant 0 : index
    %66 = vector.load %arg5[%c0_22, %c0_23] : memref<1x32xf32, #tpu.memory_space<vmem>>, vector<1x32xf32>
    %67 = vector.broadcast %66 : vector<1x32xf32> to vector<16x32xf32>
    %68 = arith.addf %65, %67 : vector<16x32xf32>
    %69 = arith.addf %1, %68 : vector<16x32xf32>
    %c0_24 = arith.constant 0 : index
    %c0_25 = arith.constant 0 : index
    %70 = vector.load %arg8[%c0_24, %c0_25] : memref<1x32xf32, #tpu.memory_space<vmem>>, vector<1x32xf32>
    %c0_26 = arith.constant 0 : index
    %c0_27 = arith.constant 0 : index
    %71 = vector.load %arg9[%c0_26, %c0_27] : memref<1x32xf32, #tpu.memory_space<vmem>>, vector<1x32xf32>
    %cst_28 = arith.constant dense<0.000000e+00> : vector<16xf32>
    %72 = vector.multi_reduction <add>, %69, %cst_28 [1] : vector<16x32xf32> to vector<16xf32>
    %73 = vector.shape_cast %72 : vector<16xf32> to vector<16x1xf32>
    %cst_29 = arith.constant 3.200000e+01 : f32
    %74 = vector.broadcast %cst_29 : f32 to vector<16x1xf32>
    %75 = arith.divf %73, %74 : vector<16x1xf32>
    %76 = vector.broadcast %75 : vector<16x1xf32> to vector<16x32xf32>
    %77 = arith.subf %69, %76 : vector<16x32xf32>
    %78 = arith.mulf %77, %77 : vector<16x32xf32>
    %cst_30 = arith.constant dense<0.000000e+00> : vector<16xf32>
    %79 = vector.multi_reduction <add>, %78, %cst_30 [1] : vector<16x32xf32> to vector<16xf32>
    %80 = vector.shape_cast %79 : vector<16xf32> to vector<16x1xf32>
    %cst_31 = arith.constant 3.200000e+01 : f32
    %81 = vector.broadcast %cst_31 : f32 to vector<16x1xf32>
    %82 = arith.divf %80, %81 : vector<16x1xf32>
    %83 = vector.broadcast %75 : vector<16x1xf32> to vector<16x32xf32>
    %84 = arith.subf %69, %83 : vector<16x32xf32>
    %cst_32 = arith.constant 9.99999974E-6 : f32
    %85 = vector.broadcast %cst_32 : f32 to vector<16x1xf32>
    %86 = arith.addf %82, %85 : vector<16x1xf32>
    %87 = math.rsqrt %86 : vector<16x1xf32>
    %88 = vector.broadcast %87 : vector<16x1xf32> to vector<16x32xf32>
    %89 = arith.mulf %84, %88 : vector<16x32xf32>
    %90 = vector.broadcast %70 : vector<1x32xf32> to vector<16x32xf32>
    %91 = arith.mulf %89, %90 : vector<16x32xf32>
    %92 = vector.broadcast %71 : vector<1x32xf32> to vector<16x32xf32>
    %93 = arith.addf %91, %92 : vector<16x32xf32>
    %94 = arith.truncf %93 : vector<16x32xf32> to vector<16x32xbf16>
    %c0_33 = arith.constant 0 : index
    %c0_34 = arith.constant 0 : index
    %95 = vector.load %arg10[%c0_33, %c0_34] : memref<32x128xbf16, #tpu.memory_space<vmem>>, vector<32x128xbf16>
    %cst_35 = arith.constant dense<0.000000e+00> : vector<16x128xf32>
    %96 = tpu.matmul %94, %95, %cst_35 {dimension_numbers = #tpu.dot_dimension_numbers<[1], [0], [0], [1], [0, 0, 1, 1], [], []>} : vector<16x32xbf16>, vector<32x128xbf16>, vector<16x128xf32> -> vector<16x128xf32>
    %c0_36 = arith.constant 0 : index
    %c0_37 = arith.constant 0 : index
    %97 = vector.load %arg11[%c0_36, %c0_37] : memref<1x128xf32, #tpu.memory_space<vmem>>, vector<1x128xf32>
    %98 = vector.broadcast %97 : vector<1x128xf32> to vector<16x128xf32>
    %99 = arith.addf %96, %98 : vector<16x128xf32>
    %cst_38 = arith.constant 1.702000e+00 : f32
    %100 = vector.broadcast %cst_38 : f32 to vector<16x128xf32>
    %101 = arith.mulf %100, %99 : vector<16x128xf32>
    %102 = arith.negf %101 : vector<16x128xf32>
    %103 = math.exp %102 : vector<16x128xf32>
    %cst_39 = arith.constant 1.000000e+00 : f32
    %104 = vector.broadcast %cst_39 : f32 to vector<16x128xf32>
    %105 = arith.addf %104, %103 : vector<16x128xf32>
    %106 = arith.divf %104, %105 : vector<16x128xf32>
    %107 = arith.mulf %99, %106 : vector<16x128xf32>
    %108 = arith.truncf %107 : vector<16x128xf32> to vector<16x128xbf16>
    %c0_40 = arith.constant 0 : index
    %c0_41 = arith.constant 0 : index
    %109 = vector.load %arg12[%c0_40, %c0_41] : memref<128x32xbf16, #tpu.memory_space<vmem>>, vector<128x32xbf16>
    %cst_42 = arith.constant dense<0.000000e+00> : vector<16x32xf32>
    %110 = tpu.matmul %108, %109, %cst_42 {dimension_numbers = #tpu.dot_dimension_numbers<[1], [0], [0], [1], [0, 0, 1, 1], [], []>} : vector<16x128xbf16>, vector<128x32xbf16>, vector<16x32xf32> -> vector<16x32xf32>
    %c0_43 = arith.constant 0 : index
    %c0_44 = arith.constant 0 : index
    %111 = vector.load %arg13[%c0_43, %c0_44] : memref<1x32xf32, #tpu.memory_space<vmem>>, vector<1x32xf32>
    %112 = vector.broadcast %111 : vector<1x32xf32> to vector<16x32xf32>
    %113 = arith.addf %110, %112 : vector<16x32xf32>
    %114 = arith.addf %69, %113 : vector<16x32xf32>
    %115 = vector.shape_cast %114 : vector<16x32xf32> to vector<2x8x32xf32>
    %c0_45 = arith.constant 0 : index
    %c0_46 = arith.constant 0 : index
    %c0_47 = arith.constant 0 : index
    %116 = vector.load %arg14[%c0_45, %c0_46, %c0_47] : memref<2x8x32xf32, #tpu.memory_space<vmem>>, vector<2x8x32xf32>
    tpu.vector_store %arg14[%c0_45, %c0_46, %c0_47], %115 {strides = array<i32>} : memref<2x8x32xf32, #tpu.memory_space<vmem>>, vector<2x8x32xf32>,
    return
  }
  func.func @transform_0(%arg0: i32) -> (i32, i32, i32) {
    %c0_i32 = arith.constant 0 : i32
    %c0_i32_0 = arith.constant 0 : i32
    %c0_i32_1 = arith.constant 0 : i32
    return %arg0, %c0_i32, %c0_i32_0 : i32, i32, i32
  }
  func.func @transform_1(%arg0: i32) -> (i32, i32) {
    %c0_i32 = arith.constant 0 : i32
    %c0_i32_0 = arith.constant 0 : i32
    %c0_i32_1 = arith.constant 0 : i32
    return %c0_i32, %c0_i32_0 : i32, i32
  }
  func.func @transform_2(%arg0: i32) -> (i32, i32) {
    %c0_i32 = arith.constant 0 : i32
    %c0_i32_0 = arith.constant 0 : i32
    %c0_i32_1 = arith.constant 0 : i32
    return %c0_i32, %c0_i32_0 : i32, i32
  }
  func.func @transform_3(%arg0: i32) -> (i32, i32) {
    %c0_i32 = arith.constant 0 : i32
    %c0_i32_0 = arith.constant 0 : i32
    %c0_i32_1 = arith.constant 0 : i32
    return %c0_i32, %c0_i32_0 : i32, i32
  }
  func.func @transform_4(%arg0: i32) -> (i32, i32) {
    %c0_i32 = arith.constant 0 : i32
    %c0_i32_0 = arith.constant 0 : i32
    %c0_i32_1 = arith.constant 0 : i32
    return %c0_i32, %c0_i32_0 : i32, i32
  }
  func.func @transform_5(%arg0: i32) -> (i32, i32) {
    %c0_i32 = arith.constant 0 : i32
    %c0_i32_0 = arith.constant 0 : i32
    %c0_i32_1 = arith.constant 0 : i32
    return %c0_i32, %c0_i32_0 : i32, i32
  }
  func.func @transform_6(%arg0: i32) -> (i32, i32) {
    %c0_i32 = arith.constant 0 : i32
    %c0_i32_0 = arith.constant 0 : i32
    %c0_i32_1 = arith.constant 0 : i32
    return %c0_i32, %c0_i32_0 : i32, i32
  }
  func.func @transform_7(%arg0: i32) -> (i32, i32) {
    %c0_i32 = arith.constant 0 : i32
    %c0_i32_0 = arith.constant 0 : i32
    %c0_i32_1 = arith.constant 0 : i32
    return %c0_i32, %c0_i32_0 : i32, i32
  }
  func.func @transform_8(%arg0: i32) -> (i32, i32) {
    %c0_i32 = arith.constant 0 : i32
    %c0_i32_0 = arith.constant 0 : i32
    %c0_i32_1 = arith.constant 0 : i32
    return %c0_i32, %c0_i32_0 : i32, i32
  }
  func.func @transform_9(%arg0: i32) -> (i32, i32) {
    %c0_i32 = arith.constant 0 : i32
    %c0_i32_0 = arith.constant 0 : i32
    %c0_i32_1 = arith.constant 0 : i32
    return %c0_i32, %c0_i32_0 : i32, i32
  }
  func.func @transform_10(%arg0: i32) -> (i32, i32) {
    %c0_i32 = arith.constant 0 : i32
    %c0_i32_0 = arith.constant 0 : i32
    %c0_i32_1 = arith.constant 0 : i32
    return %c0_i32, %c0_i32_0 : i32, i32
  }
  func.func @transform_11(%arg0: i32) -> (i32, i32) {
    %c0_i32 = arith.constant 0 : i32
    %c0_i32_0 = arith.constant 0 : i32
    %c0_i32_1 = arith.constant 0 : i32
    return %c0_i32, %c0_i32_0 : i32, i32
  }
  func.func @transform_12(%arg0: i32) -> (i32, i32) {
    %c0_i32 = arith.constant 0 : i32
    %c0_i32_0 = arith.constant 0 : i32
    %c0_i32_1 = arith.constant 0 : i32
    return %c0_i32, %c0_i32_0 : i32, i32
  }
  func.func @transform_13(%arg0: i32) -> (i32, i32, i32) {
    %c0_i32 = arith.constant 0 : i32
    %c0_i32_0 = arith.constant 0 : i32
    %c0_i32_1 = arith.constant 0 : i32
    return %arg0, %c0_i32, %c0_i32_0 : i32, i32, i32
  }
}

module attributes {stable_mosaic.version = 11 : i64} {
  func.func @residual_attention_block_kernel(%arg0: i32, %arg1: memref<2x8x32xf32, #tpu.memory_space<vmem>>, %arg2: memref<32x96xbf16, #tpu.memory_space<vmem>>, %arg3: memref<1x96xf32, #tpu.memory_space<vmem>>, %arg4: memref<32x32xbf16, #tpu.memory_space<vmem>>, %arg5: memref<1x32xf32, #tpu.memory_space<vmem>>, %arg6: memref<1x32xf32, #tpu.memory_space<vmem>>, %arg7: memref<1x32xf32, #tpu.memory_space<vmem>>, %arg8: memref<1x32xf32, #tpu.memory_space<vmem>>, %arg9: memref<1x32xf32, #tpu.memory_space<vmem>>, %arg10: memref<32x128xbf16, #tpu.memory_space<vmem>>, %arg11: memref<1x128xf32, #tpu.memory_space<vmem>>, %arg12: memref<128x32xbf16, #tpu.memory_space<vmem>>, %arg13: memref<1x32xf32, #tpu.memory_space<vmem>>, %arg14: memref<2x8x32xf32, #tpu.memory_space<vmem>>) attributes {dimension_semantics = [#tpu.dimension_semantics<parallel>], iteration_bounds = array<i64: 1>, scalar_prefetch = 0 : i64, scratch_operands = 0 : i64, tpu.core_type = #tpu.core_type<tc>, window_params = [{transform_indices = @transform_0, window_bounds = array<i64: 2, 8, 32>}, {pipeline_mode = #tpu.pipeline_mode<synchronous>, transform_indices = @transform_1, window_bounds = array<i64: 32, 96>}, {pipeline_mode = #tpu.pipeline_mode<synchronous>, transform_indices = @transform_2, window_bounds = array<i64: 1, 96>}, {pipeline_mode = #tpu.pipeline_mode<synchronous>, transform_indices = @transform_3, window_bounds = array<i64: 32, 32>}, {pipeline_mode = #tpu.pipeline_mode<synchronous>, transform_indices = @transform_4, window_bounds = array<i64: 1, 32>}, {pipeline_mode = #tpu.pipeline_mode<synchronous>, transform_indices = @transform_5, window_bounds = array<i64: 1, 32>}, {pipeline_mode = #tpu.pipeline_mode<synchronous>, transform_indices = @transform_6, window_bounds = array<i64: 1, 32>}, {pipeline_mode = #tpu.pipeline_mode<synchronous>, transform_indices = @transform_7, window_bounds = array<i64: 1, 32>}, {pipeline_mode = #tpu.pipeline_mode<synchronous>, transform_indices = @transform_8, window_bounds = array<i64: 1, 32>}, {pipeline_mode = #tpu.pipeline_mode<synchronous>, transform_indices = @transform_9, window_bounds = array<i64: 32, 128>}, {pipeline_mode = #tpu.pipeline_mode<synchronous>, transform_indices = @transform_10, window_bounds = array<i64: 1, 128>}, {pipeline_mode = #tpu.pipeline_mode<synchronous>, transform_indices = @transform_11, window_bounds = array<i64: 128, 32>}, {pipeline_mode = #tpu.pipeline_mode<synchronous>, transform_indices = @transform_12, window_bounds = array<i64: 1, 32>}, {transform_indices = @transform_13, window_bounds = array<i64: 2, 8, 32>}]} {
    %c0 = arith.constant 0 : index
    %c0_0 = arith.constant 0 : index
    %c0_1 = arith.constant 0 : index
    %0 = vector.load %arg1[%c0, %c0_0, %c0_1] : memref<2x8x32xf32, #tpu.memory_space<vmem>>, vector<2x8x32xf32>
    %1 = vector.shape_cast %0 : vector<2x8x32xf32> to vector<16x32xf32>
    %c0_2 = arith.constant 0 : index
    %c0_3 = arith.constant 0 : index
    %2 = vector.load %arg6[%c0_2, %c0_3] : memref<1x32xf32, #tpu.memory_space<vmem>>, vector<1x32xf32>
    %c0_4 = arith.constant 0 : index
    %c0_5 = arith.constant 0 : index
    %3 = vector.load %arg7[%c0_4, %c0_5] : memref<1x32xf32, #tpu.memory_space<vmem>>, vector<1x32xf32>
    %cst = arith.constant dense<0.000000e+00> : vector<16xf32>
    %4 = vector.multi_reduction <add>, %1, %cst [1] : vector<16x32xf32> to vector<16xf32>
    %5 = vector.shape_cast %4 : vector<16xf32> to vector<16x1xf32>
    %cst_6 = arith.constant 3.200000e+01 : f32
    %6 = vector.broadcast %cst_6 : f32 to vector<16x1xf32>
    %7 = arith.divf %5, %6 : vector<16x1xf32>
    %8 = vector.broadcast %7 : vector<16x1xf32> to vector<16x32xf32>
    %9 = arith.subf %1, %8 : vector<16x32xf32>
    %10 = arith.mulf %9, %9 : vector<16x32xf32>
    %cst_7 = arith.constant dense<0.000000e+00> : vector<16xf32>
    %11 = vector.multi_reduction <add>, %10, %cst_7 [1] : vector<16x32xf32> to vector<16xf32>
    %12 = vector.shape_cast %11 : vector<16xf32> to vector<16x1xf32>
    %cst_8 = arith.constant 3.200000e+01 : f32
    %13 = vector.broadcast %cst_8 : f32 to vector<16x1xf32>
    %14 = arith.divf %12, %13 : vector<16x1xf32>
    %15 = vector.broadcast %7 : vector<16x1xf32> to vector<16x32xf32>
    %16 = arith.subf %1, %15 : vector<16x32xf32>
    %cst_9 = arith.constant 9.99999974E-6 : f32
    %17 = vector.broadcast %cst_9 : f32 to vector<16x1xf32>
    %18 = arith.addf %14, %17 : vector<16x1xf32>
    %19 = math.rsqrt %18 : vector<16x1xf32>
    %20 = vector.broadcast %19 : vector<16x1xf32> to vector<16x32xf32>
    %21 = arith.mulf %16, %20 : vector<16x32xf32>
    %22 = vector.broadcast %2 : vector<1x32xf32> to vector<16x32xf32>
    %23 = arith.mulf %21, %22 : vector<16x32xf32>
    %24 = vector.broadcast %3 : vector<1x32xf32> to vector<16x32xf32>
    %25 = arith.addf %23, %24 : vector<16x32xf32>
    %26 = arith.truncf %25 : vector<16x32xf32> to vector<16x32xbf16>
    %c0_10 = arith.constant 0 : index
    %c0_11 = arith.constant 0 : index
    %27 = vector.load %arg2[%c0_10, %c0_11] : memref<32x96xbf16, #tpu.memory_space<vmem>>, vector<32x96xbf16>
    %cst_12 = arith.constant dense<0.000000e+00> : vector<16x96xf32>
    %28 = tpu.matmul %26, %27, %cst_12 {dimension_numbers = #tpu.dot_dimension_numbers<[1], [0], [0], [1], [0, 0, 1, 1], [], []>} : vector<16x32xbf16>, vector<32x96xbf16>, vector<16x96xf32> -> vector<16x96xf32>
    %c0_13 = arith.constant 0 : index
    %c0_14 = arith.constant 0 : index
    %29 = vector.load %arg3[%c0_13, %c0_14] : memref<1x96xf32, #tpu.memory_space<vmem>>, vector<1x96xf32>
    %30 = vector.broadcast %29 : vector<1x96xf32> to vector<16x96xf32>
    %31 = arith.addf %28, %30 : vector<16x96xf32>
    %32 = vector.extract_strided_slice %31 {offsets = [0, 0], sizes = [16, 32], strides = [1, 1]} : vector<16x96xf32> to vector<16x32xf32>
    %33 = arith.truncf %32 : vector<16x32xf32> to vector<16x32xbf16>
    %34 = vector.shape_cast %33 : vector<16x32xbf16> to vector<2x8x4x8xbf16>
    %35 = tpu.transpose %34, [0, 2, 1, 3] : vector<2x8x4x8xbf16> -> vector<2x4x8x8xbf16>
    %36 = vector.shape_cast %35 : vector<2x4x8x8xbf16> to vector<8x8x8xbf16>
    %37 = vector.extract_strided_slice %31 {offsets = [0, 32], sizes = [16, 32], strides = [1, 1]} : vector<16x96xf32> to vector<16x32xf32>
    %38 = arith.truncf %37 : vector<16x32xf32> to vector<16x32xbf16>
    %39 = vector.shape_cast %38 : vector<16x32xbf16> to vector<2x8x4x8xbf16>
    %40 = tpu.transpose %39, [0, 2, 1, 3] : vector<2x8x4x8xbf16> -> vector<2x4x8x8xbf16>
    %41 = vector.shape_cast %40 : vector<2x4x8x8xbf16> to vector<8x8x8xbf16>
    %42 = vector.extract_strided_slice %31 {offsets = [0, 64], sizes = [16, 32], strides = [1, 1]} : vector<16x96xf32> to vector<16x32xf32>
    %43 = arith.truncf %42 : vector<16x32xf32> to vector<16x32xbf16>
    %44 = vector.shape_cast %43 : vector<16x32xbf16> to vector<2x8x4x8xbf16>
    %45 = tpu.transpose %44, [0, 2, 1, 3] : vector<2x8x4x8xbf16> -> vector<2x4x8x8xbf16>
    %46 = vector.shape_cast %45 : vector<2x4x8x8xbf16> to vector<8x8x8xbf16>
    "tpu.trace_start"() <{level = 10 : i32, message = "gqd,gkd->gqk"}> : () -> ()
    %cst_15 = arith.constant dense<0.000000e+00> : vector<8x8x8xf32>
    %47 = tpu.matmul %36, %41, %cst_15 {dimension_numbers = #tpu.dot_dimension_numbers<[2], [2], [1], [1], [0, 0, 0, 1, 1, 1], [0], [0]>} : vector<8x8x8xbf16>, vector<8x8x8xbf16>, vector<8x8x8xf32> -> vector<8x8x8xf32>
    "tpu.trace_stop"() : () -> ()
    %cst_16 = arith.constant dense<0xFF800000> : vector<8x8xf32>
    %48 = vector.multi_reduction <maximumf>, %47, %cst_16 [2] : vector<8x8x8xf32> to vector<8x8xf32>
    %49 = vector.shape_cast %48 : vector<8x8xf32> to vector<8x8x1xf32>
    %50 = vector.broadcast %49 : vector<8x8x1xf32> to vector<8x8x8xf32>
    %51 = arith.subf %47, %50 : vector<8x8x8xf32>
    %52 = math.exp %51 : vector<8x8x8xf32>
    %cst_17 = arith.constant dense<0.000000e+00> : vector<8x8xf32>
    %53 = vector.multi_reduction <add>, %52, %cst_17 [2] : vector<8x8x8xf32> to vector<8x8xf32>
    %54 = vector.shape_cast %53 : vector<8x8xf32> to vector<8x8x1xf32>
    %55 = tpu.reciprocal %54 {approx = true} : vector<8x8x1xf32> -> vector<8x8x1xf32>
    %56 = vector.broadcast %55 : vector<8x8x1xf32> to vector<8x8x8xf32>
    %57 = arith.mulf %52, %56 : vector<8x8x8xf32>
    %58 = arith.truncf %57 : vector<8x8x8xf32> to vector<8x8x8xbf16>
    "tpu.trace_start"() <{level = 10 : i32, message = "gqk,gkd->gqd"}> : () -> ()
    %cst_18 = arith.constant dense<0.000000e+00> : vector<8x8x8xf32>
    %59 = tpu.matmul %58, %46, %cst_18 {dimension_numbers = #tpu.dot_dimension_numbers<[2], [1], [1], [2], [0, 0, 0, 1, 1, 2], [0], [0]>} : vector<8x8x8xbf16>, vector<8x8x8xbf16>, vector<8x8x8xf32> -> vector<8x8x8xf32>
    "tpu.trace_stop"() : () -> ()
    %60 = vector.shape_cast %59 : vector<8x8x8xf32> to vector<2x4x8x8xf32>
    %61 = tpu.transpose %60, [0, 2, 1, 3] : vector<2x4x8x8xf32> -> vector<2x8x4x8xf32>
    %62 = vector.shape_cast %61 : vector<2x8x4x8xf32> to vector<16x32xf32>
    %63 = arith.truncf %62 : vector<16x32xf32> to vector<16x32xbf16>
    %c0_19 = arith.constant 0 : index
    %c0_20 = arith.constant 0 : index
    %64 = vector.load %arg4[%c0_19, %c0_20] : memref<32x32xbf16, #tpu.memory_space<vmem>>, vector<32x32xbf16>
    %cst_21 = arith.constant dense<0.000000e+00> : vector<16x32xf32>
    %65 = tpu.matmul %63, %64, %cst_21 {dimension_numbers = #tpu.dot_dimension_numbers<[1], [0], [0], [1], [0, 0, 1, 1], [], []>} : vector<16x32xbf16>, vector<32x32xbf16>, vector<16x32xf32> -> vector<16x32xf32>
    %c0_22 = arith.constant 0 : index
    %c0_23 = arith.constant 0 : index
    %66 = vector.load %arg5[%c0_22, %c0_23] : memref<1x32xf32, #tpu.memory_space<vmem>>, vector<1x32xf32>
    %67 = vector.broadcast %66 : vector<1x32xf32> to vector<16x32xf32>
    %68 = arith.addf %65, %67 : vector<16x32xf32>
    %69 = arith.addf %1, %68 : vector<16x32xf32>
    %c0_24 = arith.constant 0 : index
    %c0_25 = arith.constant 0 : index
    %70 = vector.load %arg8[%c0_24, %c0_25] : memref<1x32xf32, #tpu.memory_space<vmem>>, vector<1x32xf32>
    %c0_26 = arith.constant 0 : index
    %c0_27 = arith.constant 0 : index
    %71 = vector.load %arg9[%c0_26, %c0_27] : memref<1x32xf32, #tpu.memory_space<vmem>>, vector<1x32xf32>
    %cst_28 = arith.constant dense<0.000000e+00> : vector<16xf32>
    %72 = vector.multi_reduction <add>, %69, %cst_28 [1] : vector<16x32xf32> to vector<16xf32>
    %73 = vector.shape_cast %72 : vector<16xf32> to vector<16x1xf32>
    %cst_29 = arith.constant 3.200000e+01 : f32
    %74 = vector.broadcast %cst_29 : f32 to vector<16x1xf32>
    %75 = arith.divf %73, %74 : vector<16x1xf32>
    %76 = vector.broadcast %75 : vector<16x1xf32> to vector<16x32xf32>
    %77 = arith.subf %69, %76 : vector<16x32xf32>
    %78 = arith.mulf %77, %77 : vector<16x32xf32>
    %cst_30 = arith.constant dense<0.000000e+00> : vector<16xf32>
    %79 = vector.multi_reduction <add>, %78, %cst_30 [1] : vector<16x32xf32> to vector<16xf32>
    %80 = vector.shape_cast %79 : vector<16xf32> to vector<16x1xf32>
    %cst_31 = arith.constant 3.200000e+01 : f32
    %81 = vector.broadcast %cst_31 : f32 to vector<16x1xf32>
    %82 = arith.divf %80, %81 : vector<16x1xf32>
    %83 = vector.broadcast %75 : vector<16x1xf32> to vector<16x32xf32>
    %84 = arith.subf %69, %83 : vector<16x32xf32>
    %cst_32 = arith.constant 9.99999974E-6 : f32
    %85 = vector.broadcast %cst_32 : f32 to vector<16x1xf32>
    %86 = arith.addf %82, %85 : vector<16x1xf32>
    %87 = math.rsqrt %86 : vector<16x1xf32>
    %88 = vector.broadcast %87 : vector<16x1xf32> to vector<16x32xf32>
    %89 = arith.mulf %84, %88 : vector<16x32xf32>
    %90 = vector.broadcast %70 : vector<1x32xf32> to vector<16x32xf32>
    %91 = arith.mulf %89, %90 : vector<16x32xf32>
    %92 = vector.broadcast %71 : vector<1x32xf32> to vector<16x32xf32>
    %93 = arith.addf %91, %92 : vector<16x32xf32>
    %94 = arith.truncf %93 : vector<16x32xf32> to vector<16x32xbf16>
    %c0_33 = arith.constant 0 : index
    %c0_34 = arith.constant 0 : index
    %95 = vector.load %arg10[%c0_33, %c0_34] : memref<32x128xbf16, #tpu.memory_space<vmem>>, vector<32x128xbf16>
    %cst_35 = arith.constant dense<0.000000e+00> : vector<16x128xf32>
    %96 = tpu.matmul %94, %95, %cst_35 {dimension_numbers = #tpu.dot_dimension_numbers<[1], [0], [0], [1], [0, 0, 1, 1], [], []>} : vector<16x32xbf16>, vector<32x128xbf16>, vector<16x128xf32> -> vector<16x128xf32>
    %c0_36 = arith.constant 0 : index
    %c0_37 = arith.constant 0 : index
    %97 = vector.load %arg11[%c0_36, %c0_37] : memref<1x128xf32, #tpu.memory_space<vmem>>, vector<1x128xf32>
    %98 = vector.broadcast %97 : vector<1x128xf32> to vector<16x128xf32>
    %99 = arith.addf %96, %98 : vector<16x128xf32>
    %cst_38 = arith.constant 1.702000e+00 : f32
    %100 = vector.broadcast %cst_38 : f32 to vector<16x128xf32>
    %101 = arith.mulf %100, %99 : vector<16x128xf32>
    %102 = arith.negf %101 : vector<16x128xf32>
    %103 = math.exp %102 : vector<16x128xf32>
    %cst_39 = arith.constant 1.000000e+00 : f32
    %104 = vector.broadcast %cst_39 : f32 to vector<16x128xf32>
    %105 = arith.addf %104, %103 : vector<16x128xf32>
    %106 = arith.divf %104, %105 : vector<16x128xf32>
    %107 = arith.mulf %99, %106 : vector<16x128xf32>
    %108 = arith.truncf %107 : vector<16x128xf32> to vector<16x128xbf16>
    %c0_40 = arith.constant 0 : index
    %c0_41 = arith.constant 0 : index
    %109 = vector.load %arg12[%c0_40, %c0_41] : memref<128x32xbf16, #tpu.memory_space<vmem>>, vector<128x32xbf16>
    %cst_42 = arith.constant dense<0.000000e+00> : vector<16x32xf32>
    %110 = tpu.matmul %108, %109, %cst_42 {dimension_numbers = #tpu.dot_dimension_numbers<[1], [0], [0], [1], [0, 0, 1, 1], [], []>} : vector<16x128xbf16>, vector<128x32xbf16>, vector<16x32xf32> -> vector<16x32xf32>
    %c0_43 = arith.constant 0 : index
    %c0_44 = arith.constant 0 : index
    %111 = vector.load %arg13[%c0_43, %c0_44] : memref<1x32xf32, #tpu.memory_space<vmem>>, vector<1x32xf32>
    %112 = vector.broadcast %111 : vector<1x32xf32> to vector<16x32xf32>
    %113 = arith.addf %110, %112 : vector<16x32xf32>
    %114 = arith.addf %69, %113 : vector<16x32xf32>
    %115 = vector.shape_cast %114 : vector<16x32xf32> to vector<2x8x32xf32>
    %c0_45 = arith.constant 0 : index
    %c0_46 = arith.constant 0 : index
    %c0_47 = arith.constant 0 : index
    %116 = vector.load %arg14[%c0_45, %c0_46, %c0_47] : memref<2x8x32xf32, #tpu.memory_space<vmem>>, vector<2x8x32xf32>
    tpu.vector_store %arg14[%c0_45, %c0_46, %c0_47], %115 {strides = array<i32>} : memref<2x8x32xf32, #tpu.memory_space<vmem>>, vector<2x8x32xf32>,
    return
  }
  func.func @transform_0(%arg0: i32) -> (i32, i32, i32) {
    %c0_i32 = arith.constant 0 : i32
    %c0_i32_0 = arith.constant 0 : i32
    %c0_i32_1 = arith.constant 0 : i32
    return %arg0, %c0_i32, %c0_i32_0 : i32, i32, i32
  }
  func.func @transform_1(%arg0: i32) -> (i32, i32) {
    %c0_i32 = arith.constant 0 : i32
    %c0_i32_0 = arith.constant 0 : i32
    %c0_i32_1 = arith.constant 0 : i32
    return %c0_i32, %c0_i32_0 : i32, i32
  }
  func.func @transform_2(%arg0: i32) -> (i32, i32) {
    %c0_i32 = arith.constant 0 : i32
    %c0_i32_0 = arith.constant 0 : i32
    %c0_i32_1 = arith.constant 0 : i32
    return %c0_i32, %c0_i32_0 : i32, i32
  }
  func.func @transform_3(%arg0: i32) -> (i32, i32) {
    %c0_i32 = arith.constant 0 : i32
    %c0_i32_0 = arith.constant 0 : i32
    %c0_i32_1 = arith.constant 0 : i32
    return %c0_i32, %c0_i32_0 : i32, i32
  }
  func.func @transform_4(%arg0: i32) -> (i32, i32) {
    %c0_i32 = arith.constant 0 : i32
    %c0_i32_0 = arith.constant 0 : i32
    %c0_i32_1 = arith.constant 0 : i32
    return %c0_i32, %c0_i32_0 : i32, i32
  }
  func.func @transform_5(%arg0: i32) -> (i32, i32) {
    %c0_i32 = arith.constant 0 : i32
    %c0_i32_0 = arith.constant 0 : i32
    %c0_i32_1 = arith.constant 0 : i32
    return %c0_i32, %c0_i32_0 : i32, i32
  }
  func.func @transform_6(%arg0: i32) -> (i32, i32) {
    %c0_i32 = arith.constant 0 : i32
    %c0_i32_0 = arith.constant 0 : i32
    %c0_i32_1 = arith.constant 0 : i32
    return %c0_i32, %c0_i32_0 : i32, i32
  }
  func.func @transform_7(%arg0: i32) -> (i32, i32) {
    %c0_i32 = arith.constant 0 : i32
    %c0_i32_0 = arith.constant 0 : i32
    %c0_i32_1 = arith.constant 0 : i32
    return %c0_i32, %c0_i32_0 : i32, i32
  }
  func.func @transform_8(%arg0: i32) -> (i32, i32) {
    %c0_i32 = arith.constant 0 : i32
    %c0_i32_0 = arith.constant 0 : i32
    %c0_i32_1 = arith.constant 0 : i32
    return %c0_i32, %c0_i32_0 : i32, i32
  }
  func.func @transform_9(%arg0: i32) -> (i32, i32) {
    %c0_i32 = arith.constant 0 : i32
    %c0_i32_0 = arith.constant 0 : i32
    %c0_i32_1 = arith.constant 0 : i32
    return %c0_i32, %c0_i32_0 : i32, i32
  }
  func.func @transform_10(%arg0: i32) -> (i32, i32) {
    %c0_i32 = arith.constant 0 : i32
    %c0_i32_0 = arith.constant 0 : i32
    %c0_i32_1 = arith.constant 0 : i32
    return %c0_i32, %c0_i32_0 : i32, i32
  }
  func.func @transform_11(%arg0: i32) -> (i32, i32) {
    %c0_i32 = arith.constant 0 : i32
    %c0_i32_0 = arith.constant 0 : i32
    %c0_i32_1 = arith.constant 0 : i32
    return %c0_i32, %c0_i32_0 : i32, i32
  }
  func.func @transform_12(%arg0: i32) -> (i32, i32) {
    %c0_i32 = arith.constant 0 : i32
    %c0_i32_0 = arith.constant 0 : i32
    %c0_i32_1 = arith.constant 0 : i32
    return %c0_i32, %c0_i32_0 : i32, i32
  }
  func.func @transform_13(%arg0: i32) -> (i32, i32, i32) {
    %c0_i32 = arith.constant 0 : i32
    %c0_i32_0 = arith.constant 0 : i32
    %c0_i32_1 = arith.constant 0 : i32
    return %arg0, %c0_i32, %c0_i32_0 : i32, i32, i32
  }
}

</mosaic_0001>

<bundles_post_ra>
// kernel: tpu_custom_call.1
= control target key start
LH: loop header
LB: loop body
LE: loop exit
PB: predicated region body
PF: predicated region fallthrough
CT: control target
= control target key end

     0   :  { %vm50_vm0 = vcmask 261120   ;;  %s3423_s0 = inlined_call_operand.vmem [shape: f32[2,8,32], index: 0, kind: input, shape index: {}]   ;;  %s3424_s1 = inlined_call_operand.vmem [shape: bf16[32,96], index: 1, kind: input, shape index: {}]   ;;  %s3425_s2 = inlined_call_operand.vmem [shape: f32[1,96], index: 2, kind: input, shape index: {}]   ;;  %s3426_s3 = inlined_call_operand.vmem [shape: bf16[32,32], index: 3, kind: input, shape index: {}]   ;;  %s3427_s4 = inlined_call_operand.vmem [shape: f32[1,32], index: 4, kind: input, shape index: {}]   ;;  %s3428_s5 = inlined_call_operand.vmem [shape: f32[1,32], index: 5, kind: input, shape index: {}]   ;;  %s3429_s6 = inlined_call_operand.vmem [shape: f32[1,32], index: 6, kind: input, shape index: {}]   ;;  %s3430_s7 = inlined_call_operand.vmem [shape: f32[1,32], index: 7, kind: input, shape index: {}]   ;;  %s3431_s8 = inlined_call_operand.vmem [shape: f32[1,32], index: 8, kind: input, shape index: {}]   ;;  %s3432_s9 = inlined_call_operand.vmem [shape: bf16[32,128], index: 9, kind: input, shape index: {}]   ;;  %s3433_s10 = inlined_call_operand.vmem [shape: f32[1,128], index: 10, kind: input, shape index: {}]   ;;  %s3434_s11 = inlined_call_operand.vmem [shape: bf16[128,32], index: 11, kind: input, shape index: {}]   ;;  %s3435_s12 = inlined_call_operand.vmem [shape: f32[1,32], index: 12, kind: input, shape index: {}]   ;;  %s3436_s13 = inlined_call_operand.hbm [shape: f32[2,8,32], index: 13, kind: output, shape index: {}]  }
   0x1   :  { %v46_v0 = vld [vmem:[%s3423_s0] sm:$0xff]  ;;  %v47_v1 = vld [vmem:[%s3423_s0 + $0x8] sm:$0xff] }
   0x2   :  { %v51_v2 = vsel %vm50_vm0, %v46_v0, 0.0  ;;  %v54_v3 = vsel %vm50_vm0, %v47_v1, 0.0 }
   0x3   :  { %52 = vadd.xlane.f32.xlu0 %v51_v2 }
   0x7   :  { %55 = vadd.xlane.f32.xlu0 %v54_v3 }
   0x8   :  { %18 = vsyncpa [#allocation3], 0  ;;  %v2756_v14 = vld [vmem:[%s3424_s1] sm:$0xff]   ;;  %v2844_v15 = vmov 0.0   ;;  %v2757_v16 = vld [vmem:[%s3424_s1 + $0x8] sm:$0xff]   ;;  %vm2845_vm1 = vmmov 0   ;;  %v196_v47 = vlaneseq }
   0x9   :  { %2586 = vmatprep.subr.bf16.mxu0 %v2844_v15  ;;  %2606 = vmatprep.subr.bf16.mxu1 %v2844_v15  ;;  %v2477_v25 = vld [vmem:[%s3428_s5] ss:$0 sm:$0xff]  ;;  %s2846_s5 = smov 112   ;;  %s2848_s21 = smov 104   ;;  %v2850_v45 = vmov 1983009808  }
   0xa   :  { %2587 = vmatpush3.bf16.msra.mxu0 %v2756_v14  ;;  %2590 = vmatprep.mubr.msk.bf16.mxu0 %vm2845_vm1, %v2844_v15  ;;  %v2478_v29 = vld [vmem:[%s3429_s6] ss:$0 sm:$0xff]  ;;  %s2847_s6 = smov 120   ;;  %s2849_s22 = smov 96   ;;  %v194_v46 = vunpack.c.l.s4 %v2850_v45  ;;  %v197_v49 = vshrl.u32 %v196_v47, 7  ;;  %vm1008_vm2 = vcmask 64512  }
   0xb   :  { %2588 = vmatprep.subr.bf16.mxu0 %v2844_v15  ;;  %2608 = vmatprep.mubr.msk.bf16.mxu1 %vm2845_vm1, %v2844_v15  ;;  %v2479_v34 = vld [vmem:[%s3425_s2] ss:$0 sm:$0xff]  ;;  %v2851_v53 = vmov 1934713408   ;;  %s2853_s2 = smov 64   ;;  %vm1476_vm3 = vcmask 1043456  }
   0xc   :  { %v195_v48 = vunpack.c.0.s8 %v194_v46  ;;  %v225_v54 = vunpack.c.l.s4 %v2851_v53  ;;  %s2854_s27 = smov 16   ;;  %s2856_s28 = smov 24   ;;  %vm2140_vm4 = vcmask 130048   ;;  %vm2143_vm5 = vcmask 195584  }
   0xe   :  { %2589 = vmatpush3.bf16.msra.mxu0 %v2757_v16  ;;  %v2985_v56 = vsub.s32 %v195_v48, %v197_v49  ;;  %v226_v61 = vunpack.c.0.s8 %v225_v54 }
   0xf   :  { %2594 = vmatprep.subr.bf16.mxu0 %v2844_v15 }
  0x90   :  { %v53_v4 = vpop.xlane.xlu0 %52 }
  0x91   :  { %v58_v5 = vmul.f32 0.03125, %v53_v4  ;;  %v2998_v4 = vsub.s32 %v226_v61, %v197_v49 }
  0x93   :  { %v60_v6 = vsub.f32 %v46_v0, %v58_v5 }
  0x94   :  { %v56_v7 = vpop.xlane.xlu0 %55 }
  0x95   :  { %v59_v8 = vmul.f32 0.03125, %v56_v7  ;;  %v62_v9 = vmul.f32 %v60_v6, %v60_v6 }
  0x97   :  { %v61_v10 = vsub.f32 %v47_v1, %v59_v8  ;;  %v64_v11 = vsel %vm50_vm0, %v62_v9, 0.0  ;;  %v2852_v1 = vmov 0  }
  0x98   :  { %65 = vadd.xlane.f32.xlu1 %v64_v11  ;;  %v2995_v2 = vpack.i.b16 %v2852_v1, %v2852_v1 }
  0x99   :  { %v63_v12 = vmul.f32 %v61_v10, %v61_v10 }
  0x9b   :  { %v67_v13 = vsel %vm50_vm0, %v63_v12, 0.0 }
  0x9c   :  { %68 = vadd.xlane.f32.xlu1 %v67_v13 }
 0x125   :  { %v66_v17 = vpop.xlane.xlu1 %65 }
 0x126   :  { %v70_v18 = vmul.f32 0.03125, %v66_v17 }
 0x128   :  { %v72_v19 = vadd.f32 1e-05, %v70_v18 }
 0x129   :  { %v69_v20 = vpop.xlane.xlu1 %68 }
 0x12a   :  { %2770 = vrsqrt.f32 %v72_v19  ;;  %v71_v21 = vmul.f32 0.03125, %v69_v20 }
 0x12c   :  { %v73_v22 = vadd.f32 1e-05, %v71_v21 }
 0x12e   :  { %2772 = vrsqrt.f32 %v73_v22 }
 0x134   :  { %v2771_v23 = vpop.eup %2770 }
 0x135   :  { %v76_v24 = vmul.f32 %v2771_v23, %v60_v6 }
 0x137   :  { %v84_v28 = vmul.f32 %v2477_v25, %v76_v24 }
 0x138   :  { %v2773_v26 = vpop.eup %2772 }
 0x139   :  { %v77_v27 = vmul.f32 %v2773_v26, %v61_v10  ;;  %v92_v31 = vadd.f32 %v2478_v29, %v84_v28 }
 0x13b   :  { %v85_v30 = vmul.f32 %v2477_v25, %v77_v27 }
 0x13d   :  { %v93_v32 = vadd.f32 %v2478_v29, %v85_v30 }
 0x13f   :  { %v94_v33 = vpack.c.bf16 %v93_v32, %v92_v31 }
 0x141   :  { %2591 = vmatmul.mubr.msk.bf16.vlgmr.msra.gmra.mrb[0].mxu0 %vm50_vm0, %v94_v33 }
 0x142   :  { %2596 = vmatprep.mubr.msk.bf16.mxu0 %vm2845_vm1, %v2844_v15 }
 0x214   :  { %v155_v35 = vpop.f32.mrb[0].mxu0 }
 0x215   :  { %v2592_v36 = vpop.f32.mrb[1].mxu0  ;;  %v156_v38 = vadd.f32 %v2479_v34, %v155_v35 }
 0x216   :  { %v158_v37 = vpop.f32.mrb[2].mxu0 }
 0x217   :  { %v159_v39 = vadd.f32 %v2479_v34, %v158_v37  ;;  %v2593_v40 = vpop.f32.mrb[3].mxu0 }
 0x219   :  { %v2965_v41 = vpack.c.bf16 %v159_v39, %v156_v38 }
 0x21b   :  { %166 = vrot.lane.b32.xlu1 %v2965_v41, %s2846_s5  ;;  %164 = vrot.lane.b32.xlu0 %v2965_v41, %s2847_s6  ;;  %v174_v58 = vshrl.u32 %v2965_v41, 16 }
 0x21f   :  { %168 = vrot.lane.b32.xlu1 %v2965_v41, %s2848_s21 }
 0x223   :  { %448 = vrot.lane.b32.xlu1 %v2965_v41, %s2849_s22 }
 0x28d   :  { %v2971_v42 = vpop.permute.xlu1 %166  ;;  %v2973_v43 = vpop.permute.xlu0 %164 }
 0x28e   :  { %452 = vrot.lane.b32.xlu1 %v2971_v42, %s2849_s22  ;;  %450 = vrot.lane.b32.xlu0 %v2973_v43, %s2849_s22  ;;  %v182_v51 = vshrl.u32 %v2971_v42, 16  ;;  %v175_v52 = vshrl.u32 %v2973_v43, 16  ;;  %v172_v57 = vpack.i.b16 %v2973_v43, %v2965_v41 }
 0x290   :  { %v176_v60 = vpack.i.b16 %v175_v52, %v174_v58  ;;  %v199_v63 = vrot.slane %v172_v57, %v2985_v56  ;;  %v192_v12 = vcombine.high %v172_v57, %v2995_v2 }
 0x291   :  { %v2977_v44 = vpop.permute.xlu1 %168 }
 0x292   :  { %454 = vrot.lane.b32.xlu0 %v2977_v44, %s2849_s22  ;;  %v183_v50 = vshrl.u32 %v2977_v44, 16  ;;  %v180_v55 = vpack.i.b16 %v2977_v44, %v2971_v42  ;;  %v265_v3 = vrot.slane %v176_v60, %v2985_v56  ;;  %v258_v13 = vcombine.high %v176_v60, %v2995_v2 }
 0x293   :  { %v3016_v27 = vrot.slane %v192_v12, %v2985_v56 }
 0x294   :  { %v184_v59 = vpack.i.b16 %v183_v50, %v182_v51  ;;  %v214_v62 = vrot.slane %v180_v55, %v2985_v56  ;;  %v207_v17 = vcombine.high %v180_v55, %v2995_v2  ;;  %v3019_v28 = vrot.slane %v258_v13, %v2985_v56 }
 0x295   :  { %v449_v7 = vpop.permute.xlu1 %448 }
 0x296   :  { %v280_v0 = vrot.slane %v184_v59, %v2985_v56  ;;  %v222_v5 = vcombine.low %v199_v63, %v214_v62  ;;  %v223_v6 = vcombine.high %v199_v63, %v214_v62  ;;  %v273_v8 = vcombine.high %v184_v59, %v2995_v2 }
 0x297   :  { %v460_v20 = vshrl.u32 %v449_v7, 16  ;;  %v3023_v31 = vrot.slane %v207_v17, %v2985_v56 }
 0x298   :  { %v288_v9 = vcombine.low %v265_v3, %v280_v0  ;;  %v289_v10 = vcombine.high %v265_v3, %v280_v0  ;;  %v3005_v18 = vrot.slane %v222_v5, %v2998_v4  ;;  %v3008_v19 = vrot.slane %v223_v6, %v2998_v4 }
 0x299   :  { %v3011_v22 = vrot.slane %v273_v8, %v2985_v56 }
 0x29a   :  { %v296_v23 = vrot.slane %v288_v9, %v2998_v4  ;;  %v303_v24 = vrot.slane %v289_v10, %v2998_v4  ;;  %v324_v32 = vcombine.low %v3005_v18, %v3008_v19  ;;  %v2483_v35 = vcombine.high %v3005_v18, %v3008_v19 }
 0x29b   :  { %v304_v39 = vcombine.low %v3019_v28, %v3011_v22 }
 0x29c   :  { %v349_v40 = vcombine.low %v296_v23, %v303_v24  ;;  %v2484_v51 = vcombine.high %v296_v23, %v303_v24 }
 0x29e   :  { %v356_v12 = vrot.slane %v349_v40, %v2985_v56 }
 0x300   :  { %v451_v11 = vpop.permute.xlu0 %450  ;;  %v453_v21 = vpop.permute.xlu1 %452 }
 0x301   :  { %v458_v14 = vpack.i.b16 %v451_v11, %v449_v7  ;;  %v461_v16 = vshrl.u32 %v451_v11, 16  ;;  %v468_v33 = vshrl.u32 %v453_v21, 16  ;;  %v305_v11 = vcombine.high %v3019_v28, %v3011_v22 }
 0x303   :  { %v462_v25 = vpack.i.b16 %v461_v16, %v460_v20  ;;  %v472_v29 = vcombine.high %v458_v14, %v2995_v2  ;;  %v479_v36 = vrot.slane %v458_v14, %v2985_v56  ;;  %v364_v20 = vrot.slane %v2484_v51, %v2985_v56 }
 0x304   :  { %v455_v26 = vpop.permute.xlu0 %454 }
 0x305   :  { %v466_v30 = vpack.i.b16 %v455_v26, %v453_v21  ;;  %v469_v34 = vshrl.u32 %v455_v26, 16  ;;  %v538_v45 = vcombine.high %v462_v25, %v2995_v2  ;;  %v486_v47 = vrot.slane %v472_v29, %v2985_v56 }
 0x306   :  { %v545_v52 = vrot.slane %v462_v25, %v2985_v56  ;;  %v238_v29 = vcombine.low %v3016_v27, %v3023_v31 }
 0x307   :  { %v487_v37 = vcombine.high %v466_v30, %v2995_v2  ;;  %v494_v38 = vrot.slane %v466_v30, %v2985_v56  ;;  %v470_v46 = vpack.i.b16 %v469_v34, %v468_v33  ;;  %v552_v60 = vrot.slane %v538_v45, %v2985_v56 }
 0x308   :  { %v239_v30 = vcombine.high %v3016_v27, %v3023_v31  ;;  %v331_v33 = vrot.slane %v324_v32, %v2985_v56  ;;  %v339_v34 = vrot.slane %v2483_v35, %v2985_v56  ;;  %v312_v45 = vrot.slane %v304_v39, %v2998_v4 }
 0x309   :  { %v501_v48 = vrot.slane %v487_v37, %v2985_v56  ;;  %v502_v49 = vcombine.low %v479_v36, %v494_v38  ;;  %v503_v50 = vcombine.high %v479_v36, %v494_v38  ;;  %v553_v53 = vcombine.high %v470_v46, %v2995_v2 }
 0x30a   :  { %v560_v54 = vrot.slane %v470_v46, %v2985_v56  ;;  %v319_v46 = vrot.slane %v305_v11, %v2998_v4  ;;  %v246_v32 = vrot.slane %v238_v29, %v2998_v4  ;;  %v253_v35 = vrot.slane %v239_v30, %v2998_v4 }
 0x30b   :  { %v510_v55 = vrot.slane %v502_v49, %v2998_v4  ;;  %v517_v57 = vrot.slane %v503_v50, %v2998_v4  ;;  %v518_v58 = vcombine.low %v486_v47, %v501_v48  ;;  %v519_v59 = vcombine.high %v486_v47, %v501_v48 }
 0x30c   :  { %v567_v61 = vrot.slane %v553_v53, %v2985_v56  ;;  %v568_v62 = vcombine.low %v545_v52, %v560_v54  ;;  %v569_v63 = vcombine.high %v545_v52, %v560_v54  ;;  %v365_v47 = vcombine.low %v356_v12, %v364_v20 }
 0x30d   :  { %v526_v0 = vrot.slane %v518_v58, %v2998_v4  ;;  %v533_v3 = vrot.slane %v519_v59, %v2998_v4  ;;  %v604_v5 = vcombine.low %v510_v55, %v517_v57  ;;  %v2487_v6 = vcombine.high %v510_v55, %v517_v57 }
 0x30e   :  { %v576_v7 = vrot.slane %v568_v62, %v2998_v4  ;;  %v583_v8 = vrot.slane %v569_v63, %v2998_v4  ;;  %v584_v9 = vcombine.low %v552_v60, %v567_v61  ;;  %v585_v10 = vcombine.high %v552_v60, %v567_v61 }
 0x30f   :  { %v611_v13 = vrot.slane %v604_v5, %v2985_v56  ;;  %v619_v14 = vrot.slane %v2487_v6, %v2985_v56  ;;  %v654_v21 = vcombine.low %v526_v0, %v533_v3  ;;  %v2489_v23 = vcombine.high %v526_v0, %v533_v3 }
 0x310   :  { %v592_v16 = vrot.slane %v584_v9, %v2998_v4  ;;  %v599_v17 = vrot.slane %v585_v10, %v2998_v4  ;;  %v629_v18 = vcombine.low %v576_v7, %v583_v8  ;;  %v2488_v19 = vcombine.high %v576_v7, %v583_v8 }
 0x311   :  { %v620_v24 = vcombine.low %v611_v13, %v619_v14  ;;  %v661_v48 = vrot.slane %v654_v21, %v2985_v56  ;;  %v669_v27 = vrot.slane %v2489_v23, %v2985_v56  ;;  %v340_v49 = vcombine.low %v331_v33, %v339_v34 }
 0x312   :  { %v636_v25 = vrot.slane %v629_v18, %v2985_v56  ;;  %v644_v22 = vrot.slane %v2488_v19, %v2985_v56  ;;  %v679_v26 = vcombine.low %v592_v16, %v599_v17  ;;  %v2490_v28 = vcombine.high %v592_v16, %v599_v17 }
 0x313   :  { %v627_v36 = vrot.slane %v620_v24, %v2998_v4  ;;  %v399_v53 = vcombine.low %v312_v45, %v319_v46  ;;  %v2486_v54 = vcombine.high %v312_v45, %v319_v46  ;;  %v372_v55 = vrot.slane %v365_v47, %v2998_v4 }
 0x314   :  { %v645_v37 = vcombine.low %v636_v25, %v644_v22  ;;  %v686_v38 = vrot.slane %v679_v26, %v2985_v56  ;;  %v694_v40 = vrot.slane %v2490_v28, %v2985_v56  ;;  %v670_v60 = vcombine.low %v661_v48, %v669_v27 }
 0x315   :  { %v628_v51 = vcombine.high %v627_v36, %v2852_v1  ;;  %v374_v61 = vcombine.low %v246_v32, %v253_v35  ;;  %v2485_v62 = vcombine.high %v246_v32, %v253_v35  ;;  %v347_v0 = vrot.slane %v340_v49, %v2998_v4 }
 0x316   :  { %v652_v31 = vrot.slane %v645_v37, %v2998_v4  ;;  %v695_v52 = vcombine.low %v686_v38, %v694_v40  ;;  %v707_v3 = vshrl.u32 %v627_v36, 16  ;;  %v406_v6 = vrot.slane %v399_v53, %v2985_v56 }
 0x317   :  { %v414_v7 = vrot.slane %v2486_v54, %v2985_v56  ;;  %v373_v9 = vcombine.high %v372_v55, %v2852_v1  ;;  %v677_v10 = vrot.slane %v670_v60, %v2998_v4  ;;  %v381_v11 = vrot.slane %v374_v61, %v2985_v56 }
 0x318   :  { %v706_v50 = vpack.i.b16 %v652_v31, %v627_v36  ;;  %v653_v39 = vcombine.high %v652_v31, %v2852_v1  ;;  %v708_v59 = vshrl.u32 %v652_v31, 16  ;;  %v702_v5 = vrot.slane %v695_v52, %v2998_v4 }
 0x319   :  { %v389_v12 = vrot.slane %v2485_v62, %v2985_v56  ;;  %v426_v13 = vpack.i.b16 %v372_v55, %v347_v0  ;;  %v348_v14 = vcombine.high %v347_v0, %v2852_v1  ;;  %v415_v20 = vcombine.low %v406_v6, %v414_v7 }
 0x31a   :  { %v1013_v57 = vsel %vm1008_vm2, %v706_v50, 0  ;;  %v712_v58 = vpack.i.b16 %v653_v39, %v628_v51  ;;  %v709_v8 = vpack.i.b16 %v708_v59, %v707_v3  ;;  %v718_v16 = vpack.i.b16 %v702_v5, %v677_v10 }
 0x31b   :  { %2595 = vmatpush3.bf16.xpose.msra.mxu0 %v1013_v57  ;;  %v714_v17 = vshrl.u32 %v653_v39, 16  ;;  %v432_v19 = vpack.i.b16 %v373_v9, %v348_v14  ;;  %v390_v21 = vcombine.low %v381_v11, %v389_v12  ;;  %v713_v23 = vshrl.u32 %v628_v51, 16 }
 0x31c   :  { %v1105_v63 = vsel %vm1008_vm2, %v712_v58, 0  ;;  %2600 = vmatprep.subr.bf16.mxu0 %v2844_v15  ;;  %v1059_v18 = vsel %vm1008_vm2, %v709_v8, 0  ;;  %v1197_v24 = vsel %vm1008_vm2, %v718_v16, 0  ;;  %v428_v25 = vshrl.u32 %v372_v55, 16 }
 0x31d   :  { %2607 = vmatpush3.bf16.xpose.msra.mxu1 %v1105_v63  ;;  %v703_v22 = vcombine.high %v702_v5, %v2852_v1  ;;  %v427_v26 = vshrl.u32 %v347_v0, 16  ;;  %v715_v28 = vpack.i.b16 %v714_v17, %v713_v23  ;;  %v422_v29 = vrot.slane %v415_v20, %v2998_v4 }
 0x31e   :  { %2618 = vmatprep.subr.bf16.mxu1 %v2844_v15  ;;  %v678_v30 = vcombine.high %v677_v10, %v2852_v1  ;;  %v397_v34 = vrot.slane %v390_v21, %v2998_v4  ;;  %v720_v40 = vshrl.u32 %v702_v5, 16  ;;  %v434_v45 = vshrl.u32 %v373_v9, 16 }
 0x31f   :  { %v429_v33 = vpack.i.b16 %v428_v25, %v427_v26  ;;  %v1151_v37 = vsel %vm1008_vm2, %v715_v28, 0  ;;  %v719_v47 = vshrl.u32 %v677_v10, 16  ;;  %v433_v48 = vshrl.u32 %v348_v14, 16 }
 0x320   :  { %v724_v36 = vpack.i.b16 %v703_v22, %v678_v30  ;;  %v438_v38 = vpack.i.b16 %v422_v29, %v397_v34  ;;  %v423_v31 = vcombine.high %v422_v29, %v2852_v1  ;;  %v398_v35 = vcombine.high %v397_v34, %v2852_v1 }
 0x321   :  { %v721_v27 = vpack.i.b16 %v720_v40, %v719_v47  ;;  %v435_v32 = vpack.i.b16 %v434_v45, %v433_v48  ;;  %v726_v51 = vshrl.u32 %v703_v22, 16  ;;  %v440_v39 = vshrl.u32 %v422_v29, 16 }
 0x322   :  { %2597 = vmatmul.mubr.msk.bf16.vlgmr.msra.gmra.mrb[4].mxu0 %vm1008_vm2, %v426_v13  ;;  %v1289_v46 = vsel %vm1008_vm2, %v724_v36, 0  ;;  %v444_v50 = vpack.i.b16 %v423_v31, %v398_v35  ;;  %v725_v52 = vshrl.u32 %v678_v30, 16  ;;  %v439_v53 = vshrl.u32 %v397_v34, 16 }
 0x323   :  { %2601 = vmatpush3.bf16.xpose.msra.mxu0 %v1059_v18  ;;  %2602 = vmatprep.mubr.msk.bf16.mxu0 %vm2845_vm1, %v2844_v15  ;;  %v1243_v49 = vsel %vm1008_vm2, %v721_v27, 0  ;;  %v446_v58 = vshrl.u32 %v423_v31, 16  ;;  %v445_v59 = vshrl.u32 %v398_v35, 16 }
 0x324   :  { %2609 = vmatmul.mubr.msk.bf16.vlgmr.msra.gmra.mrb[0].mxu1 %vm1008_vm2, %v432_v19  ;;  %2612 = vmatprep.subr.bf16.mxu0 %v2844_v15  ;;  %v727_v54 = vpack.i.b16 %v726_v51, %v725_v52  ;;  %v441_v55 = vpack.i.b16 %v440_v39, %v439_v53 }
 0x325   :  { %2619 = vmatpush3.bf16.xpose.msra.mxu1 %v1197_v24  ;;  %2620 = vmatprep.mubr.msk.bf16.mxu1 %vm2845_vm1, %v2844_v15  ;;  %v447_v60 = vpack.i.b16 %v446_v58, %v445_v59 }
 0x326   :  { %2630 = vmatprep.subr.bf16.mxu1 %v2844_v15  ;;  %v1335_v57 = vsel %vm1008_vm2, %v727_v54, 0 }
 0x32a   :  { %2603 = vmatmul.mubr.msk.bf16.vlgmr.msra.gmra.mrb[8].mxu0 %vm1008_vm2, %v429_v33 }
 0x32b   :  { %2613 = vmatpush3.bf16.xpose.msra.mxu0 %v1151_v37  ;;  %2614 = vmatprep.mubr.msk.bf16.mxu0 %vm2845_vm1, %v2844_v15 }
 0x32c   :  { %2621 = vmatmul.mubr.msk.bf16.vlgmr.msra.gmra.mrb[4].mxu1 %vm1008_vm2, %v438_v38  ;;  %2624 = vmatprep.subr.bf16.mxu0 %v2844_v15 }
 0x32d   :  { %2631 = vmatpush3.bf16.xpose.msra.mxu1 %v1289_v46  ;;  %2632 = vmatprep.mubr.msk.bf16.mxu1 %vm2845_vm1, %v2844_v15 }
 0x32e   :  { %2642 = vmatprep.subr.bf16.mxu1 %v2844_v15 }
 0x332   :  { %2615 = vmatmul.mubr.msk.bf16.vlgmr.msra.gmra.mrb[12].mxu0 %vm1008_vm2, %v435_v32 }
 0x333   :  { %2625 = vmatpush3.bf16.xpose.msra.mxu0 %v1243_v49  ;;  %2626 = vmatprep.mubr.msk.bf16.mxu0 %vm2845_vm1, %v2844_v15 }
 0x334   :  { %2633 = vmatmul.mubr.msk.bf16.vlgmr.msra.gmra.mrb[8].mxu1 %vm1008_vm2, %v444_v50  ;;  %2636 = vmatprep.subr.bf16.mxu0 %v2844_v15 }
 0x335   :  { %2644 = vmatprep.mubr.msk.bf16.mxu1 %vm2845_vm1, %v2844_v15 }
 0x33a   :  { %2627 = vmatmul.mubr.msk.bf16.vlgmr.msra.gmra.mrb[16].mxu0 %vm1008_vm2, %v441_v55 }
 0x33b   :  { %2637 = vmatpush3.bf16.xpose.msra.mxu0 %v1335_v57  ;;  %2638 = vmatprep.mubr.msk.bf16.mxu0 %vm2845_vm1, %v2844_v15 }
 0x33c   :  { %2648 = vmatprep.subr.bf16.mxu0 %v2844_v15 }
 0x342   :  { %2639 = vmatmul.mubr.msk.bf16.vlgmr.msra.gmra.mrb[20].mxu0 %vm1008_vm2, %v447_v60 }
 0x343   :  { %2650 = vmatprep.mubr.msk.bf16.mxu0 %vm2845_vm1, %v2844_v15 }
 0x3f5   :  { %v1049_v61 = vpop.f32.mrb[4].mxu0 }
 0x3f6   :  { %v2598_v62 = vpop.f32.mrb[5].mxu0  ;;  %v1377_v63 = vsel %vm1008_vm2, %v1049_v61, -inf }
 0x3f7   :  { %v3133_v0 = vpop.f32.mrb[0].mxu1  ;;  %1378 = vmax.xlane.f32.xlu1 %v1377_v63  ;;  %v1052_v3 = vpop.f32.mrb[6].mxu0 }
 0x3f8   :  { %v2599_v5 = vpop.f32.mrb[7].mxu0  ;;  %v2610_v6 = vpop.f32.mrb[1].mxu1  ;;  %v1383_v20 = vsel %vm1008_vm2, %v3133_v0, -inf }
 0x3f9   :  { %v1144_v7 = vpop.f32.mrb[2].mxu1 }
 0x3fa   :  { %v2611_v8 = vpop.f32.mrb[3].mxu1 }
 0x3fd   :  { %v1095_v9 = vpop.f32.mrb[8].mxu0 }
 0x3fe   :  { %v2604_v10 = vpop.f32.mrb[9].mxu0  ;;  %v1380_v11 = vsel %vm1008_vm2, %v1095_v9, -inf }
 0x3ff   :  { %v3136_v12 = vpop.f32.mrb[4].mxu1  ;;  %1381 = vmax.xlane.f32.xlu0 %v1380_v11  ;;  %v1098_v13 = vpop.f32.mrb[10].mxu0 }
 0x400   :  { %v2605_v14 = vpop.f32.mrb[11].mxu0  ;;  %v2622_v16 = vpop.f32.mrb[5].mxu1  ;;  %v1389_v17 = vsel %vm1008_vm2, %v3136_v12, -inf }
 0x401   :  { %v1236_v18 = vpop.f32.mrb[6].mxu1  ;;  %1390 = vmax.xlane.f32.xlu1 %v1389_v17 }
 0x402   :  { %v2623_v19 = vpop.f32.mrb[7].mxu1 }
 0x403   :  { %1384 = vmax.xlane.f32.xlu0 %v1383_v20 }
 0x405   :  { %v1187_v21 = vpop.f32.mrb[12].mxu0 }
 0x406   :  { %v2616_v23 = vpop.f32.mrb[13].mxu0  ;;  %v1386_v24 = vsel %vm1008_vm2, %v1187_v21, -inf }
 0x407   :  { %v1325_v25 = vpop.f32.mrb[8].mxu1  ;;  %1387 = vmax.xlane.f32.xlu0 %v1386_v24  ;;  %v1190_v22 = vpop.f32.mrb[14].mxu0 }
 0x408   :  { %v2617_v26 = vpop.f32.mrb[15].mxu0  ;;  %v2634_v28 = vpop.f32.mrb[9].mxu1  ;;  %v1395_v29 = vsel %vm1008_vm2, %v1325_v25, -inf }
 0x409   :  { %v1328_v30 = vpop.f32.mrb[10].mxu1  ;;  %1396 = vmax.xlane.f32.xlu1 %v1395_v29 }
 0x40a   :  { %v2635_v33 = vpop.f32.mrb[11].mxu1 }
 0x40d   :  { %v1279_v34 = vpop.f32.mrb[16].mxu0 }
 0x40e   :  { %v2628_v36 = vpop.f32.mrb[17].mxu0  ;;  %v1392_v37 = vsel %vm1008_vm2, %v1279_v34, -inf }
 0x40f   :  { %1393 = vmax.xlane.f32.xlu0 %v1392_v37  ;;  %v1282_v38 = vpop.f32.mrb[18].mxu0 }
 0x410   :  { %v2629_v40 = vpop.f32.mrb[19].mxu0 }
 0x415   :  { %v1371_v45 = vpop.f32.mrb[20].mxu0 }
 0x416   :  { %v2640_v46 = vpop.f32.mrb[21].mxu0  ;;  %v1398_v47 = vsel %vm1008_vm2, %v1371_v45, -inf }
 0x417   :  { %1399 = vmax.xlane.f32.xlu0 %v1398_v47  ;;  %v1374_v48 = vpop.f32.mrb[22].mxu0 }
 0x418   :  { %v2641_v27 = vpop.f32.mrb[23].mxu0 }
 0x41a   :  { %728 = vrot.lane.b32.xlu1 %v2965_v41, %s2853_s2 }
 0x484   :  { %v1379_v31 = vpop.xlane.xlu1 %1378 }
 0x485   :  { %v1401_v32 = vsub.f32 %v1049_v61, %v1379_v31 }
 0x487   :  { %v1409_v35 = vmul.f32 1.442695, %v1401_v32 }
 0x489   :  { %2774 = vpow2.f32 %v1409_v35 }
 0x48c   :  { %v1382_v49 = vpop.xlane.xlu0 %1381 }
 0x48d   :  { %v1402_v50 = vsub.f32 %v1095_v9, %v1382_v49 }
 0x48e   :  { %v1391_v55 = vpop.xlane.xlu1 %1390 }
 0x48f   :  { %v1411_v51 = vmul.f32 1.442695, %v1402_v50  ;;  %v1405_v3 = vsub.f32 %v3136_v12, %v1391_v55 }
 0x490   :  { %v1385_v41 = vpop.xlane.xlu0 %1384 }
 0x491   :  { %2776 = vpow2.f32 %v1411_v51  ;;  %v1403_v57 = vsub.f32 %v3133_v0, %v1385_v41 }
 0x493   :  { %v3147_v39 = vpop.eup %2774  ;;  %v1413_v61 = vmul.f32 1.442695, %v1403_v57 }
 0x494   :  { %v1425_v52 = vsel %vm1008_vm2, %v3147_v39, 0.0  ;;  %v1388_v58 = vpop.xlane.xlu0 %1387 }
 0x495   :  { %1426 = vadd.xlane.f32.xlu1 %v1425_v52  ;;  %v1404_v60 = vsub.f32 %v1187_v21, %v1388_v58  ;;  %2778 = vpow2.f32 %v1413_v61 }
 0x496   :  { %v1397_v59 = vpop.xlane.xlu1 %1396 }
 0x497   :  { %v1407_v62 = vsub.f32 %v1325_v25, %v1397_v59  ;;  %v1415_v63 = vmul.f32 1.442695, %v1404_v60 }
 0x499   :  { %v1421_v5 = vmul.f32 1.442695, %v1407_v62  ;;  %2780 = vpow2.f32 %v1415_v63 }
 0x49a   :  { %v729_v23 = vpop.permute.xlu1 %728 }
 0x49b   :  { %v3151_v53 = vpop.eup %2776  ;;  %2782 = vpow2.f32 %v1421_v5  ;;  %v740_v36 = vshrl.u32 %v729_v23, 16 }
 0x49c   :  { %v1428_v54 = vsel %vm1008_vm2, %v3151_v53, 0.0  ;;  %v1394_v6 = vpop.xlane.xlu0 %1393 }
 0x49d   :  { %1429 = vadd.xlane.f32.xlu0 %v1428_v54 }
 0x49f   :  { %v3160_v0 = vpop.eup %2778 }
 0x4a0   :  { %v1431_v11 = vsel %vm1008_vm2, %v3160_v0, 0.0 }
 0x4a3   :  { %v3162_v10 = vpop.eup %2780 }
 0x4a4   :  { %v1400_v7 = vpop.xlane.xlu0 %1399  ;;  %v1434_v14 = vsel %vm1008_vm2, %v3162_v10, 0.0 }
 0x4a5   :  { %v1408_v8 = vsub.f32 %v1371_v45, %v1400_v7  ;;  %v3166_v12 = vpop.eup %2782 }
 0x4a6   :  { %732 = vrot.lane.b32.xlu1 %v2971_v42, %s2853_s2  ;;  %v1417_v42 = vmul.f32 1.442695, %v1405_v3  ;;  %v1443_v13 = vsel %vm1008_vm2, %v3166_v12, 0.0 }
 0x4a7   :  { %v1423_v9 = vmul.f32 1.442695, %v1408_v8 }
 0x4a8   :  { %2784 = vpow2.f32 %v1417_v42 }
 0x4aa   :  { %734 = vrot.lane.b32.xlu1 %v2977_v44, %s2853_s2  ;;  %v1406_v44 = vsub.f32 %v1279_v34, %v1394_v6 }
 0x4b2   :  { %v3172_v16 = vpop.eup %2784 }
 0x4b3   :  { %730 = vrot.lane.b32.xlu0 %v2973_v43, %s2853_s2  ;;  %v1419_v43 = vmul.f32 1.442695, %v1406_v44  ;;  %v1437_v17 = vsel %vm1008_vm2, %v3172_v16, 0.0 }
 0x4b5   :  { %2786 = vpow2.f32 %v1419_v43 }
 0x4b6   :  { %2788 = vpow2.f32 %v1423_v9 }
 0x4bf   :  { %v3176_v18 = vpop.eup %2786 }
 0x4c0   :  { %v1440_v19 = vsel %vm1008_vm2, %v3176_v18, 0.0  ;;  %v3180_v20 = vpop.eup %2788 }
 0x4c1   :  { %v1446_v21 = vsel %vm1008_vm2, %v3180_v20, 0.0 }
 0x4ce   :  { %1432 = vadd.xlane.f32.xlu1 %v1431_v11 }
 0x4d2   :  { %1444 = vadd.xlane.f32.xlu1 %v1443_v13  ;;  %1435 = vadd.xlane.f32.xlu0 %v1434_v14 }
 0x4d6   :  { %1438 = vadd.xlane.f32.xlu0 %v1437_v17 }
 0x4da   :  { %1441 = vadd.xlane.f32.xlu0 %v1440_v19 }
 0x4de   :  { %1447 = vadd.xlane.f32.xlu0 %v1446_v21 }
 0x522   :  { %v1427_v24 = vpop.xlane.xlu1 %1426 }
 0x523   :  { %2790 = vrcp.f32 %v1427_v24 }
 0x526   :  { %v733_v25 = vpop.permute.xlu1 %732 }
 0x527   :  { %v748_v30 = vshrl.u32 %v733_v25, 16 }
 0x52a   :  { %v735_v22 = vpop.permute.xlu1 %734  ;;  %v1430_v26 = vpop.xlane.xlu0 %1429 }
 0x52b   :  { %v749_v28 = vshrl.u32 %v735_v22, 16  ;;  %v3184_v29 = vpack.i.b16 %v735_v22, %v733_v25  ;;  %2792 = vrcp.f32 %v1430_v26 }
 0x52d   :  { %v3188_v37 = vpack.i.b16 %v749_v28, %v748_v30  ;;  %v774_v40 = vrot.slane %v3184_v29, %v2985_v56  ;;  %v2791_v3 = vpop.eup %2790 }
 0x52e   :  { %v731_v33 = vpop.permute.xlu0 %730  ;;  %v1457_v7 = vmul.f32 %v2791_v3, %v3147_v39 }
 0x52f   :  { %v3186_v34 = vpack.i.b16 %v731_v33, %v729_v23  ;;  %v741_v38 = vshrl.u32 %v731_v33, 16  ;;  %v840_v27 = vrot.slane %v3188_v37, %v2985_v56  ;;  %v833_v28 = vcombine.high %v3188_v37, %v2995_v2 }
 0x530   :  { %v1465_v25 = vpack.c.bf16 %v1457_v7, %v1457_v7 }
 0x531   :  { %v759_v45 = vrot.slane %v3186_v34, %v2985_v56  ;;  %v742_v46 = vpack.i.b16 %v741_v38, %v740_v36  ;;  %v752_v30 = vcombine.high %v3186_v34, %v2995_v2  ;;  %v767_v36 = vcombine.high %v3184_v29, %v2995_v2 }
 0x532   :  { %v847_v34 = vrot.slane %v833_v28, %v2985_v56 }
 0x533   :  { %v782_v47 = vcombine.low %v759_v45, %v774_v40  ;;  %v783_v48 = vcombine.high %v759_v45, %v774_v40  ;;  %v825_v31 = vrot.slane %v742_v46, %v2985_v56  ;;  %v818_v22 = vcombine.high %v742_v46, %v2995_v2 }
 0x534   :  { %v766_v37 = vrot.slane %v752_v30, %v2985_v56  ;;  %v781_v40 = vrot.slane %v767_v36, %v2985_v56 }
 0x535   :  { %v790_v32 = vrot.slane %v782_v47, %v2998_v4  ;;  %v797_v35 = vrot.slane %v783_v48, %v2998_v4  ;;  %v848_v49 = vcombine.low %v825_v31, %v840_v27  ;;  %v849_v50 = vcombine.high %v825_v31, %v840_v27  ;;  %v2793_v42 = vpop.eup %2792 }
 0x536   :  { %v1458_v13 = vmul.f32 %v2793_v42, %v3151_v53  ;;  %v832_v38 = vrot.slane %v818_v22, %v2985_v56  ;;  %v798_v47 = vcombine.low %v766_v37, %v781_v40  ;;  %v799_v48 = vcombine.high %v766_v37, %v781_v40 }
 0x537   :  { %v884_v51 = vcombine.low %v790_v32, %v797_v35  ;;  %v2491_v52 = vcombine.high %v790_v32, %v797_v35  ;;  %v856_v54 = vrot.slane %v848_v49, %v2998_v4  ;;  %v863_v41 = vrot.slane %v849_v50, %v2998_v4 }
 0x538   :  { %v1466_v26 = vpack.c.bf16 %v1458_v13, %v1458_v13  ;;  %v864_v45 = vcombine.low %v832_v38, %v847_v34  ;;  %v865_v46 = vcombine.high %v832_v38, %v847_v34  ;;  %v806_v27 = vrot.slane %v798_v47, %v2998_v4 }
 0x539   :  { %v891_v55 = vrot.slane %v884_v51, %v2985_v56  ;;  %v899_v57 = vrot.slane %v2491_v52, %v2985_v56  ;;  %v909_v58 = vcombine.low %v856_v54, %v863_v41  ;;  %v2492_v59 = vcombine.high %v856_v54, %v863_v41 }
 0x53a   :  { %v872_v2 = vrot.slane %v864_v45, %v2998_v4  ;;  %v879_v29 = vrot.slane %v865_v46, %v2998_v4  ;;  %v813_v31 = vrot.slane %v799_v48, %v2998_v4 }
 0x53b   :  { %v900_v60 = vcombine.low %v891_v55, %v899_v57  ;;  %v916_v61 = vrot.slane %v909_v58, %v2985_v56  ;;  %v924_v62 = vrot.slane %v2492_v59, %v2985_v56 }
 0x53c   :  { %v959_v32 = vcombine.low %v872_v2, %v879_v29  ;;  %v2494_v35 = vcombine.high %v872_v2, %v879_v29  ;;  %v934_v49 = vcombine.low %v806_v27, %v813_v31  ;;  %v2493_v50 = vcombine.high %v806_v27, %v813_v31 }
 0x53d   :  { %v907_v63 = vrot.slane %v900_v60, %v2998_v4  ;;  %v925_v5 = vcombine.low %v916_v61, %v924_v62 }
 0x53e   :  { %v966_v52 = vrot.slane %v959_v32, %v2985_v56  ;;  %v974_v54 = vrot.slane %v2494_v35, %v2985_v56  ;;  %v941_v41 = vrot.slane %v934_v49, %v2985_v56  ;;  %v949_v55 = vrot.slane %v2493_v50, %v2985_v56 }
 0x53f   :  { %v908_v6 = vcombine.high %v907_v63, %v2852_v1  ;;  %v932_v44 = vrot.slane %v925_v5, %v2998_v4  ;;  %v987_v8 = vshrl.u32 %v907_v63, 16 }
 0x540   :  { %v975_v58 = vcombine.low %v966_v52, %v974_v54  ;;  %v950_v59 = vcombine.low %v941_v41, %v949_v55 }
 0x541   :  { %v986_v43 = vpack.i.b16 %v932_v44, %v907_v63  ;;  %v988_v9 = vshrl.u32 %v932_v44, 16  ;;  %v933_v11 = vcombine.high %v932_v44, %v2852_v1  ;;  %v993_v14 = vshrl.u32 %v908_v6, 16 }
 0x542   :  { %v982_v61 = vrot.slane %v975_v58, %v2998_v4  ;;  %v957_v63 = vrot.slane %v950_v59, %v2998_v4 }
 0x543   :  { %v1478_v17 = vsel %vm1476_vm3, %v986_v43, 0  ;;  %v989_v19 = vpack.i.b16 %v988_v9, %v987_v8  ;;  %v992_v21 = vpack.i.b16 %v933_v11, %v908_v6  ;;  %v994_v23 = vshrl.u32 %v933_v11, 16 }
 0x544   :  { %2643 = vmatpush3.bf16.msra.mxu1 %v1478_v17  ;;  %v998_v42 = vpack.i.b16 %v982_v61, %v957_v63  ;;  %v1000_v44 = vshrl.u32 %v982_v61, 16  ;;  %v999_v43 = vshrl.u32 %v957_v63, 16  ;;  %v983_v13 = vcombine.high %v982_v61, %v2852_v1 }
 0x545   :  { %v1524_v24 = vsel %vm1476_vm3, %v989_v19, 0  ;;  %2654 = vmatprep.subr.bf16.mxu1 %v2844_v15  ;;  %v995_v39 = vpack.i.b16 %v994_v23, %v993_v14  ;;  %v1570_v53 = vsel %vm1476_vm3, %v992_v21, 0 }
 0x546   :  { %2649 = vmatpush3.bf16.msra.mxu0 %v1524_v24  ;;  %v1662_v9 = vsel %vm1476_vm3, %v998_v42, 0  ;;  %v1001_v17 = vpack.i.b16 %v1000_v44, %v999_v43 }
 0x547   :  { %2645 = vmatmul.mubr.msk.bf16.vlgmr.msra.gmra.mrb[12].mxu1 %vm1008_vm2, %v1465_v25  ;;  %2660 = vmatprep.subr.bf16.mxu0 %v2844_v15  ;;  %v1616_v33 = vsel %vm1476_vm3, %v995_v39, 0 }
 0x548   :  { %2655 = vmatpush3.bf16.msra.mxu1 %v1570_v53  ;;  %2656 = vmatprep.mubr.msk.bf16.mxu1 %vm2845_vm1, %v2844_v15  ;;  %v1708_v25 = vsel %vm1476_vm3, %v1001_v17, 0 }
 0x549   :  { %2651 = vmatmul.mubr.msk.bf16.vlgmr.msra.gmra.mrb[24].mxu0 %vm1008_vm2, %v1466_v26  ;;  %2666 = vmatprep.subr.bf16.mxu1 %v2844_v15 }
 0x54a   :  { %2661 = vmatpush3.bf16.msra.mxu0 %v1616_v33  ;;  %2662 = vmatprep.mubr.msk.bf16.mxu0 %vm2845_vm1, %v2844_v15 }
 0x54b   :  { %2672 = vmatprep.subr.bf16.mxu0 %v2844_v15 }
 0x55b   :  { %v1433_v51 = vpop.xlane.xlu1 %1432 }
 0x55c   :  { %2794 = vrcp.f32 %v1433_v51 }
 0x55f   :  { %v1436_v57 = vpop.xlane.xlu0 %1435  ;;  %v1445_v62 = vpop.xlane.xlu1 %1444 }
 0x560   :  { %2796 = vrcp.f32 %v1436_v57 }
 0x563   :  { %v1439_v60 = vpop.xlane.xlu0 %1438 }
 0x564   :  { %2798 = vrcp.f32 %v1439_v60 }
 0x565   :  { %2800 = vrcp.f32 %v1445_v62 }
 0x566   :  { %v2795_v3 = vpop.eup %2794 }
 0x567   :  { %v1459_v5 = vmul.f32 %v2795_v3, %v3160_v0  ;;  %v1442_v6 = vpop.xlane.xlu0 %1441  ;;  %v958_v0 = vcombine.high %v957_v63, %v2852_v1 }
 0x568   :  { %2802 = vrcp.f32 %v1442_v6 }
 0x569   :  { %v1467_v7 = vpack.c.bf16 %v1459_v5, %v1459_v5  ;;  %v1004_v24 = vpack.i.b16 %v983_v13, %v958_v0  ;;  %v1005_v1 = vshrl.u32 %v958_v0, 16 }
 0x56a   :  { %v2797_v8 = vpop.eup %2796 }
 0x56b   :  { %2657 = vmatmul.mubr.msk.bf16.vlgmr.msra.gmra.mrb[16].mxu1 %vm1008_vm2, %v1467_v7  ;;  %v1448_v11 = vpop.xlane.xlu0 %1447  ;;  %v1460_v14 = vmul.f32 %v2797_v8, %v3162_v10  ;;  %v1006_v10 = vshrl.u32 %v983_v13, 16 }
 0x56c   :  { %2667 = vmatpush3.bf16.msra.mxu1 %v1662_v9  ;;  %2668 = vmatprep.mubr.msk.bf16.mxu1 %vm2845_vm1, %v2844_v15  ;;  %2804 = vrcp.f32 %v1448_v11 }
 0x56d   :  { %2678 = vmatprep.subr.bf16.mxu1 %v2844_v15  ;;  %v1468_v21 = vpack.c.bf16 %v1460_v14, %v1460_v14  ;;  %v1007_v28 = vpack.i.b16 %v1006_v10, %v1005_v1 }
 0x56e   :  { %v2799_v19 = vpop.eup %2798 }
 0x56f   :  { %v1461_v23 = vmul.f32 %v2799_v19, %v3172_v16  ;;  %2663 = vmatmul.mubr.msk.bf16.vlgmr.msra.gmra.mrb[28].mxu0 %vm1008_vm2, %v1468_v21  ;;  %v2801_v39 = vpop.eup %2800  ;;  %v1754_v16 = vsel %vm1476_vm3, %v1004_v24, 0  ;;  %v1800_v38 = vsel %vm1476_vm3, %v1007_v28, 0 }
 0x570   :  { %2673 = vmatpush3.bf16.msra.mxu0 %v1708_v25  ;;  %2674 = vmatprep.mubr.msk.bf16.mxu0 %vm2845_vm1, %v2844_v15  ;;  %v1463_v30 = vmul.f32 %v2801_v39, %v3166_v12 }
 0x571   :  { %v1469_v22 = vpack.c.bf16 %v1461_v23, %v1461_v23  ;;  %2684 = vmatprep.subr.bf16.mxu0 %v2844_v15 }
 0x572   :  { %v2803_v53 = vpop.eup %2802 }
 0x573   :  { %v1462_v26 = vmul.f32 %v2803_v53, %v3176_v18  ;;  %2669 = vmatmul.mubr.msk.bf16.vlgmr.msra.gmra.mrb[20].mxu1 %vm1008_vm2, %v1469_v22  ;;  %v1471_v18 = vpack.c.bf16 %v1463_v30, %v1463_v30 }
 0x574   :  { %2679 = vmatpush3.bf16.msra.mxu1 %v1754_v16  ;;  %2680 = vmatprep.mubr.msk.bf16.mxu1 %vm2845_vm1, %v2844_v15 }
 0x575   :  { %v1470_v33 = vpack.c.bf16 %v1462_v26, %v1462_v26  ;;  %2690 = vmatprep.subr.bf16.mxu1 %v2844_v15 }
 0x576   :  { %v2805_v36 = vpop.eup %2804 }
 0x577   :  { %2675 = vmatmul.mubr.msk.bf16.vlgmr.msra.gmra.mrb[32].mxu0 %vm1008_vm2, %v1470_v33  ;;  %v1464_v34 = vmul.f32 %v2805_v36, %v3180_v20 }
 0x578   :  { %2685 = vmatpush3.bf16.msra.mxu0 %v1800_v38  ;;  %2686 = vmatprep.mubr.msk.bf16.mxu0 %vm2845_vm1, %v2844_v15 }
 0x579   :  { %2698 = vmatprep.subr.bf16.mxu0 %v2844_v15  ;;  %v1472_v12 = vpack.c.bf16 %v1464_v34, %v1464_v34 }
 0x57b   :  { %2681 = vmatmul.mubr.msk.bf16.vlgmr.msra.gmra.mrb[24].mxu1 %vm1008_vm2, %v1471_v18 }
 0x57c   :  { %2694 = vmatprep.mubr.msk.bf16.mxu1 %vm2845_vm1, %v2844_v15 }
 0x57f   :  { %2687 = vmatmul.mubr.msk.bf16.vlgmr.msra.gmra.mrb[36].mxu0 %vm1008_vm2, %v1472_v12 }
 0x580   :  { %2702 = vmatprep.mubr.msk.bf16.mxu0 %vm2845_vm1, %v2844_v15 }
 0x61a   :  { %v1514_v37 = vpop.f32.mrb[12].mxu1 }
 0x61b   :  { %v2646_v40 = vpop.f32.mrb[13].mxu1 }
 0x61c   :  { %v1517_v45 = vpop.f32.mrb[14].mxu1  ;;  %v1560_v46 = vpop.f32.mrb[24].mxu0 }
 0x61d   :  { %v2647_v47 = vpop.f32.mrb[15].mxu1  ;;  %v2652_v48 = vpop.f32.mrb[25].mxu0 }
 0x61e   :  { %v1563_v20 = vpop.f32.mrb[26].mxu0 }
 0x61f   :  { %v2653_v2 = vpop.f32.mrb[27].mxu0 }
 0x63e   :  { %v1606_v29 = vpop.f32.mrb[16].mxu1 }
 0x63f   :  { %v1842_v27 = vcombine.low %v1514_v37, %v1606_v29  ;;  %v1843_v31 = vcombine.high %v1514_v37, %v1606_v29  ;;  %v2658_v32 = vpop.f32.mrb[17].mxu1 }
 0x640   :  { %v1609_v35 = vpop.f32.mrb[18].mxu1 }
 0x641   :  { %v2659_v49 = vpop.f32.mrb[19].mxu1  ;;  %v1850_v55 = vrot.slane %v1842_v27, %v2985_v56  ;;  %v1857_v57 = vrot.slane %v1843_v31, %v2985_v56 }
 0x642   :  { %v1652_v50 = vpop.f32.mrb[28].mxu0 }
 0x643   :  { %v1858_v51 = vcombine.low %v1560_v46, %v1652_v50  ;;  %v1859_v52 = vcombine.high %v1560_v46, %v1652_v50  ;;  %v2664_v54 = vpop.f32.mrb[29].mxu0 }
 0x644   :  { %v1655_v41 = vpop.f32.mrb[30].mxu0 }
 0x645   :  { %v1866_v58 = vrot.slane %v1858_v51, %v2985_v56  ;;  %v1873_v59 = vrot.slane %v1859_v52, %v2985_v56  ;;  %v2665_v60 = vpop.f32.mrb[31].mxu0 }
 0x646   :  { %v1698_v61 = vpop.f32.mrb[20].mxu1 }
 0x647   :  { %v2670_v62 = vpop.f32.mrb[21].mxu1  ;;  %v1874_v63 = vcombine.low %v1850_v55, %v1866_v58  ;;  %v1875_v3 = vcombine.high %v1850_v55, %v1866_v58  ;;  %v1890_v5 = vcombine.low %v1857_v57, %v1873_v59  ;;  %v1891_v6 = vcombine.high %v1857_v57, %v1873_v59 }
 0x648   :  { %v1701_v42 = vpop.f32.mrb[22].mxu1 }
 0x649   :  { %v2671_v44 = vpop.f32.mrb[23].mxu1  ;;  %v1882_v7 = vrot.slane %v1874_v63, %v2998_v4  ;;  %v1889_v43 = vrot.slane %v1875_v3, %v2998_v4  ;;  %v1898_v8 = vrot.slane %v1890_v5, %v2998_v4  ;;  %v1905_v9 = vrot.slane %v1891_v6, %v2998_v4  ;;  %v2758_v3 = vld [vmem:[%s3426_s3] sm:$0xff]  }
 0x64a   :  { %v1744_v11 = vpop.f32.mrb[32].mxu0  ;;  %2691 = vmatpush3.bf16.msra.mxu1 %v2758_v3 }
 0x64b   :  { %v1978_v13 = vcombine.low %v1882_v7, %v1889_v43  ;;  %v2511_v14 = vcombine.high %v1882_v7, %v1889_v43  ;;  %v1994_v17 = vcombine.low %v1898_v8, %v1905_v9  ;;  %v2512_v0 = vcombine.high %v1898_v8, %v1905_v9  ;;  %v2676_v19 = vpop.f32.mrb[33].mxu0  ;;  %2692 = vmatprep.subr.bf16.mxu1 %v2844_v15 }
 0x64c   :  { %v1747_v21 = vpop.f32.mrb[34].mxu0 }
 0x64d   :  { %v1985_v23 = vrot.slane %v1978_v13, %v2985_v56  ;;  %v1993_v24 = vrot.slane %v2511_v14, %v2985_v56  ;;  %v2001_v25 = vrot.slane %v1994_v17, %v2985_v56  ;;  %v2009_v10 = vrot.slane %v2512_v0, %v2985_v56  ;;  %v2677_v39 = vpop.f32.mrb[35].mxu0 }
 0x64e   :  { %v1790_v22 = vpop.f32.mrb[24].mxu1 }
 0x64f   :  { %v1910_v53 = vcombine.low %v1698_v61, %v1790_v22  ;;  %v1911_v1 = vcombine.high %v1698_v61, %v1790_v22  ;;  %v2682_v26 = vpop.f32.mrb[25].mxu1  ;;  %v2011_v28 = vcombine.high %v1985_v23, %v1993_v24  ;;  %v2027_v30 = vcombine.high %v2001_v25, %v2009_v10 }
 0x650   :  { %v1793_v16 = vpop.f32.mrb[26].mxu1  ;;  %v2010_v33 = vcombine.low %v1985_v23, %v1993_v24  ;;  %v2026_v36 = vcombine.low %v2001_v25, %v2009_v10 }
 0x651   :  { %v2683_v38 = vpop.f32.mrb[27].mxu1  ;;  %v2025_v18 = vrot.slane %v2011_v28, %v2998_v4  ;;  %v2041_v34 = vrot.slane %v2027_v30, %v2998_v4  ;;  %v1918_v31 = vrot.slane %v1910_v53, %v2985_v56  ;;  %v1925_v32 = vrot.slane %v1911_v1, %v2985_v56 }
 0x652   :  { %v3295_v12 = vrot.slane %v2010_v33, %v2998_v4  ;;  %v3298_v37 = vrot.slane %v2026_v36, %v2998_v4  ;;  %v1836_v40 = vpop.f32.mrb[36].mxu0 }
 0x653   :  { %v1926_v45 = vcombine.low %v1744_v11, %v1836_v40  ;;  %v1927_v46 = vcombine.high %v1744_v11, %v1836_v40  ;;  %v2688_v47 = vpop.f32.mrb[37].mxu0  ;;  %v2044_v48 = vcombine.low %v2025_v18, %v2041_v34  ;;  %v2045_v27 = vcombine.high %v2025_v18, %v2041_v34  ;;  %v2759_v11 = vld [vmem:[%s3426_s3 + $0x8] sm:$0xff]   ;;  %s2855_s3 = smov 8   ;;  %v2515_v40 = vld [vmem:[%s3427_s4] ss:$0 sm:$0xff] }
 0x654   :  { %v2042_v20 = vcombine.low %v3295_v12, %v3298_v37  ;;  %v1839_v2 = vpop.f32.mrb[38].mxu0  ;;  %v2043_v29 = vcombine.high %v3295_v12, %v3298_v37  ;;  %2693 = vmatpush3.bf16.msra.mxu1 %v2759_v11 }
 0x655   :  { %v1934_v35 = vrot.slane %v1926_v45, %v2985_v56  ;;  %v1941_v49 = vrot.slane %v1927_v46, %v2985_v56  ;;  %v2689_v50 = vpop.f32.mrb[39].mxu0  ;;  %2706 = vmatprep.subr.bf16.mxu1 %v2844_v15 }
 0x657   :  { %v1942_v51 = vcombine.low %v1918_v31, %v1934_v35  ;;  %v1943_v52 = vcombine.high %v1918_v31, %v1934_v35  ;;  %v1958_v54 = vcombine.low %v1925_v32, %v1941_v49  ;;  %v1959_v41 = vcombine.high %v1925_v32, %v1941_v49  ;;  %v2819_v31 = vld [vmem:[%s3423_s0 + $0x8] sm:$0xff] }
 0x659   :  { %v1950_v55 = vrot.slane %v1942_v51, %v2998_v4  ;;  %v1957_v57 = vrot.slane %v1943_v52, %v2998_v4  ;;  %v1966_v58 = vrot.slane %v1958_v54, %v2998_v4  ;;  %v1973_v59 = vrot.slane %v1959_v41, %v2998_v4 }
 0x65b   :  { %v2046_v60 = vcombine.low %v1950_v55, %v1957_v57  ;;  %v2513_v61 = vcombine.high %v1950_v55, %v1957_v57  ;;  %v2062_v62 = vcombine.low %v1966_v58, %v1973_v59  ;;  %v2514_v63 = vcombine.high %v1966_v58, %v1973_v59 }
 0x65d   :  { %v2053_v5 = vrot.slane %v2046_v60, %v2985_v56  ;;  %v2061_v6 = vrot.slane %v2513_v61, %v2985_v56  ;;  %v2069_v42 = vrot.slane %v2062_v62, %v2985_v56  ;;  %v2077_v44 = vrot.slane %v2514_v63, %v2985_v56  ;;  %v2760_v61 = vld [vmem:[%s3432_s9] sm:$0xff]   ;;  %v2761_v62 = vld [vmem:[%s3432_s9 + $0x8] sm:$0xff]  }
 0x65e   :  { %2699 = vmatpush3.bf16.msra.mxu0 %v2760_v61 }
 0x65f   :  { %v2079_v7 = vcombine.high %v2053_v5, %v2061_v6  ;;  %v2095_v43 = vcombine.high %v2069_v42, %v2077_v44  ;;  %v2078_v8 = vcombine.low %v2053_v5, %v2061_v6  ;;  %v2094_v9 = vcombine.low %v2069_v42, %v2077_v44  ;;  %2700 = vmatprep.subr.bf16.mxu0 %v2844_v15 }
 0x661   :  { %v2093_v13 = vrot.slane %v2079_v7, %v2998_v4  ;;  %v2109_v14 = vrot.slane %v2095_v43, %v2998_v4  ;;  %v2086_v17 = vrot.slane %v2078_v8, %v2998_v4  ;;  %v2102_v0 = vrot.slane %v2094_v9, %v2998_v4  ;;  %v2519_v43 = vld [vmem:[%s3430_s7] ss:$0 sm:$0xff] }
 0x662   :  { %2701 = vmatpush3.bf16.msra.mxu0 %v2761_v62 }
 0x663   :  { %v2112_v56 = vcombine.low %v2093_v13, %v2109_v14  ;;  %v2111_v19 = vcombine.high %v2086_v17, %v2102_v0  ;;  %v2110_v21 = vcombine.low %v2086_v17, %v2102_v0  ;;  %v2113_v23 = vcombine.high %v2093_v13, %v2109_v14  ;;  %v2520_v14 = vld [vmem:[%s3431_s8] ss:$0 sm:$0xff] }
 0x665   :  { %v2746_v24 = vpack.i.bf16 %v2112_v56, %v2044_v48  ;;  %v2741_v25 = vpack.i.bf16 %v2111_v19, %v2043_v29  ;;  %v2751_v10 = vpack.i.bf16 %v2113_v23, %v2045_v27  ;;  %v2763_v23 = vld [vmem:[%s3434_s11 + $0x8] sm:$0xff]  }
 0x667   :  { %2747 = vrot.lane.b32.xlu0 %v2746_v24, %s2854_s27  ;;  %2742 = vrot.lane.b32.xlu1 %v2741_v25, %s2855_s3  ;;  %v2764_v24 = vld [vmem:[%s3434_s11 + $0x10] sm:$0xff]   ;;  %v2765_v25 = vld [vmem:[%s3434_s11 + $0x18] sm:$0xff]  }
 0x66b   :  { %2752 = vrot.lane.b32.xlu1 %v2751_v10, %s2856_s28  ;;  %v2766_v10 = vld [vmem:[%s3434_s11 + $0x20] sm:$0xff]  }
 0x6d9   :  { %v2748_v39 = vpop.permute.xlu0 %2747  ;;  %v2743_v22 = vpop.permute.xlu1 %2742 }
 0x6da   :  { %v2745_v4 = vunpack.i.h.bf16 %v2743_v22  ;;  %v2744_v53 = vunpack.i.l.bf16 %v2743_v22  ;;  %v2750_v1 = vunpack.i.h.bf16 %v2748_v39  ;;  %v2749_v26 = vunpack.i.l.bf16 %v2748_v39  ;;  %v2767_v39 = vld [vmem:[%s3434_s11 + $0x28] sm:$0xff]   ;;  %v2768_v22 = vld [vmem:[%s3434_s11 + $0x30] sm:$0xff]  }
 0x6dc   :  { %v2138_v16 = vsel %vm1008_vm2, %v2042_v20, %v2744_v53  ;;  %v2139_v28 = vsel %vm1008_vm2, %v2110_v21, %v2745_v4  ;;  %v2818_v20 = vld [vmem:[%s3423_s0] sm:$0xff]  ;;  %v2769_v4 = vld [vmem:[%s3434_s11 + $0x38] sm:$0xff]   ;;  %s2857_s0 = smov [#allocation2]  }
 0x6dd   :  { %v2753_v30 = vpop.permute.xlu1 %2752  ;;  %v2141_v38 = vsel %vm2140_vm4, %v2138_v16, %v2749_v26  ;;  %v2142_v18 = vsel %vm2140_vm4, %v2139_v28, %v2750_v1  ;;  %v2762_v21 = vld [vmem:[%s3434_s11] sm:$0xff]   ;;  %s2466_s4 = sshll.u32 %s2857_s0, 4  ;;  %s2467_s4 = int_to_ptr.vmem [resolvable:$true] %s2466_s4 }
 0x6de   :  { %v2755_v33 = vunpack.i.h.bf16 %v2753_v30  ;;  %v2754_v36 = vunpack.i.l.bf16 %v2753_v30  ;;  %v2521_v53 = vld [vmem:[%s3433_s10] ss:$0 sm:$0xff]  ;;  %s2820_s17 = scalar_lea.vmem %s2467_s4, 256  ;;  %p2825_p1 = scmp.lt.s32.totalorder %s2467_s4, %s2467_s4 }
 0x6df   :  { %p2821_p0 = scmp.ne.s32.totalorder %s2467_s4, %s2820_s17  ;;  %p2826_p2 = scmp.lt.s32.totalorder %s2820_s17, %s2820_s17 }
 0x6e0   :  { %v2144_v34 = vsel %vm2143_vm5, %v2141_v38, %v2754_v36  ;;  %v2145_v12 = vsel %vm2143_vm5, %v2142_v18, %v2755_v33 }
 0x6e1   :  { %v2146_v37 = vpack.c.bf16 %v2145_v12, %v2144_v34  ;;  %p2827_p3 = por %p2826_p2, %p2825_p1 }
 0x6e3   :  { %2695 = vmatmul.mubr.msk.bf16.vlgmr.msra.gmra.mrb[28].mxu1 %vm50_vm0, %v2146_v37  ;;  %p2828_p4 = pnand %p2827_p3, %p2821_p0 }
 0x6e4   :  { %2722 = vmatprep.mubr.msk.bf16.mxu1 %vm2845_vm1, %v2844_v15  ;;  %2707 = vmatpush3.bf16.msra.mxu1 %v2762_v21 }
 0x6e5   :  { %2708 = vmatprep.subr.bf16.mxu1 %v2844_v15 }
 0x6e8   :  { %2709 = vmatpush3.bf16.msra.mxu1 %v2763_v23 }
 0x6e9   :  { %2710 = vmatprep.subr.bf16.mxu1 %v2844_v15 }
 0x6ec   :  { %2711 = vmatpush3.bf16.msra.mxu1 %v2764_v24 }
 0x6ed   :  { %2712 = vmatprep.subr.bf16.mxu1 %v2844_v15 }
 0x6f0   :  { %2713 = vmatpush3.bf16.msra.mxu1 %v2765_v25 }
 0x6f1   :  { %2714 = vmatprep.subr.bf16.mxu1 %v2844_v15 }
 0x6f4   :  { %2715 = vmatpush3.bf16.msra.mxu1 %v2766_v10 }
 0x6f5   :  { %2716 = vmatprep.subr.bf16.mxu1 %v2844_v15 }
 0x6f8   :  { %2717 = vmatpush3.bf16.msra.mxu1 %v2767_v39 }
 0x6f9   :  { %2718 = vmatprep.subr.bf16.mxu1 %v2844_v15 }
 0x6fc   :  { %2719 = vmatpush3.bf16.msra.mxu1 %v2768_v22 }
 0x6fd   :  { %2720 = vmatprep.subr.bf16.mxu1 %v2844_v15 }
 0x700   :  { %2721 = vmatpush3.bf16.msra.mxu1 %v2769_v4 }
 0x7b6   :  { %v2207_v45 = vpop.f32.mrb[28].mxu1 }
 0x7b7   :  { %v2208_v46 = vadd.f32 %v2515_v40, %v2207_v45  ;;  %v2696_v47 = vpop.f32.mrb[29].mxu1 }
 0x7b8   :  { %v2210_v48 = vpop.f32.mrb[30].mxu1 }
 0x7b9   :  { %v3340_v2 = vadd.f32 %v2818_v20, %v2208_v46  ;;  %v2211_v29 = vadd.f32 %v2515_v40, %v2210_v48  ;;  %v2697_v27 = vpop.f32.mrb[31].mxu1 }
 0x7bb   :  { %v3345_v32 = vadd.f32 %v2819_v31, %v2211_v29  ;;  %v2218_v35 = vsel %vm50_vm0, %v3340_v2, 0.0  ;;  %v2527_v29 = vld [vmem:[%s3435_s12] ss:$0 sm:$0xff] }
 0x7bc   :  { %2219 = vadd.xlane.f32.xlu1 %v2218_v35 }
 0x7bd   :  { %v2221_v49 = vsel %vm50_vm0, %v3345_v32, 0.0 }
 0x7be   :  { %2222 = vadd.xlane.f32.xlu0 %v2221_v49 }
 0x849   :  { %v2220_v50 = vpop.xlane.xlu1 %2219 }
 0x84a   :  { %v2224_v51 = vmul.f32 0.03125, %v2220_v50 }
 0x84b   :  { %v2223_v52 = vpop.xlane.xlu0 %2222 }
 0x84c   :  { %v2226_v54 = vsub.f32 %v3340_v2, %v2224_v51  ;;  %v2225_v41 = vmul.f32 0.03125, %v2223_v52 }
 0x84e   :  { %v2227_v55 = vsub.f32 %v3345_v32, %v2225_v41  ;;  %v2228_v57 = vmul.f32 %v2226_v54, %v2226_v54 }
 0x850   :  { %v2230_v58 = vsel %vm50_vm0, %v2228_v57, 0.0  ;;  %v2229_v59 = vmul.f32 %v2227_v55, %v2227_v55 }
 0x851   :  { %2231 = vadd.xlane.f32.xlu0 %v2230_v58 }
 0x852   :  { %v2233_v60 = vsel %vm50_vm0, %v2229_v59, 0.0 }
 0x853   :  { %2234 = vadd.xlane.f32.xlu1 %v2233_v60 }
 0x8de   :  { %v2232_v63 = vpop.xlane.xlu0 %2231 }
 0x8df   :  { %v2236_v3 = vmul.f32 0.03125, %v2232_v63 }
 0x8e0   :  { %v2235_v5 = vpop.xlane.xlu1 %2234 }
 0x8e1   :  { %v2238_v6 = vadd.f32 1e-05, %v2236_v3  ;;  %v2237_v42 = vmul.f32 0.03125, %v2235_v5 }
 0x8e3   :  { %2806 = vrsqrt.f32 %v2238_v6  ;;  %v2239_v44 = vadd.f32 1e-05, %v2237_v42 }
 0x8e5   :  { %2808 = vrsqrt.f32 %v2239_v44 }
 0x8ed   :  { %v2807_v7 = vpop.eup %2806 }
 0x8ee   :  { %v2242_v8 = vmul.f32 %v2807_v7, %v2226_v54 }
 0x8ef   :  { %v2809_v9 = vpop.eup %2808 }
 0x8f0   :  { %v2250_v11 = vmul.f32 %v2519_v43, %v2242_v8  ;;  %v2243_v13 = vmul.f32 %v2809_v9, %v2227_v55 }
 0x8f2   :  { %v2251_v17 = vmul.f32 %v2519_v43, %v2243_v13  ;;  %v2258_v0 = vadd.f32 %v2520_v14, %v2250_v11 }
 0x8f4   :  { %v2259_v56 = vadd.f32 %v2520_v14, %v2251_v17 }
 0x8f6   :  { %v2260_v19 = vpack.c.bf16 %v2259_v56, %v2258_v0 }
 0x8f8   :  { %2703 = vmatmul.mubr.msk.bf16.vlgmr.msra.gmra.mrb[40].mxu0 %vm50_vm0, %v2260_v19 }
 0x9cb   :  { %v2321_v1 = vpop.f32.mrb[40].mxu0 }
 0x9cc   :  { %v2322_v26 = vadd.f32 %v2521_v53, %v2321_v1  ;;  %v2704_v16 = vpop.f32.mrb[41].mxu0 }
 0x9cd   :  { %v2324_v28 = vpop.f32.mrb[42].mxu0 }
 0x9ce   :  { %v2525_v30 = vmul.f32 -1.702, %v2322_v26  ;;  %v2325_v33 = vadd.f32 %v2521_v53, %v2324_v28  ;;  %v2705_v36 = vpop.f32.mrb[43].mxu0 }
 0x9d0   :  { %v2332_v38 = vmul.f32 1.442695, %v2525_v30  ;;  %v2526_v18 = vmul.f32 -1.702, %v2325_v33 }
 0x9d2   :  { %2810 = vpow2.f32 %v2332_v38  ;;  %v2334_v15 = vmul.f32 1.442695, %v2526_v18 }
 0x9d4   :  { %2812 = vpow2.f32 %v2334_v15 }
 0x9dc   :  { %v2811_v34 = vpop.eup %2810 }
 0x9dd   :  { %v2336_v12 = vadd.f32 1.0, %v2811_v34 }
 0x9de   :  { %v2813_v37 = vpop.eup %2812 }
 0x9df   :  { %2814 = vrcp.f32 %v2336_v12  ;;  %v2337_v40 = vadd.f32 1.0, %v2813_v37 }
 0x9e1   :  { %2816 = vrcp.f32 %v2337_v40 }
 0x9e9   :  { %v2815_v45 = vpop.eup %2814 }
 0x9ea   :  { %v2342_v47 = vmul.f32 %v2815_v45, %v2322_v26 }
 0x9eb   :  { %v2817_v46 = vpop.eup %2816 }
 0x9ec   :  { %v2343_v48 = vmul.f32 %v2817_v46, %v2325_v33 }
 0x9ee   :  { %v2344_v20 = vpack.c.bf16 %v2343_v48, %v2342_v47 }
 0x9f0   :  { %2723 = vmatmul.mubr.bf16.vlgmr.msra.gmra.mrb[32].mxu1 %v2344_v20 }
 0xac3   :  { %v2450_v27 = vpop.f32.mrb[32].mxu1 }
 0xac4   :  { %v2451_v31 = vadd.f32 %v2527_v29, %v2450_v27  ;;  %v2724_v35 = vpop.f32.mrb[33].mxu1 }
 0xac5   :  { %v2453_v49 = vpop.f32.mrb[34].mxu1 }
 0xac6   :  { %v2457_v50 = vadd.f32 %v2451_v31, %v3340_v2  ;;  %v2454_v51 = vadd.f32 %v2527_v29, %v2453_v49  ;;  %v2725_v52 = vpop.f32.mrb[35].mxu1 }
 0xac8   :  { %2459 = vst.msk [vmem:[#allocation2] sm:$0xff] %vm50_vm0, %v2457_v50  ;;  %v2458_v54 = vadd.f32 %v2454_v51, %v3345_v32 }
 0xaca   :  { %2460 = vst.msk [vmem:[#allocation2 + $0x8] sm:$0xff] %vm50_vm0, %v2458_v54 }
 0xacb   :  { %2831 = shalt.err (!%p2828_p4)
}
 0xacc   :  { %s2832_s19 = scalar_lea.hbm %s3436_s13, 256 }
 0xacd   :  { %p2833_p5 = scmp.ne.s32.totalorder %s3436_s13, %s2832_s19  ;;  %p2836_p6 = scmp.lt.u32.totalorder %s2832_s19, %s3436_s13 }
 0xacf   :  { %p2838_p7 = pnand %p2836_p6, %p2833_p5 }
 0xad1   :  { %2841 = shalt.err (!%p2838_p7)
}
 0xad2   :  { %s2858_s21 = smov 128  }
 0xad3   :  { %2472 = dma.vmem_to_hbm [thread:$0]  %s2467_s4, 256, %s3436_s13, [#allocation3], %s2858_s21, %s2858_s21, %s2855_s3  }
 0xad4   :  { %2842 = dma.done.wait [#allocation3], 256  }
 0xad5   :  { %2843 = vsyncadd [#allocation3], 4294967040 }
 0xad6   :  { %2476 = vsyncpa [#allocation3], 1 }

// kernel: tpu_custom_call.1
= control target key start
LH: loop header
LB: loop body
LE: loop exit
PB: predicated region body
PF: predicated region fallthrough
CT: control target
= control target key end

     0   :  { %vm50_vm0 = vcmask 261120   ;;  %s3423_s0 = inlined_call_operand.vmem [shape: f32[2,8,32], index: 0, kind: input, shape index: {}]   ;;  %s3424_s1 = inlined_call_operand.vmem [shape: bf16[32,96], index: 1, kind: input, shape index: {}]   ;;  %s3425_s2 = inlined_call_operand.vmem [shape: f32[1,96], index: 2, kind: input, shape index: {}]   ;;  %s3426_s3 = inlined_call_operand.vmem [shape: bf16[32,32], index: 3, kind: input, shape index: {}]   ;;  %s3427_s4 = inlined_call_operand.vmem [shape: f32[1,32], index: 4, kind: input, shape index: {}]   ;;  %s3428_s5 = inlined_call_operand.vmem [shape: f32[1,32], index: 5, kind: input, shape index: {}]   ;;  %s3429_s6 = inlined_call_operand.vmem [shape: f32[1,32], index: 6, kind: input, shape index: {}]   ;;  %s3430_s7 = inlined_call_operand.vmem [shape: f32[1,32], index: 7, kind: input, shape index: {}]   ;;  %s3431_s8 = inlined_call_operand.vmem [shape: f32[1,32], index: 8, kind: input, shape index: {}]   ;;  %s3432_s9 = inlined_call_operand.vmem [shape: bf16[32,128], index: 9, kind: input, shape index: {}]   ;;  %s3433_s10 = inlined_call_operand.vmem [shape: f32[1,128], index: 10, kind: input, shape index: {}]   ;;  %s3434_s11 = inlined_call_operand.vmem [shape: bf16[128,32], index: 11, kind: input, shape index: {}]   ;;  %s3435_s12 = inlined_call_operand.vmem [shape: f32[1,32], index: 12, kind: input, shape index: {}]   ;;  %s3436_s13 = inlined_call_operand.hbm [shape: f32[2,8,32], index: 13, kind: output, shape index: {}]  }
   0x1   :  { %v46_v0 = vld [vmem:[%s3423_s0] sm:$0xff]  ;;  %v47_v1 = vld [vmem:[%s3423_s0 + $0x8] sm:$0xff] }
   0x2   :  { %v51_v2 = vsel %vm50_vm0, %v46_v0, 0.0  ;;  %v54_v3 = vsel %vm50_vm0, %v47_v1, 0.0 }
   0x3   :  { %52 = vadd.xlane.f32.xlu0 %v51_v2 }
   0x7   :  { %55 = vadd.xlane.f32.xlu0 %v54_v3 }
   0x8   :  { %18 = vsyncpa [#allocation3], 0  ;;  %v2756_v14 = vld [vmem:[%s3424_s1] sm:$0xff]   ;;  %v2844_v15 = vmov 0.0   ;;  %v2757_v16 = vld [vmem:[%s3424_s1 + $0x8] sm:$0xff]   ;;  %vm2845_vm1 = vmmov 0   ;;  %v196_v47 = vlaneseq }
   0x9   :  { %2586 = vmatprep.subr.bf16.mxu0 %v2844_v15  ;;  %2606 = vmatprep.subr.bf16.mxu1 %v2844_v15  ;;  %v2477_v25 = vld [vmem:[%s3428_s5] ss:$0 sm:$0xff]  ;;  %s2846_s5 = smov 112   ;;  %s2848_s21 = smov 104   ;;  %v2850_v45 = vmov 1983009808  }
   0xa   :  { %2587 = vmatpush3.bf16.msra.mxu0 %v2756_v14  ;;  %2590 = vmatprep.mubr.msk.bf16.mxu0 %vm2845_vm1, %v2844_v15  ;;  %v2478_v29 = vld [vmem:[%s3429_s6] ss:$0 sm:$0xff]  ;;  %s2847_s6 = smov 120   ;;  %s2849_s22 = smov 96   ;;  %v194_v46 = vunpack.c.l.s4 %v2850_v45  ;;  %v197_v49 = vshrl.u32 %v196_v47, 7  ;;  %vm1008_vm2 = vcmask 64512  }
   0xb   :  { %2588 = vmatprep.subr.bf16.mxu0 %v2844_v15  ;;  %2608 = vmatprep.mubr.msk.bf16.mxu1 %vm2845_vm1, %v2844_v15  ;;  %v2479_v34 = vld [vmem:[%s3425_s2] ss:$0 sm:$0xff]  ;;  %v2851_v53 = vmov 1934713408   ;;  %s2853_s2 = smov 64   ;;  %vm1476_vm3 = vcmask 1043456  }
   0xc   :  { %v195_v48 = vunpack.c.0.s8 %v194_v46  ;;  %v225_v54 = vunpack.c.l.s4 %v2851_v53  ;;  %s2854_s27 = smov 16   ;;  %s2856_s28 = smov 24   ;;  %vm2140_vm4 = vcmask 130048   ;;  %vm2143_vm5 = vcmask 195584  }
   0xe   :  { %2589 = vmatpush3.bf16.msra.mxu0 %v2757_v16  ;;  %v2985_v56 = vsub.s32 %v195_v48, %v197_v49  ;;  %v226_v61 = vunpack.c.0.s8 %v225_v54 }
   0xf   :  { %2594 = vmatprep.subr.bf16.mxu0 %v2844_v15 }
  0x90   :  { %v53_v4 = vpop.xlane.xlu0 %52 }
  0x91   :  { %v58_v5 = vmul.f32 0.03125, %v53_v4  ;;  %v2998_v4 = vsub.s32 %v226_v61, %v197_v49 }
  0x93   :  { %v60_v6 = vsub.f32 %v46_v0, %v58_v5 }
  0x94   :  { %v56_v7 = vpop.xlane.xlu0 %55 }
  0x95   :  { %v59_v8 = vmul.f32 0.03125, %v56_v7  ;;  %v62_v9 = vmul.f32 %v60_v6, %v60_v6 }
  0x97   :  { %v61_v10 = vsub.f32 %v47_v1, %v59_v8  ;;  %v64_v11 = vsel %vm50_vm0, %v62_v9, 0.0  ;;  %v2852_v1 = vmov 0  }
  0x98   :  { %65 = vadd.xlane.f32.xlu1 %v64_v11  ;;  %v2995_v2 = vpack.i.b16 %v2852_v1, %v2852_v1 }
  0x99   :  { %v63_v12 = vmul.f32 %v61_v10, %v61_v10 }
  0x9b   :  { %v67_v13 = vsel %vm50_vm0, %v63_v12, 0.0 }
  0x9c   :  { %68 = vadd.xlane.f32.xlu1 %v67_v13 }
 0x125   :  { %v66_v17 = vpop.xlane.xlu1 %65 }
 0x126   :  { %v70_v18 = vmul.f32 0.03125, %v66_v17 }
 0x128   :  { %v72_v19 = vadd.f32 1e-05, %v70_v18 }
 0x129   :  { %v69_v20 = vpop.xlane.xlu1 %68 }
 0x12a   :  { %2770 = vrsqrt.f32 %v72_v19  ;;  %v71_v21 = vmul.f32 0.03125, %v69_v20 }
 0x12c   :  { %v73_v22 = vadd.f32 1e-05, %v71_v21 }
 0x12e   :  { %2772 = vrsqrt.f32 %v73_v22 }
 0x134   :  { %v2771_v23 = vpop.eup %2770 }
 0x135   :  { %v76_v24 = vmul.f32 %v2771_v23, %v60_v6 }
 0x137   :  { %v84_v28 = vmul.f32 %v2477_v25, %v76_v24 }
 0x138   :  { %v2773_v26 = vpop.eup %2772 }
 0x139   :  { %v77_v27 = vmul.f32 %v2773_v26, %v61_v10  ;;  %v92_v31 = vadd.f32 %v2478_v29, %v84_v28 }
 0x13b   :  { %v85_v30 = vmul.f32 %v2477_v25, %v77_v27 }
 0x13d   :  { %v93_v32 = vadd.f32 %v2478_v29, %v85_v30 }
 0x13f   :  { %v94_v33 = vpack.c.bf16 %v93_v32, %v92_v31 }
 0x141   :  { %2591 = vmatmul.mubr.msk.bf16.vlgmr.msra.gmra.mrb[0].mxu0 %vm50_vm0, %v94_v33 }
 0x142   :  { %2596 = vmatprep.mubr.msk.bf16.mxu0 %vm2845_vm1, %v2844_v15 }
 0x214   :  { %v155_v35 = vpop.f32.mrb[0].mxu0 }
 0x215   :  { %v2592_v36 = vpop.f32.mrb[1].mxu0  ;;  %v156_v38 = vadd.f32 %v2479_v34, %v155_v35 }
 0x216   :  { %v158_v37 = vpop.f32.mrb[2].mxu0 }
 0x217   :  { %v159_v39 = vadd.f32 %v2479_v34, %v158_v37  ;;  %v2593_v40 = vpop.f32.mrb[3].mxu0 }
 0x219   :  { %v2965_v41 = vpack.c.bf16 %v159_v39, %v156_v38 }
 0x21b   :  { %166 = vrot.lane.b32.xlu1 %v2965_v41, %s2846_s5  ;;  %164 = vrot.lane.b32.xlu0 %v2965_v41, %s2847_s6  ;;  %v174_v58 = vshrl.u32 %v2965_v41, 16 }
 0x21f   :  { %168 = vrot.lane.b32.xlu1 %v2965_v41, %s2848_s21 }
 0x223   :  { %448 = vrot.lane.b32.xlu1 %v2965_v41, %s2849_s22 }
 0x28d   :  { %v2971_v42 = vpop.permute.xlu1 %166  ;;  %v2973_v43 = vpop.permute.xlu0 %164 }
 0x28e   :  { %452 = vrot.lane.b32.xlu1 %v2971_v42, %s2849_s22  ;;  %450 = vrot.lane.b32.xlu0 %v2973_v43, %s2849_s22  ;;  %v182_v51 = vshrl.u32 %v2971_v42, 16  ;;  %v175_v52 = vshrl.u32 %v2973_v43, 16  ;;  %v172_v57 = vpack.i.b16 %v2973_v43, %v2965_v41 }
 0x290   :  { %v176_v60 = vpack.i.b16 %v175_v52, %v174_v58  ;;  %v199_v63 = vrot.slane %v172_v57, %v2985_v56  ;;  %v192_v12 = vcombine.high %v172_v57, %v2995_v2 }
 0x291   :  { %v2977_v44 = vpop.permute.xlu1 %168 }
 0x292   :  { %454 = vrot.lane.b32.xlu0 %v2977_v44, %s2849_s22  ;;  %v183_v50 = vshrl.u32 %v2977_v44, 16  ;;  %v180_v55 = vpack.i.b16 %v2977_v44, %v2971_v42  ;;  %v265_v3 = vrot.slane %v176_v60, %v2985_v56  ;;  %v258_v13 = vcombine.high %v176_v60, %v2995_v2 }
 0x293   :  { %v3016_v27 = vrot.slane %v192_v12, %v2985_v56 }
 0x294   :  { %v184_v59 = vpack.i.b16 %v183_v50, %v182_v51  ;;  %v214_v62 = vrot.slane %v180_v55, %v2985_v56  ;;  %v207_v17 = vcombine.high %v180_v55, %v2995_v2  ;;  %v3019_v28 = vrot.slane %v258_v13, %v2985_v56 }
 0x295   :  { %v449_v7 = vpop.permute.xlu1 %448 }
 0x296   :  { %v280_v0 = vrot.slane %v184_v59, %v2985_v56  ;;  %v222_v5 = vcombine.low %v199_v63, %v214_v62  ;;  %v223_v6 = vcombine.high %v199_v63, %v214_v62  ;;  %v273_v8 = vcombine.high %v184_v59, %v2995_v2 }
 0x297   :  { %v460_v20 = vshrl.u32 %v449_v7, 16  ;;  %v3023_v31 = vrot.slane %v207_v17, %v2985_v56 }
 0x298   :  { %v288_v9 = vcombine.low %v265_v3, %v280_v0  ;;  %v289_v10 = vcombine.high %v265_v3, %v280_v0  ;;  %v3005_v18 = vrot.slane %v222_v5, %v2998_v4  ;;  %v3008_v19 = vrot.slane %v223_v6, %v2998_v4 }
 0x299   :  { %v3011_v22 = vrot.slane %v273_v8, %v2985_v56 }
 0x29a   :  { %v296_v23 = vrot.slane %v288_v9, %v2998_v4  ;;  %v303_v24 = vrot.slane %v289_v10, %v2998_v4  ;;  %v324_v32 = vcombine.low %v3005_v18, %v3008_v19  ;;  %v2483_v35 = vcombine.high %v3005_v18, %v3008_v19 }
 0x29b   :  { %v304_v39 = vcombine.low %v3019_v28, %v3011_v22 }
 0x29c   :  { %v349_v40 = vcombine.low %v296_v23, %v303_v24  ;;  %v2484_v51 = vcombine.high %v296_v23, %v303_v24 }
 0x29e   :  { %v356_v12 = vrot.slane %v349_v40, %v2985_v56 }
 0x300   :  { %v451_v11 = vpop.permute.xlu0 %450  ;;  %v453_v21 = vpop.permute.xlu1 %452 }
 0x301   :  { %v458_v14 = vpack.i.b16 %v451_v11, %v449_v7  ;;  %v461_v16 = vshrl.u32 %v451_v11, 16  ;;  %v468_v33 = vshrl.u32 %v453_v21, 16  ;;  %v305_v11 = vcombine.high %v3019_v28, %v3011_v22 }
 0x303   :  { %v462_v25 = vpack.i.b16 %v461_v16, %v460_v20  ;;  %v472_v29 = vcombine.high %v458_v14, %v2995_v2  ;;  %v479_v36 = vrot.slane %v458_v14, %v2985_v56  ;;  %v364_v20 = vrot.slane %v2484_v51, %v2985_v56 }
 0x304   :  { %v455_v26 = vpop.permute.xlu0 %454 }
 0x305   :  { %v466_v30 = vpack.i.b16 %v455_v26, %v453_v21  ;;  %v469_v34 = vshrl.u32 %v455_v26, 16  ;;  %v538_v45 = vcombine.high %v462_v25, %v2995_v2  ;;  %v486_v47 = vrot.slane %v472_v29, %v2985_v56 }
 0x306   :  { %v545_v52 = vrot.slane %v462_v25, %v2985_v56  ;;  %v238_v29 = vcombine.low %v3016_v27, %v3023_v31 }
 0x307   :  { %v487_v37 = vcombine.high %v466_v30, %v2995_v2  ;;  %v494_v38 = vrot.slane %v466_v30, %v2985_v56  ;;  %v470_v46 = vpack.i.b16 %v469_v34, %v468_v33  ;;  %v552_v60 = vrot.slane %v538_v45, %v2985_v56 }
 0x308   :  { %v239_v30 = vcombine.high %v3016_v27, %v3023_v31  ;;  %v331_v33 = vrot.slane %v324_v32, %v2985_v56  ;;  %v339_v34 = vrot.slane %v2483_v35, %v2985_v56  ;;  %v312_v45 = vrot.slane %v304_v39, %v2998_v4 }
 0x309   :  { %v501_v48 = vrot.slane %v487_v37, %v2985_v56  ;;  %v502_v49 = vcombine.low %v479_v36, %v494_v38  ;;  %v503_v50 = vcombine.high %v479_v36, %v494_v38  ;;  %v553_v53 = vcombine.high %v470_v46, %v2995_v2 }
 0x30a   :  { %v560_v54 = vrot.slane %v470_v46, %v2985_v56  ;;  %v319_v46 = vrot.slane %v305_v11, %v2998_v4  ;;  %v246_v32 = vrot.slane %v238_v29, %v2998_v4  ;;  %v253_v35 = vrot.slane %v239_v30, %v2998_v4 }
 0x30b   :  { %v510_v55 = vrot.slane %v502_v49, %v2998_v4  ;;  %v517_v57 = vrot.slane %v503_v50, %v2998_v4  ;;  %v518_v58 = vcombine.low %v486_v47, %v501_v48  ;;  %v519_v59 = vcombine.high %v486_v47, %v501_v48 }
 0x30c   :  { %v567_v61 = vrot.slane %v553_v53, %v2985_v56  ;;  %v568_v62 = vcombine.low %v545_v52, %v560_v54  ;;  %v569_v63 = vcombine.high %v545_v52, %v560_v54  ;;  %v365_v47 = vcombine.low %v356_v12, %v364_v20 }
 0x30d   :  { %v526_v0 = vrot.slane %v518_v58, %v2998_v4  ;;  %v533_v3 = vrot.slane %v519_v59, %v2998_v4  ;;  %v604_v5 = vcombine.low %v510_v55, %v517_v57  ;;  %v2487_v6 = vcombine.high %v510_v55, %v517_v57 }
 0x30e   :  { %v576_v7 = vrot.slane %v568_v62, %v2998_v4  ;;  %v583_v8 = vrot.slane %v569_v63, %v2998_v4  ;;  %v584_v9 = vcombine.low %v552_v60, %v567_v61  ;;  %v585_v10 = vcombine.high %v552_v60, %v567_v61 }
 0x30f   :  { %v611_v13 = vrot.slane %v604_v5, %v2985_v56  ;;  %v619_v14 = vrot.slane %v2487_v6, %v2985_v56  ;;  %v654_v21 = vcombine.low %v526_v0, %v533_v3  ;;  %v2489_v23 = vcombine.high %v526_v0, %v533_v3 }
 0x310   :  { %v592_v16 = vrot.slane %v584_v9, %v2998_v4  ;;  %v599_v17 = vrot.slane %v585_v10, %v2998_v4  ;;  %v629_v18 = vcombine.low %v576_v7, %v583_v8  ;;  %v2488_v19 = vcombine.high %v576_v7, %v583_v8 }
 0x311   :  { %v620_v24 = vcombine.low %v611_v13, %v619_v14  ;;  %v661_v48 = vrot.slane %v654_v21, %v2985_v56  ;;  %v669_v27 = vrot.slane %v2489_v23, %v2985_v56  ;;  %v340_v49 = vcombine.low %v331_v33, %v339_v34 }
 0x312   :  { %v636_v25 = vrot.slane %v629_v18, %v2985_v56  ;;  %v644_v22 = vrot.slane %v2488_v19, %v2985_v56  ;;  %v679_v26 = vcombine.low %v592_v16, %v599_v17  ;;  %v2490_v28 = vcombine.high %v592_v16, %v599_v17 }
 0x313   :  { %v627_v36 = vrot.slane %v620_v24, %v2998_v4  ;;  %v399_v53 = vcombine.low %v312_v45, %v319_v46  ;;  %v2486_v54 = vcombine.high %v312_v45, %v319_v46  ;;  %v372_v55 = vrot.slane %v365_v47, %v2998_v4 }
 0x314   :  { %v645_v37 = vcombine.low %v636_v25, %v644_v22  ;;  %v686_v38 = vrot.slane %v679_v26, %v2985_v56  ;;  %v694_v40 = vrot.slane %v2490_v28, %v2985_v56  ;;  %v670_v60 = vcombine.low %v661_v48, %v669_v27 }
 0x315   :  { %v628_v51 = vcombine.high %v627_v36, %v2852_v1  ;;  %v374_v61 = vcombine.low %v246_v32, %v253_v35  ;;  %v2485_v62 = vcombine.high %v246_v32, %v253_v35  ;;  %v347_v0 = vrot.slane %v340_v49, %v2998_v4 }
 0x316   :  { %v652_v31 = vrot.slane %v645_v37, %v2998_v4  ;;  %v695_v52 = vcombine.low %v686_v38, %v694_v40  ;;  %v707_v3 = vshrl.u32 %v627_v36, 16  ;;  %v406_v6 = vrot.slane %v399_v53, %v2985_v56 }
 0x317   :  { %v414_v7 = vrot.slane %v2486_v54, %v2985_v56  ;;  %v373_v9 = vcombine.high %v372_v55, %v2852_v1  ;;  %v677_v10 = vrot.slane %v670_v60, %v2998_v4  ;;  %v381_v11 = vrot.slane %v374_v61, %v2985_v56 }
 0x318   :  { %v706_v50 = vpack.i.b16 %v652_v31, %v627_v36  ;;  %v653_v39 = vcombine.high %v652_v31, %v2852_v1  ;;  %v708_v59 = vshrl.u32 %v652_v31, 16  ;;  %v702_v5 = vrot.slane %v695_v52, %v2998_v4 }
 0x319   :  { %v389_v12 = vrot.slane %v2485_v62, %v2985_v56  ;;  %v426_v13 = vpack.i.b16 %v372_v55, %v347_v0  ;;  %v348_v14 = vcombine.high %v347_v0, %v2852_v1  ;;  %v415_v20 = vcombine.low %v406_v6, %v414_v7 }
 0x31a   :  { %v1013_v57 = vsel %vm1008_vm2, %v706_v50, 0  ;;  %v712_v58 = vpack.i.b16 %v653_v39, %v628_v51  ;;  %v709_v8 = vpack.i.b16 %v708_v59, %v707_v3  ;;  %v718_v16 = vpack.i.b16 %v702_v5, %v677_v10 }
 0x31b   :  { %2595 = vmatpush3.bf16.xpose.msra.mxu0 %v1013_v57  ;;  %v714_v17 = vshrl.u32 %v653_v39, 16  ;;  %v432_v19 = vpack.i.b16 %v373_v9, %v348_v14  ;;  %v390_v21 = vcombine.low %v381_v11, %v389_v12  ;;  %v713_v23 = vshrl.u32 %v628_v51, 16 }
 0x31c   :  { %v1105_v63 = vsel %vm1008_vm2, %v712_v58, 0  ;;  %2600 = vmatprep.subr.bf16.mxu0 %v2844_v15  ;;  %v1059_v18 = vsel %vm1008_vm2, %v709_v8, 0  ;;  %v1197_v24 = vsel %vm1008_vm2, %v718_v16, 0  ;;  %v428_v25 = vshrl.u32 %v372_v55, 16 }
 0x31d   :  { %2607 = vmatpush3.bf16.xpose.msra.mxu1 %v1105_v63  ;;  %v703_v22 = vcombine.high %v702_v5, %v2852_v1  ;;  %v427_v26 = vshrl.u32 %v347_v0, 16  ;;  %v715_v28 = vpack.i.b16 %v714_v17, %v713_v23  ;;  %v422_v29 = vrot.slane %v415_v20, %v2998_v4 }
 0x31e   :  { %2618 = vmatprep.subr.bf16.mxu1 %v2844_v15  ;;  %v678_v30 = vcombine.high %v677_v10, %v2852_v1  ;;  %v397_v34 = vrot.slane %v390_v21, %v2998_v4  ;;  %v720_v40 = vshrl.u32 %v702_v5, 16  ;;  %v434_v45 = vshrl.u32 %v373_v9, 16 }
 0x31f   :  { %v429_v33 = vpack.i.b16 %v428_v25, %v427_v26  ;;  %v1151_v37 = vsel %vm1008_vm2, %v715_v28, 0  ;;  %v719_v47 = vshrl.u32 %v677_v10, 16  ;;  %v433_v48 = vshrl.u32 %v348_v14, 16 }
 0x320   :  { %v724_v36 = vpack.i.b16 %v703_v22, %v678_v30  ;;  %v438_v38 = vpack.i.b16 %v422_v29, %v397_v34  ;;  %v423_v31 = vcombine.high %v422_v29, %v2852_v1  ;;  %v398_v35 = vcombine.high %v397_v34, %v2852_v1 }
 0x321   :  { %v721_v27 = vpack.i.b16 %v720_v40, %v719_v47  ;;  %v435_v32 = vpack.i.b16 %v434_v45, %v433_v48  ;;  %v726_v51 = vshrl.u32 %v703_v22, 16  ;;  %v440_v39 = vshrl.u32 %v422_v29, 16 }
 0x322   :  { %2597 = vmatmul.mubr.msk.bf16.vlgmr.msra.gmra.mrb[4].mxu0 %vm1008_vm2, %v426_v13  ;;  %v1289_v46 = vsel %vm1008_vm2, %v724_v36, 0  ;;  %v444_v50 = vpack.i.b16 %v423_v31, %v398_v35  ;;  %v725_v52 = vshrl.u32 %v678_v30, 16  ;;  %v439_v53 = vshrl.u32 %v397_v34, 16 }
 0x323   :  { %2601 = vmatpush3.bf16.xpose.msra.mxu0 %v1059_v18  ;;  %2602 = vmatprep.mubr.msk.bf16.mxu0 %vm2845_vm1, %v2844_v15  ;;  %v1243_v49 = vsel %vm1008_vm2, %v721_v27, 0  ;;  %v446_v58 = vshrl.u32 %v423_v31, 16  ;;  %v445_v59 = vshrl.u32 %v398_v35, 16 }
 0x324   :  { %2609 = vmatmul.mubr.msk.bf16.vlgmr.msra.gmra.mrb[0].mxu1 %vm1008_vm2, %v432_v19  ;;  %2612 = vmatprep.subr.bf16.mxu0 %v2844_v15  ;;  %v727_v54 = vpack.i.b16 %v726_v51, %v725_v52  ;;  %v441_v55 = vpack.i.b16 %v440_v39, %v439_v53 }
 0x325   :  { %2619 = vmatpush3.bf16.xpose.msra.mxu1 %v1197_v24  ;;  %2620 = vmatprep.mubr.msk.bf16.mxu1 %vm2845_vm1, %v2844_v15  ;;  %v447_v60 = vpack.i.b16 %v446_v58, %v445_v59 }
 0x326   :  { %2630 = vmatprep.subr.bf16.mxu1 %v2844_v15  ;;  %v1335_v57 = vsel %vm1008_vm2, %v727_v54, 0 }
 0x32a   :  { %2603 = vmatmul.mubr.msk.bf16.vlgmr.msra.gmra.mrb[8].mxu0 %vm1008_vm2, %v429_v33 }
 0x32b   :  { %2613 = vmatpush3.bf16.xpose.msra.mxu0 %v1151_v37  ;;  %2614 = vmatprep.mubr.msk.bf16.mxu0 %vm2845_vm1, %v2844_v15 }
 0x32c   :  { %2621 = vmatmul.mubr.msk.bf16.vlgmr.msra.gmra.mrb[4].mxu1 %vm1008_vm2, %v438_v38  ;;  %2624 = vmatprep.subr.bf16.mxu0 %v2844_v15 }
 0x32d   :  { %2631 = vmatpush3.bf16.xpose.msra.mxu1 %v1289_v46  ;;  %2632 = vmatprep.mubr.msk.bf16.mxu1 %vm2845_vm1, %v2844_v15 }
 0x32e   :  { %2642 = vmatprep.subr.bf16.mxu1 %v2844_v15 }
 0x332   :  { %2615 = vmatmul.mubr.msk.bf16.vlgmr.msra.gmra.mrb[12].mxu0 %vm1008_vm2, %v435_v32 }
 0x333   :  { %2625 = vmatpush3.bf16.xpose.msra.mxu0 %v1243_v49  ;;  %2626 = vmatprep.mubr.msk.bf16.mxu0 %vm2845_vm1, %v2844_v15 }
 0x334   :  { %2633 = vmatmul.mubr.msk.bf16.vlgmr.msra.gmra.mrb[8].mxu1 %vm1008_vm2, %v444_v50  ;;  %2636 = vmatprep.subr.bf16.mxu0 %v2844_v15 }
 0x335   :  { %2644 = vmatprep.mubr.msk.bf16.mxu1 %vm2845_vm1, %v2844_v15 }
 0x33a   :  { %2627 = vmatmul.mubr.msk.bf16.vlgmr.msra.gmra.mrb[16].mxu0 %vm1008_vm2, %v441_v55 }
 0x33b   :  { %2637 = vmatpush3.bf16.xpose.msra.mxu0 %v1335_v57  ;;  %2638 = vmatprep.mubr.msk.bf16.mxu0 %vm2845_vm1, %v2844_v15 }
 0x33c   :  { %2648 = vmatprep.subr.bf16.mxu0 %v2844_v15 }
 0x342   :  { %2639 = vmatmul.mubr.msk.bf16.vlgmr.msra.gmra.mrb[20].mxu0 %vm1008_vm2, %v447_v60 }
 0x343   :  { %2650 = vmatprep.mubr.msk.bf16.mxu0 %vm2845_vm1, %v2844_v15 }
 0x3f5   :  { %v1049_v61 = vpop.f32.mrb[4].mxu0 }
 0x3f6   :  { %v2598_v62 = vpop.f32.mrb[5].mxu0  ;;  %v1377_v63 = vsel %vm1008_vm2, %v1049_v61, -inf }
 0x3f7   :  { %v3133_v0 = vpop.f32.mrb[0].mxu1  ;;  %1378 = vmax.xlane.f32.xlu1 %v1377_v63  ;;  %v1052_v3 = vpop.f32.mrb[6].mxu0 }
 0x3f8   :  { %v2599_v5 = vpop.f32.mrb[7].mxu0  ;;  %v2610_v6 = vpop.f32.mrb[1].mxu1  ;;  %v1383_v20 = vsel %vm1008_vm2, %v3133_v0, -inf }
 0x3f9   :  { %v1144_v7 = vpop.f32.mrb[2].mxu1 }
 0x3fa   :  { %v2611_v8 = vpop.f32.mrb[3].mxu1 }
 0x3fd   :  { %v1095_v9 = vpop.f32.mrb[8].mxu0 }
 0x3fe   :  { %v2604_v10 = vpop.f32.mrb[9].mxu0  ;;  %v1380_v11 = vsel %vm1008_vm2, %v1095_v9, -inf }
 0x3ff   :  { %v3136_v12 = vpop.f32.mrb[4].mxu1  ;;  %1381 = vmax.xlane.f32.xlu0 %v1380_v11  ;;  %v1098_v13 = vpop.f32.mrb[10].mxu0 }
 0x400   :  { %v2605_v14 = vpop.f32.mrb[11].mxu0  ;;  %v2622_v16 = vpop.f32.mrb[5].mxu1  ;;  %v1389_v17 = vsel %vm1008_vm2, %v3136_v12, -inf }
 0x401   :  { %v1236_v18 = vpop.f32.mrb[6].mxu1  ;;  %1390 = vmax.xlane.f32.xlu1 %v1389_v17 }
 0x402   :  { %v2623_v19 = vpop.f32.mrb[7].mxu1 }
 0x403   :  { %1384 = vmax.xlane.f32.xlu0 %v1383_v20 }
 0x405   :  { %v1187_v21 = vpop.f32.mrb[12].mxu0 }
 0x406   :  { %v2616_v23 = vpop.f32.mrb[13].mxu0  ;;  %v1386_v24 = vsel %vm1008_vm2, %v1187_v21, -inf }
 0x407   :  { %v1325_v25 = vpop.f32.mrb[8].mxu1  ;;  %1387 = vmax.xlane.f32.xlu0 %v1386_v24  ;;  %v1190_v22 = vpop.f32.mrb[14].mxu0 }
 0x408   :  { %v2617_v26 = vpop.f32.mrb[15].mxu0  ;;  %v2634_v28 = vpop.f32.mrb[9].mxu1  ;;  %v1395_v29 = vsel %vm1008_vm2, %v1325_v25, -inf }
 0x409   :  { %v1328_v30 = vpop.f32.mrb[10].mxu1  ;;  %1396 = vmax.xlane.f32.xlu1 %v1395_v29 }
 0x40a   :  { %v2635_v33 = vpop.f32.mrb[11].mxu1 }
 0x40d   :  { %v1279_v34 = vpop.f32.mrb[16].mxu0 }
 0x40e   :  { %v2628_v36 = vpop.f32.mrb[17].mxu0  ;;  %v1392_v37 = vsel %vm1008_vm2, %v1279_v34, -inf }
 0x40f   :  { %1393 = vmax.xlane.f32.xlu0 %v1392_v37  ;;  %v1282_v38 = vpop.f32.mrb[18].mxu0 }
 0x410   :  { %v2629_v40 = vpop.f32.mrb[19].mxu0 }
 0x415   :  { %v1371_v45 = vpop.f32.mrb[20].mxu0 }
 0x416   :  { %v2640_v46 = vpop.f32.mrb[21].mxu0  ;;  %v1398_v47 = vsel %vm1008_vm2, %v1371_v45, -inf }
 0x417   :  { %1399 = vmax.xlane.f32.xlu0 %v1398_v47  ;;  %v1374_v48 = vpop.f32.mrb[22].mxu0 }
 0x418   :  { %v2641_v27 = vpop.f32.mrb[23].mxu0 }
 0x41a   :  { %728 = vrot.lane.b32.xlu1 %v2965_v41, %s2853_s2 }
 0x484   :  { %v1379_v31 = vpop.xlane.xlu1 %1378 }
 0x485   :  { %v1401_v32 = vsub.f32 %v1049_v61, %v1379_v31 }
 0x487   :  { %v1409_v35 = vmul.f32 1.442695, %v1401_v32 }
 0x489   :  { %2774 = vpow2.f32 %v1409_v35 }
 0x48c   :  { %v1382_v49 = vpop.xlane.xlu0 %1381 }
 0x48d   :  { %v1402_v50 = vsub.f32 %v1095_v9, %v1382_v49 }
 0x48e   :  { %v1391_v55 = vpop.xlane.xlu1 %1390 }
 0x48f   :  { %v1411_v51 = vmul.f32 1.442695, %v1402_v50  ;;  %v1405_v3 = vsub.f32 %v3136_v12, %v1391_v55 }
 0x490   :  { %v1385_v41 = vpop.xlane.xlu0 %1384 }
 0x491   :  { %2776 = vpow2.f32 %v1411_v51  ;;  %v1403_v57 = vsub.f32 %v3133_v0, %v1385_v41 }
 0x493   :  { %v3147_v39 = vpop.eup %2774  ;;  %v1413_v61 = vmul.f32 1.442695, %v1403_v57 }
 0x494   :  { %v1425_v52 = vsel %vm1008_vm2, %v3147_v39, 0.0  ;;  %v1388_v58 = vpop.xlane.xlu0 %1387 }
 0x495   :  { %1426 = vadd.xlane.f32.xlu1 %v1425_v52  ;;  %v1404_v60 = vsub.f32 %v1187_v21, %v1388_v58  ;;  %2778 = vpow2.f32 %v1413_v61 }
 0x496   :  { %v1397_v59 = vpop.xlane.xlu1 %1396 }
 0x497   :  { %v1407_v62 = vsub.f32 %v1325_v25, %v1397_v59  ;;  %v1415_v63 = vmul.f32 1.442695, %v1404_v60 }
 0x499   :  { %v1421_v5 = vmul.f32 1.442695, %v1407_v62  ;;  %2780 = vpow2.f32 %v1415_v63 }
 0x49a   :  { %v729_v23 = vpop.permute.xlu1 %728 }
 0x49b   :  { %v3151_v53 = vpop.eup %2776  ;;  %2782 = vpow2.f32 %v1421_v5  ;;  %v740_v36 = vshrl.u32 %v729_v23, 16 }
 0x49c   :  { %v1428_v54 = vsel %vm1008_vm2, %v3151_v53, 0.0  ;;  %v1394_v6 = vpop.xlane.xlu0 %1393 }
 0x49d   :  { %1429 = vadd.xlane.f32.xlu0 %v1428_v54 }
 0x49f   :  { %v3160_v0 = vpop.eup %2778 }
 0x4a0   :  { %v1431_v11 = vsel %vm1008_vm2, %v3160_v0, 0.0 }
 0x4a3   :  { %v3162_v10 = vpop.eup %2780 }
 0x4a4   :  { %v1400_v7 = vpop.xlane.xlu0 %1399  ;;  %v1434_v14 = vsel %vm1008_vm2, %v3162_v10, 0.0 }
 0x4a5   :  { %v1408_v8 = vsub.f32 %v1371_v45, %v1400_v7  ;;  %v3166_v12 = vpop.eup %2782 }
 0x4a6   :  { %732 = vrot.lane.b32.xlu1 %v2971_v42, %s2853_s2  ;;  %v1417_v42 = vmul.f32 1.442695, %v1405_v3  ;;  %v1443_v13 = vsel %vm1008_vm2, %v3166_v12, 0.0 }
 0x4a7   :  { %v1423_v9 = vmul.f32 1.442695, %v1408_v8 }
 0x4a8   :  { %2784 = vpow2.f32 %v1417_v42 }
 0x4aa   :  { %734 = vrot.lane.b32.xlu1 %v2977_v44, %s2853_s2  ;;  %v1406_v44 = vsub.f32 %v1279_v34, %v1394_v6 }
 0x4b2   :  { %v3172_v16 = vpop.eup %2784 }
 0x4b3   :  { %730 = vrot.lane.b32.xlu0 %v2973_v43, %s2853_s2  ;;  %v1419_v43 = vmul.f32 1.442695, %v1406_v44  ;;  %v1437_v17 = vsel %vm1008_vm2, %v3172_v16, 0.0 }
 0x4b5   :  { %2786 = vpow2.f32 %v1419_v43 }
 0x4b6   :  { %2788 = vpow2.f32 %v1423_v9 }
 0x4bf   :  { %v3176_v18 = vpop.eup %2786 }
 0x4c0   :  { %v1440_v19 = vsel %vm1008_vm2, %v3176_v18, 0.0  ;;  %v3180_v20 = vpop.eup %2788 }
 0x4c1   :  { %v1446_v21 = vsel %vm1008_vm2, %v3180_v20, 0.0 }
 0x4ce   :  { %1432 = vadd.xlane.f32.xlu1 %v1431_v11 }
 0x4d2   :  { %1444 = vadd.xlane.f32.xlu1 %v1443_v13  ;;  %1435 = vadd.xlane.f32.xlu0 %v1434_v14 }
 0x4d6   :  { %1438 = vadd.xlane.f32.xlu0 %v1437_v17 }
 0x4da   :  { %1441 = vadd.xlane.f32.xlu0 %v1440_v19 }
 0x4de   :  { %1447 = vadd.xlane.f32.xlu0 %v1446_v21 }
 0x522   :  { %v1427_v24 = vpop.xlane.xlu1 %1426 }
 0x523   :  { %2790 = vrcp.f32 %v1427_v24 }
 0x526   :  { %v733_v25 = vpop.permute.xlu1 %732 }
 0x527   :  { %v748_v30 = vshrl.u32 %v733_v25, 16 }
 0x52a   :  { %v735_v22 = vpop.permute.xlu1 %734  ;;  %v1430_v26 = vpop.xlane.xlu0 %1429 }
 0x52b   :  { %v749_v28 = vshrl.u32 %v735_v22, 16  ;;  %v3184_v29 = vpack.i.b16 %v735_v22, %v733_v25  ;;  %2792 = vrcp.f32 %v1430_v26 }
 0x52d   :  { %v3188_v37 = vpack.i.b16 %v749_v28, %v748_v30  ;;  %v774_v40 = vrot.slane %v3184_v29, %v2985_v56  ;;  %v2791_v3 = vpop.eup %2790 }
 0x52e   :  { %v731_v33 = vpop.permute.xlu0 %730  ;;  %v1457_v7 = vmul.f32 %v2791_v3, %v3147_v39 }
 0x52f   :  { %v3186_v34 = vpack.i.b16 %v731_v33, %v729_v23  ;;  %v741_v38 = vshrl.u32 %v731_v33, 16  ;;  %v840_v27 = vrot.slane %v3188_v37, %v2985_v56  ;;  %v833_v28 = vcombine.high %v3188_v37, %v2995_v2 }
 0x530   :  { %v1465_v25 = vpack.c.bf16 %v1457_v7, %v1457_v7 }
 0x531   :  { %v759_v45 = vrot.slane %v3186_v34, %v2985_v56  ;;  %v742_v46 = vpack.i.b16 %v741_v38, %v740_v36  ;;  %v752_v30 = vcombine.high %v3186_v34, %v2995_v2  ;;  %v767_v36 = vcombine.high %v3184_v29, %v2995_v2 }
 0x532   :  { %v847_v34 = vrot.slane %v833_v28, %v2985_v56 }
 0x533   :  { %v782_v47 = vcombine.low %v759_v45, %v774_v40  ;;  %v783_v48 = vcombine.high %v759_v45, %v774_v40  ;;  %v825_v31 = vrot.slane %v742_v46, %v2985_v56  ;;  %v818_v22 = vcombine.high %v742_v46, %v2995_v2 }
 0x534   :  { %v766_v37 = vrot.slane %v752_v30, %v2985_v56  ;;  %v781_v40 = vrot.slane %v767_v36, %v2985_v56 }
 0x535   :  { %v790_v32 = vrot.slane %v782_v47, %v2998_v4  ;;  %v797_v35 = vrot.slane %v783_v48, %v2998_v4  ;;  %v848_v49 = vcombine.low %v825_v31, %v840_v27  ;;  %v849_v50 = vcombine.high %v825_v31, %v840_v27  ;;  %v2793_v42 = vpop.eup %2792 }
 0x536   :  { %v1458_v13 = vmul.f32 %v2793_v42, %v3151_v53  ;;  %v832_v38 = vrot.slane %v818_v22, %v2985_v56  ;;  %v798_v47 = vcombine.low %v766_v37, %v781_v40  ;;  %v799_v48 = vcombine.high %v766_v37, %v781_v40 }
 0x537   :  { %v884_v51 = vcombine.low %v790_v32, %v797_v35  ;;  %v2491_v52 = vcombine.high %v790_v32, %v797_v35  ;;  %v856_v54 = vrot.slane %v848_v49, %v2998_v4  ;;  %v863_v41 = vrot.slane %v849_v50, %v2998_v4 }
 0x538   :  { %v1466_v26 = vpack.c.bf16 %v1458_v13, %v1458_v13  ;;  %v864_v45 = vcombine.low %v832_v38, %v847_v34  ;;  %v865_v46 = vcombine.high %v832_v38, %v847_v34  ;;  %v806_v27 = vrot.slane %v798_v47, %v2998_v4 }
 0x539   :  { %v891_v55 = vrot.slane %v884_v51, %v2985_v56  ;;  %v899_v57 = vrot.slane %v2491_v52, %v2985_v56  ;;  %v909_v58 = vcombine.low %v856_v54, %v863_v41  ;;  %v2492_v59 = vcombine.high %v856_v54, %v863_v41 }
 0x53a   :  { %v872_v2 = vrot.slane %v864_v45, %v2998_v4  ;;  %v879_v29 = vrot.slane %v865_v46, %v2998_v4  ;;  %v813_v31 = vrot.slane %v799_v48, %v2998_v4 }
 0x53b   :  { %v900_v60 = vcombine.low %v891_v55, %v899_v57  ;;  %v916_v61 = vrot.slane %v909_v58, %v2985_v56  ;;  %v924_v62 = vrot.slane %v2492_v59, %v2985_v56 }
 0x53c   :  { %v959_v32 = vcombine.low %v872_v2, %v879_v29  ;;  %v2494_v35 = vcombine.high %v872_v2, %v879_v29  ;;  %v934_v49 = vcombine.low %v806_v27, %v813_v31  ;;  %v2493_v50 = vcombine.high %v806_v27, %v813_v31 }
 0x53d   :  { %v907_v63 = vrot.slane %v900_v60, %v2998_v4  ;;  %v925_v5 = vcombine.low %v916_v61, %v924_v62 }
 0x53e   :  { %v966_v52 = vrot.slane %v959_v32, %v2985_v56  ;;  %v974_v54 = vrot.slane %v2494_v35, %v2985_v56  ;;  %v941_v41 = vrot.slane %v934_v49, %v2985_v56  ;;  %v949_v55 = vrot.slane %v2493_v50, %v2985_v56 }
 0x53f   :  { %v908_v6 = vcombine.high %v907_v63, %v2852_v1  ;;  %v932_v44 = vrot.slane %v925_v5, %v2998_v4  ;;  %v987_v8 = vshrl.u32 %v907_v63, 16 }
 0x540   :  { %v975_v58 = vcombine.low %v966_v52, %v974_v54  ;;  %v950_v59 = vcombine.low %v941_v41, %v949_v55 }
 0x541   :  { %v986_v43 = vpack.i.b16 %v932_v44, %v907_v63  ;;  %v988_v9 = vshrl.u32 %v932_v44, 16  ;;  %v933_v11 = vcombine.high %v932_v44, %v2852_v1  ;;  %v993_v14 = vshrl.u32 %v908_v6, 16 }
 0x542   :  { %v982_v61 = vrot.slane %v975_v58, %v2998_v4  ;;  %v957_v63 = vrot.slane %v950_v59, %v2998_v4 }
 0x543   :  { %v1478_v17 = vsel %vm1476_vm3, %v986_v43, 0  ;;  %v989_v19 = vpack.i.b16 %v988_v9, %v987_v8  ;;  %v992_v21 = vpack.i.b16 %v933_v11, %v908_v6  ;;  %v994_v23 = vshrl.u32 %v933_v11, 16 }
 0x544   :  { %2643 = vmatpush3.bf16.msra.mxu1 %v1478_v17  ;;  %v998_v42 = vpack.i.b16 %v982_v61, %v957_v63  ;;  %v1000_v44 = vshrl.u32 %v982_v61, 16  ;;  %v999_v43 = vshrl.u32 %v957_v63, 16  ;;  %v983_v13 = vcombine.high %v982_v61, %v2852_v1 }
 0x545   :  { %v1524_v24 = vsel %vm1476_vm3, %v989_v19, 0  ;;  %2654 = vmatprep.subr.bf16.mxu1 %v2844_v15  ;;  %v995_v39 = vpack.i.b16 %v994_v23, %v993_v14  ;;  %v1570_v53 = vsel %vm1476_vm3, %v992_v21, 0 }
 0x546   :  { %2649 = vmatpush3.bf16.msra.mxu0 %v1524_v24  ;;  %v1662_v9 = vsel %vm1476_vm3, %v998_v42, 0  ;;  %v1001_v17 = vpack.i.b16 %v1000_v44, %v999_v43 }
 0x547   :  { %2645 = vmatmul.mubr.msk.bf16.vlgmr.msra.gmra.mrb[12].mxu1 %vm1008_vm2, %v1465_v25  ;;  %2660 = vmatprep.subr.bf16.mxu0 %v2844_v15  ;;  %v1616_v33 = vsel %vm1476_vm3, %v995_v39, 0 }
 0x548   :  { %2655 = vmatpush3.bf16.msra.mxu1 %v1570_v53  ;;  %2656 = vmatprep.mubr.msk.bf16.mxu1 %vm2845_vm1, %v2844_v15  ;;  %v1708_v25 = vsel %vm1476_vm3, %v1001_v17, 0 }
 0x549   :  { %2651 = vmatmul.mubr.msk.bf16.vlgmr.msra.gmra.mrb[24].mxu0 %vm1008_vm2, %v1466_v26  ;;  %2666 = vmatprep.subr.bf16.mxu1 %v2844_v15 }
 0x54a   :  { %2661 = vmatpush3.bf16.msra.mxu0 %v1616_v33  ;;  %2662 = vmatprep.mubr.msk.bf16.mxu0 %vm2845_vm1, %v2844_v15 }
 0x54b   :  { %2672 = vmatprep.subr.bf16.mxu0 %v2844_v15 }
 0x55b   :  { %v1433_v51 = vpop.xlane.xlu1 %1432 }
 0x55c   :  { %2794 = vrcp.f32 %v1433_v51 }
 0x55f   :  { %v1436_v57 = vpop.xlane.xlu0 %1435  ;;  %v1445_v62 = vpop.xlane.xlu1 %1444 }
 0x560   :  { %2796 = vrcp.f32 %v1436_v57 }
 0x563   :  { %v1439_v60 = vpop.xlane.xlu0 %1438 }
 0x564   :  { %2798 = vrcp.f32 %v1439_v60 }
 0x565   :  { %2800 = vrcp.f32 %v1445_v62 }
 0x566   :  { %v2795_v3 = vpop.eup %2794 }
 0x567   :  { %v1459_v5 = vmul.f32 %v2795_v3, %v3160_v0  ;;  %v1442_v6 = vpop.xlane.xlu0 %1441  ;;  %v958_v0 = vcombine.high %v957_v63, %v2852_v1 }
 0x568   :  { %2802 = vrcp.f32 %v1442_v6 }
 0x569   :  { %v1467_v7 = vpack.c.bf16 %v1459_v5, %v1459_v5  ;;  %v1004_v24 = vpack.i.b16 %v983_v13, %v958_v0  ;;  %v1005_v1 = vshrl.u32 %v958_v0, 16 }
 0x56a   :  { %v2797_v8 = vpop.eup %2796 }
 0x56b   :  { %2657 = vmatmul.mubr.msk.bf16.vlgmr.msra.gmra.mrb[16].mxu1 %vm1008_vm2, %v1467_v7  ;;  %v1448_v11 = vpop.xlane.xlu0 %1447  ;;  %v1460_v14 = vmul.f32 %v2797_v8, %v3162_v10  ;;  %v1006_v10 = vshrl.u32 %v983_v13, 16 }
 0x56c   :  { %2667 = vmatpush3.bf16.msra.mxu1 %v1662_v9  ;;  %2668 = vmatprep.mubr.msk.bf16.mxu1 %vm2845_vm1, %v2844_v15  ;;  %2804 = vrcp.f32 %v1448_v11 }
 0x56d   :  { %2678 = vmatprep.subr.bf16.mxu1 %v2844_v15  ;;  %v1468_v21 = vpack.c.bf16 %v1460_v14, %v1460_v14  ;;  %v1007_v28 = vpack.i.b16 %v1006_v10, %v1005_v1 }
 0x56e   :  { %v2799_v19 = vpop.eup %2798 }
 0x56f   :  { %v1461_v23 = vmul.f32 %v2799_v19, %v3172_v16  ;;  %2663 = vmatmul.mubr.msk.bf16.vlgmr.msra.gmra.mrb[28].mxu0 %vm1008_vm2, %v1468_v21  ;;  %v2801_v39 = vpop.eup %2800  ;;  %v1754_v16 = vsel %vm1476_vm3, %v1004_v24, 0  ;;  %v1800_v38 = vsel %vm1476_vm3, %v1007_v28, 0 }
 0x570   :  { %2673 = vmatpush3.bf16.msra.mxu0 %v1708_v25  ;;  %2674 = vmatprep.mubr.msk.bf16.mxu0 %vm2845_vm1, %v2844_v15  ;;  %v1463_v30 = vmul.f32 %v2801_v39, %v3166_v12 }
 0x571   :  { %v1469_v22 = vpack.c.bf16 %v1461_v23, %v1461_v23  ;;  %2684 = vmatprep.subr.bf16.mxu0 %v2844_v15 }
 0x572   :  { %v2803_v53 = vpop.eup %2802 }
 0x573   :  { %v1462_v26 = vmul.f32 %v2803_v53, %v3176_v18  ;;  %2669 = vmatmul.mubr.msk.bf16.vlgmr.msra.gmra.mrb[20].mxu1 %vm1008_vm2, %v1469_v22  ;;  %v1471_v18 = vpack.c.bf16 %v1463_v30, %v1463_v30 }
 0x574   :  { %2679 = vmatpush3.bf16.msra.mxu1 %v1754_v16  ;;  %2680 = vmatprep.mubr.msk.bf16.mxu1 %vm2845_vm1, %v2844_v15 }
 0x575   :  { %v1470_v33 = vpack.c.bf16 %v1462_v26, %v1462_v26  ;;  %2690 = vmatprep.subr.bf16.mxu1 %v2844_v15 }
 0x576   :  { %v2805_v36 = vpop.eup %2804 }
 0x577   :  { %2675 = vmatmul.mubr.msk.bf16.vlgmr.msra.gmra.mrb[32].mxu0 %vm1008_vm2, %v1470_v33  ;;  %v1464_v34 = vmul.f32 %v2805_v36, %v3180_v20 }
 0x578   :  { %2685 = vmatpush3.bf16.msra.mxu0 %v1800_v38  ;;  %2686 = vmatprep.mubr.msk.bf16.mxu0 %vm2845_vm1, %v2844_v15 }
 0x579   :  { %2698 = vmatprep.subr.bf16.mxu0 %v2844_v15  ;;  %v1472_v12 = vpack.c.bf16 %v1464_v34, %v1464_v34 }
 0x57b   :  { %2681 = vmatmul.mubr.msk.bf16.vlgmr.msra.gmra.mrb[24].mxu1 %vm1008_vm2, %v1471_v18 }
 0x57c   :  { %2694 = vmatprep.mubr.msk.bf16.mxu1 %vm2845_vm1, %v2844_v15 }
 0x57f   :  { %2687 = vmatmul.mubr.msk.bf16.vlgmr.msra.gmra.mrb[36].mxu0 %vm1008_vm2, %v1472_v12 }
 0x580   :  { %2702 = vmatprep.mubr.msk.bf16.mxu0 %vm2845_vm1, %v2844_v15 }
 0x61a   :  { %v1514_v37 = vpop.f32.mrb[12].mxu1 }
 0x61b   :  { %v2646_v40 = vpop.f32.mrb[13].mxu1 }
 0x61c   :  { %v1517_v45 = vpop.f32.mrb[14].mxu1  ;;  %v1560_v46 = vpop.f32.mrb[24].mxu0 }
 0x61d   :  { %v2647_v47 = vpop.f32.mrb[15].mxu1  ;;  %v2652_v48 = vpop.f32.mrb[25].mxu0 }
 0x61e   :  { %v1563_v20 = vpop.f32.mrb[26].mxu0 }
 0x61f   :  { %v2653_v2 = vpop.f32.mrb[27].mxu0 }
 0x63e   :  { %v1606_v29 = vpop.f32.mrb[16].mxu1 }
 0x63f   :  { %v1842_v27 = vcombine.low %v1514_v37, %v1606_v29  ;;  %v1843_v31 = vcombine.high %v1514_v37, %v1606_v29  ;;  %v2658_v32 = vpop.f32.mrb[17].mxu1 }
 0x640   :  { %v1609_v35 = vpop.f32.mrb[18].mxu1 }
 0x641   :  { %v2659_v49 = vpop.f32.mrb[19].mxu1  ;;  %v1850_v55 = vrot.slane %v1842_v27, %v2985_v56  ;;  %v1857_v57 = vrot.slane %v1843_v31, %v2985_v56 }
 0x642   :  { %v1652_v50 = vpop.f32.mrb[28].mxu0 }
 0x643   :  { %v1858_v51 = vcombine.low %v1560_v46, %v1652_v50  ;;  %v1859_v52 = vcombine.high %v1560_v46, %v1652_v50  ;;  %v2664_v54 = vpop.f32.mrb[29].mxu0 }
 0x644   :  { %v1655_v41 = vpop.f32.mrb[30].mxu0 }
 0x645   :  { %v1866_v58 = vrot.slane %v1858_v51, %v2985_v56  ;;  %v1873_v59 = vrot.slane %v1859_v52, %v2985_v56  ;;  %v2665_v60 = vpop.f32.mrb[31].mxu0 }
 0x646   :  { %v1698_v61 = vpop.f32.mrb[20].mxu1 }
 0x647   :  { %v2670_v62 = vpop.f32.mrb[21].mxu1  ;;  %v1874_v63 = vcombine.low %v1850_v55, %v1866_v58  ;;  %v1875_v3 = vcombine.high %v1850_v55, %v1866_v58  ;;  %v1890_v5 = vcombine.low %v1857_v57, %v1873_v59  ;;  %v1891_v6 = vcombine.high %v1857_v57, %v1873_v59 }
 0x648   :  { %v1701_v42 = vpop.f32.mrb[22].mxu1 }
 0x649   :  { %v2671_v44 = vpop.f32.mrb[23].mxu1  ;;  %v1882_v7 = vrot.slane %v1874_v63, %v2998_v4  ;;  %v1889_v43 = vrot.slane %v1875_v3, %v2998_v4  ;;  %v1898_v8 = vrot.slane %v1890_v5, %v2998_v4  ;;  %v1905_v9 = vrot.slane %v1891_v6, %v2998_v4  ;;  %v2758_v3 = vld [vmem:[%s3426_s3] sm:$0xff]  }
 0x64a   :  { %v1744_v11 = vpop.f32.mrb[32].mxu0  ;;  %2691 = vmatpush3.bf16.msra.mxu1 %v2758_v3 }
 0x64b   :  { %v1978_v13 = vcombine.low %v1882_v7, %v1889_v43  ;;  %v2511_v14 = vcombine.high %v1882_v7, %v1889_v43  ;;  %v1994_v17 = vcombine.low %v1898_v8, %v1905_v9  ;;  %v2512_v0 = vcombine.high %v1898_v8, %v1905_v9  ;;  %v2676_v19 = vpop.f32.mrb[33].mxu0  ;;  %2692 = vmatprep.subr.bf16.mxu1 %v2844_v15 }
 0x64c   :  { %v1747_v21 = vpop.f32.mrb[34].mxu0 }
 0x64d   :  { %v1985_v23 = vrot.slane %v1978_v13, %v2985_v56  ;;  %v1993_v24 = vrot.slane %v2511_v14, %v2985_v56  ;;  %v2001_v25 = vrot.slane %v1994_v17, %v2985_v56  ;;  %v2009_v10 = vrot.slane %v2512_v0, %v2985_v56  ;;  %v2677_v39 = vpop.f32.mrb[35].mxu0 }
 0x64e   :  { %v1790_v22 = vpop.f32.mrb[24].mxu1 }
 0x64f   :  { %v1910_v53 = vcombine.low %v1698_v61, %v1790_v22  ;;  %v1911_v1 = vcombine.high %v1698_v61, %v1790_v22  ;;  %v2682_v26 = vpop.f32.mrb[25].mxu1  ;;  %v2011_v28 = vcombine.high %v1985_v23, %v1993_v24  ;;  %v2027_v30 = vcombine.high %v2001_v25, %v2009_v10 }
 0x650   :  { %v1793_v16 = vpop.f32.mrb[26].mxu1  ;;  %v2010_v33 = vcombine.low %v1985_v23, %v1993_v24  ;;  %v2026_v36 = vcombine.low %v2001_v25, %v2009_v10 }
 0x651   :  { %v2683_v38 = vpop.f32.mrb[27].mxu1  ;;  %v2025_v18 = vrot.slane %v2011_v28, %v2998_v4  ;;  %v2041_v34 = vrot.slane %v2027_v30, %v2998_v4  ;;  %v1918_v31 = vrot.slane %v1910_v53, %v2985_v56  ;;  %v1925_v32 = vrot.slane %v1911_v1, %v2985_v56 }
 0x652   :  { %v3295_v12 = vrot.slane %v2010_v33, %v2998_v4  ;;  %v3298_v37 = vrot.slane %v2026_v36, %v2998_v4  ;;  %v1836_v40 = vpop.f32.mrb[36].mxu0 }
 0x653   :  { %v1926_v45 = vcombine.low %v1744_v11, %v1836_v40  ;;  %v1927_v46 = vcombine.high %v1744_v11, %v1836_v40  ;;  %v2688_v47 = vpop.f32.mrb[37].mxu0  ;;  %v2044_v48 = vcombine.low %v2025_v18, %v2041_v34  ;;  %v2045_v27 = vcombine.high %v2025_v18, %v2041_v34  ;;  %v2759_v11 = vld [vmem:[%s3426_s3 + $0x8] sm:$0xff]   ;;  %s2855_s3 = smov 8   ;;  %v2515_v40 = vld [vmem:[%s3427_s4] ss:$0 sm:$0xff] }
 0x654   :  { %v2042_v20 = vcombine.low %v3295_v12, %v3298_v37  ;;  %v1839_v2 = vpop.f32.mrb[38].mxu0  ;;  %v2043_v29 = vcombine.high %v3295_v12, %v3298_v37  ;;  %2693 = vmatpush3.bf16.msra.mxu1 %v2759_v11 }
 0x655   :  { %v1934_v35 = vrot.slane %v1926_v45, %v2985_v56  ;;  %v1941_v49 = vrot.slane %v1927_v46, %v2985_v56  ;;  %v2689_v50 = vpop.f32.mrb[39].mxu0  ;;  %2706 = vmatprep.subr.bf16.mxu1 %v2844_v15 }
 0x657   :  { %v1942_v51 = vcombine.low %v1918_v31, %v1934_v35  ;;  %v1943_v52 = vcombine.high %v1918_v31, %v1934_v35  ;;  %v1958_v54 = vcombine.low %v1925_v32, %v1941_v49  ;;  %v1959_v41 = vcombine.high %v1925_v32, %v1941_v49  ;;  %v2819_v31 = vld [vmem:[%s3423_s0 + $0x8] sm:$0xff] }
 0x659   :  { %v1950_v55 = vrot.slane %v1942_v51, %v2998_v4  ;;  %v1957_v57 = vrot.slane %v1943_v52, %v2998_v4  ;;  %v1966_v58 = vrot.slane %v1958_v54, %v2998_v4  ;;  %v1973_v59 = vrot.slane %v1959_v41, %v2998_v4 }
 0x65b   :  { %v2046_v60 = vcombine.low %v1950_v55, %v1957_v57  ;;  %v2513_v61 = vcombine.high %v1950_v55, %v1957_v57  ;;  %v2062_v62 = vcombine.low %v1966_v58, %v1973_v59  ;;  %v2514_v63 = vcombine.high %v1966_v58, %v1973_v59 }
 0x65d   :  { %v2053_v5 = vrot.slane %v2046_v60, %v2985_v56  ;;  %v2061_v6 = vrot.slane %v2513_v61, %v2985_v56  ;;  %v2069_v42 = vrot.slane %v2062_v62, %v2985_v56  ;;  %v2077_v44 = vrot.slane %v2514_v63, %v2985_v56  ;;  %v2760_v61 = vld [vmem:[%s3432_s9] sm:$0xff]   ;;  %v2761_v62 = vld [vmem:[%s3432_s9 + $0x8] sm:$0xff]  }
 0x65e   :  { %2699 = vmatpush3.bf16.msra.mxu0 %v2760_v61 }
 0x65f   :  { %v2079_v7 = vcombine.high %v2053_v5, %v2061_v6  ;;  %v2095_v43 = vcombine.high %v2069_v42, %v2077_v44  ;;  %v2078_v8 = vcombine.low %v2053_v5, %v2061_v6  ;;  %v2094_v9 = vcombine.low %v2069_v42, %v2077_v44  ;;  %2700 = vmatprep.subr.bf16.mxu0 %v2844_v15 }
 0x661   :  { %v2093_v13 = vrot.slane %v2079_v7, %v2998_v4  ;;  %v2109_v14 = vrot.slane %v2095_v43, %v2998_v4  ;;  %v2086_v17 = vrot.slane %v2078_v8, %v2998_v4  ;;  %v2102_v0 = vrot.slane %v2094_v9, %v2998_v4  ;;  %v2519_v43 = vld [vmem:[%s3430_s7] ss:$0 sm:$0xff] }
 0x662   :  { %2701 = vmatpush3.bf16.msra.mxu0 %v2761_v62 }
 0x663   :  { %v2112_v56 = vcombine.low %v2093_v13, %v2109_v14  ;;  %v2111_v19 = vcombine.high %v2086_v17, %v2102_v0  ;;  %v2110_v21 = vcombine.low %v2086_v17, %v2102_v0  ;;  %v2113_v23 = vcombine.high %v2093_v13, %v2109_v14  ;;  %v2520_v14 = vld [vmem:[%s3431_s8] ss:$0 sm:$0xff] }
 0x665   :  { %v2746_v24 = vpack.i.bf16 %v2112_v56, %v2044_v48  ;;  %v2741_v25 = vpack.i.bf16 %v2111_v19, %v2043_v29  ;;  %v2751_v10 = vpack.i.bf16 %v2113_v23, %v2045_v27  ;;  %v2763_v23 = vld [vmem:[%s3434_s11 + $0x8] sm:$0xff]  }
 0x667   :  { %2747 = vrot.lane.b32.xlu0 %v2746_v24, %s2854_s27  ;;  %2742 = vrot.lane.b32.xlu1 %v2741_v25, %s2855_s3  ;;  %v2764_v24 = vld [vmem:[%s3434_s11 + $0x10] sm:$0xff]   ;;  %v2765_v25 = vld [vmem:[%s3434_s11 + $0x18] sm:$0xff]  }
 0x66b   :  { %2752 = vrot.lane.b32.xlu1 %v2751_v10, %s2856_s28  ;;  %v2766_v10 = vld [vmem:[%s3434_s11 + $0x20] sm:$0xff]  }
 0x6d9   :  { %v2748_v39 = vpop.permute.xlu0 %2747  ;;  %v2743_v22 = vpop.permute.xlu1 %2742 }
 0x6da   :  { %v2745_v4 = vunpack.i.h.bf16 %v2743_v22  ;;  %v2744_v53 = vunpack.i.l.bf16 %v2743_v22  ;;  %v2750_v1 = vunpack.i.h.bf16 %v2748_v39  ;;  %v2749_v26 = vunpack.i.l.bf16 %v2748_v39  ;;  %v2767_v39 = vld [vmem:[%s3434_s11 + $0x28] sm:$0xff]   ;;  %v2768_v22 = vld [vmem:[%s3434_s11 + $0x30] sm:$0xff]  }
 0x6dc   :  { %v2138_v16 = vsel %vm1008_vm2, %v2042_v20, %v2744_v53  ;;  %v2139_v28 = vsel %vm1008_vm2, %v2110_v21, %v2745_v4  ;;  %v2818_v20 = vld [vmem:[%s3423_s0] sm:$0xff]  ;;  %v2769_v4 = vld [vmem:[%s3434_s11 + $0x38] sm:$0xff]   ;;  %s2857_s0 = smov [#allocation2]  }
 0x6dd   :  { %v2753_v30 = vpop.permute.xlu1 %2752  ;;  %v2141_v38 = vsel %vm2140_vm4, %v2138_v16, %v2749_v26  ;;  %v2142_v18 = vsel %vm2140_vm4, %v2139_v28, %v2750_v1  ;;  %v2762_v21 = vld [vmem:[%s3434_s11] sm:$0xff]   ;;  %s2466_s4 = sshll.u32 %s2857_s0, 4  ;;  %s2467_s4 = int_to_ptr.vmem [resolvable:$true] %s2466_s4 }
 0x6de   :  { %v2755_v33 = vunpack.i.h.bf16 %v2753_v30  ;;  %v2754_v36 = vunpack.i.l.bf16 %v2753_v30  ;;  %v2521_v53 = vld [vmem:[%s3433_s10] ss:$0 sm:$0xff]  ;;  %s2820_s17 = scalar_lea.vmem %s2467_s4, 256  ;;  %p2825_p1 = scmp.lt.s32.totalorder %s2467_s4, %s2467_s4 }
 0x6df   :  { %p2821_p0 = scmp.ne.s32.totalorder %s2467_s4, %s2820_s17  ;;  %p2826_p2 = scmp.lt.s32.totalorder %s2820_s17, %s2820_s17 }
 0x6e0   :  { %v2144_v34 = vsel %vm2143_vm5, %v2141_v38, %v2754_v36  ;;  %v2145_v12 = vsel %vm2143_vm5, %v2142_v18, %v2755_v33 }
 0x6e1   :  { %v2146_v37 = vpack.c.bf16 %v2145_v12, %v2144_v34  ;;  %p2827_p3 = por %p2826_p2, %p2825_p1 }
 0x6e3   :  { %2695 = vmatmul.mubr.msk.bf16.vlgmr.msra.gmra.mrb[28].mxu1 %vm50_vm0, %v2146_v37  ;;  %p2828_p4 = pnand %p2827_p3, %p2821_p0 }
 0x6e4   :  { %2722 = vmatprep.mubr.msk.bf16.mxu1 %vm2845_vm1, %v2844_v15  ;;  %2707 = vmatpush3.bf16.msra.mxu1 %v2762_v21 }
 0x6e5   :  { %2708 = vmatprep.subr.bf16.mxu1 %v2844_v15 }
 0x6e8   :  { %2709 = vmatpush3.bf16.msra.mxu1 %v2763_v23 }
 0x6e9   :  { %2710 = vmatprep.subr.bf16.mxu1 %v2844_v15 }
 0x6ec   :  { %2711 = vmatpush3.bf16.msra.mxu1 %v2764_v24 }
 0x6ed   :  { %2712 = vmatprep.subr.bf16.mxu1 %v2844_v15 }
 0x6f0   :  { %2713 = vmatpush3.bf16.msra.mxu1 %v2765_v25 }
 0x6f1   :  { %2714 = vmatprep.subr.bf16.mxu1 %v2844_v15 }
 0x6f4   :  { %2715 = vmatpush3.bf16.msra.mxu1 %v2766_v10 }
 0x6f5   :  { %2716 = vmatprep.subr.bf16.mxu1 %v2844_v15 }
 0x6f8   :  { %2717 = vmatpush3.bf16.msra.mxu1 %v2767_v39 }
 0x6f9   :  { %2718 = vmatprep.subr.bf16.mxu1 %v2844_v15 }
 0x6fc   :  { %2719 = vmatpush3.bf16.msra.mxu1 %v2768_v22 }
 0x6fd   :  { %2720 = vmatprep.subr.bf16.mxu1 %v2844_v15 }
 0x700   :  { %2721 = vmatpush3.bf16.msra.mxu1 %v2769_v4 }
 0x7b6   :  { %v2207_v45 = vpop.f32.mrb[28].mxu1 }
 0x7b7   :  { %v2208_v46 = vadd.f32 %v2515_v40, %v2207_v45  ;;  %v2696_v47 = vpop.f32.mrb[29].mxu1 }
 0x7b8   :  { %v2210_v48 = vpop.f32.mrb[30].mxu1 }
 0x7b9   :  { %v3340_v2 = vadd.f32 %v2818_v20, %v2208_v46  ;;  %v2211_v29 = vadd.f32 %v2515_v40, %v2210_v48  ;;  %v2697_v27 = vpop.f32.mrb[31].mxu1 }
 0x7bb   :  { %v3345_v32 = vadd.f32 %v2819_v31, %v2211_v29  ;;  %v2218_v35 = vsel %vm50_vm0, %v3340_v2, 0.0  ;;  %v2527_v29 = vld [vmem:[%s3435_s12] ss:$0 sm:$0xff] }
 0x7bc   :  { %2219 = vadd.xlane.f32.xlu1 %v2218_v35 }
 0x7bd   :  { %v2221_v49 = vsel %vm50_vm0, %v3345_v32, 0.0 }
 0x7be   :  { %2222 = vadd.xlane.f32.xlu0 %v2221_v49 }
 0x849   :  { %v2220_v50 = vpop.xlane.xlu1 %2219 }
 0x84a   :  { %v2224_v51 = vmul.f32 0.03125, %v2220_v50 }
 0x84b   :  { %v2223_v52 = vpop.xlane.xlu0 %2222 }
 0x84c   :  { %v2226_v54 = vsub.f32 %v3340_v2, %v2224_v51  ;;  %v2225_v41 = vmul.f32 0.03125, %v2223_v52 }
 0x84e   :  { %v2227_v55 = vsub.f32 %v3345_v32, %v2225_v41  ;;  %v2228_v57 = vmul.f32 %v2226_v54, %v2226_v54 }
 0x850   :  { %v2230_v58 = vsel %vm50_vm0, %v2228_v57, 0.0  ;;  %v2229_v59 = vmul.f32 %v2227_v55, %v2227_v55 }
 0x851   :  { %2231 = vadd.xlane.f32.xlu0 %v2230_v58 }
 0x852   :  { %v2233_v60 = vsel %vm50_vm0, %v2229_v59, 0.0 }
 0x853   :  { %2234 = vadd.xlane.f32.xlu1 %v2233_v60 }
 0x8de   :  { %v2232_v63 = vpop.xlane.xlu0 %2231 }
 0x8df   :  { %v2236_v3 = vmul.f32 0.03125, %v2232_v63 }
 0x8e0   :  { %v2235_v5 = vpop.xlane.xlu1 %2234 }
 0x8e1   :  { %v2238_v6 = vadd.f32 1e-05, %v2236_v3  ;;  %v2237_v42 = vmul.f32 0.03125, %v2235_v5 }
 0x8e3   :  { %2806 = vrsqrt.f32 %v2238_v6  ;;  %v2239_v44 = vadd.f32 1e-05, %v2237_v42 }
 0x8e5   :  { %2808 = vrsqrt.f32 %v2239_v44 }
 0x8ed   :  { %v2807_v7 = vpop.eup %2806 }
 0x8ee   :  { %v2242_v8 = vmul.f32 %v2807_v7, %v2226_v54 }
 0x8ef   :  { %v2809_v9 = vpop.eup %2808 }
 0x8f0   :  { %v2250_v11 = vmul.f32 %v2519_v43, %v2242_v8  ;;  %v2243_v13 = vmul.f32 %v2809_v9, %v2227_v55 }
 0x8f2   :  { %v2251_v17 = vmul.f32 %v2519_v43, %v2243_v13  ;;  %v2258_v0 = vadd.f32 %v2520_v14, %v2250_v11 }
 0x8f4   :  { %v2259_v56 = vadd.f32 %v2520_v14, %v2251_v17 }
 0x8f6   :  { %v2260_v19 = vpack.c.bf16 %v2259_v56, %v2258_v0 }
 0x8f8   :  { %2703 = vmatmul.mubr.msk.bf16.vlgmr.msra.gmra.mrb[40].mxu0 %vm50_vm0, %v2260_v19 }
 0x9cb   :  { %v2321_v1 = vpop.f32.mrb[40].mxu0 }
 0x9cc   :  { %v2322_v26 = vadd.f32 %v2521_v53, %v2321_v1  ;;  %v2704_v16 = vpop.f32.mrb[41].mxu0 }
 0x9cd   :  { %v2324_v28 = vpop.f32.mrb[42].mxu0 }
 0x9ce   :  { %v2525_v30 = vmul.f32 -1.702, %v2322_v26  ;;  %v2325_v33 = vadd.f32 %v2521_v53, %v2324_v28  ;;  %v2705_v36 = vpop.f32.mrb[43].mxu0 }
 0x9d0   :  { %v2332_v38 = vmul.f32 1.442695, %v2525_v30  ;;  %v2526_v18 = vmul.f32 -1.702, %v2325_v33 }
 0x9d2   :  { %2810 = vpow2.f32 %v2332_v38  ;;  %v2334_v15 = vmul.f32 1.442695, %v2526_v18 }
 0x9d4   :  { %2812 = vpow2.f32 %v2334_v15 }
 0x9dc   :  { %v2811_v34 = vpop.eup %2810 }
 0x9dd   :  { %v2336_v12 = vadd.f32 1.0, %v2811_v34 }
 0x9de   :  { %v2813_v37 = vpop.eup %2812 }
 0x9df   :  { %2814 = vrcp.f32 %v2336_v12  ;;  %v2337_v40 = vadd.f32 1.0, %v2813_v37 }
 0x9e1   :  { %2816 = vrcp.f32 %v2337_v40 }
 0x9e9   :  { %v2815_v45 = vpop.eup %2814 }
 0x9ea   :  { %v2342_v47 = vmul.f32 %v2815_v45, %v2322_v26 }
 0x9eb   :  { %v2817_v46 = vpop.eup %2816 }
 0x9ec   :  { %v2343_v48 = vmul.f32 %v2817_v46, %v2325_v33 }
 0x9ee   :  { %v2344_v20 = vpack.c.bf16 %v2343_v48, %v2342_v47 }
 0x9f0   :  { %2723 = vmatmul.mubr.bf16.vlgmr.msra.gmra.mrb[32].mxu1 %v2344_v20 }
 0xac3   :  { %v2450_v27 = vpop.f32.mrb[32].mxu1 }
 0xac4   :  { %v2451_v31 = vadd.f32 %v2527_v29, %v2450_v27  ;;  %v2724_v35 = vpop.f32.mrb[33].mxu1 }
 0xac5   :  { %v2453_v49 = vpop.f32.mrb[34].mxu1 }
 0xac6   :  { %v2457_v50 = vadd.f32 %v2451_v31, %v3340_v2  ;;  %v2454_v51 = vadd.f32 %v2527_v29, %v2453_v49  ;;  %v2725_v52 = vpop.f32.mrb[35].mxu1 }
 0xac8   :  { %2459 = vst.msk [vmem:[#allocation2] sm:$0xff] %vm50_vm0, %v2457_v50  ;;  %v2458_v54 = vadd.f32 %v2454_v51, %v3345_v32 }
 0xaca   :  { %2460 = vst.msk [vmem:[#allocation2 + $0x8] sm:$0xff] %vm50_vm0, %v2458_v54 }
 0xacb   :  { %2831 = shalt.err (!%p2828_p4)
}
 0xacc   :  { %s2832_s19 = scalar_lea.hbm %s3436_s13, 256 }
 0xacd   :  { %p2833_p5 = scmp.ne.s32.totalorder %s3436_s13, %s2832_s19  ;;  %p2836_p6 = scmp.lt.u32.totalorder %s2832_s19, %s3436_s13 }
 0xacf   :  { %p2838_p7 = pnand %p2836_p6, %p2833_p5 }
 0xad1   :  { %2841 = shalt.err (!%p2838_p7)
}
 0xad2   :  { %s2858_s21 = smov 128  }
 0xad3   :  { %2472 = dma.vmem_to_hbm [thread:$0]  %s2467_s4, 256, %s3436_s13, [#allocation3], %s2858_s21, %s2858_s21, %s2855_s3  }
 0xad4   :  { %2842 = dma.done.wait [#allocation3], 256  }
 0xad5   :  { %2843 = vsyncadd [#allocation3], 4294967040 }
 0xad6   :  { %2476 = vsyncpa [#allocation3], 1 }

</bundles_post_ra>
